<compile_context>
chip_gen: v5e
topology: v5e:2x2
jax: 0.10.0
libtpu: 0.0.40
codegen_flags: <defaults>
</compile_context>

<pallas_src>
import math
from functools import partial

import jax
import jax.numpy as jnp
import numpy as np
from jax import lax
from jax.experimental import pallas as pl
from jax.experimental.pallas import tpu as pltpu

_NEG_BIG = -1e30  # finite mask bias (see note above)


# ------------------------------- small helpers --------------------------------

def _pick_tile(n, candidates):
    """Largest candidate tile that divides n with >= 2 grid steps, else n."""
    for t in candidates:
        if n % t == 0 and n // t >= 2:
            return t
    return n


def _vmem_limit(n_bytes):
    """Scoped-VMEM hint: estimate * 1.4 + 2 MiB, clamped to [32 MiB, 96 MiB]."""
    return int(min(max(n_bytes * 1.4 + (2 << 20), 32 << 20), 96 << 20))


def _softmax_lastdim(s, approx_recip):
    m = jnp.max(s, axis=-1, keepdims=True)
    p = jnp.exp(s - m)
    return p * pl.reciprocal(jnp.sum(p, axis=-1, keepdims=True),
                             approx=approx_recip)


# --------------------------- fused MHA + LN kernel -----------------------------

def _mha_ln_kernel(q_ref, kv_ref, bias_ref, wqt_ref, bq_ref, wkvt_ref, bkv_ref,
                   wo_ref, bo_ref, g_ref, bt_ref, o_ref, att_ref=None, *,
                   n_heads, head_dim, scale, causal, approx_recip, batched_heads):
    """One grid step = one (batch, query-tile). All heads processed together.

    q_ref  : [1, tq, D]  query-side input (also the residual branch), f32
    kv_ref : [1, Lk, D]  key/value-side input, f32
    bias_ref: [1, mq, Lk] additive mask bias (mq in {1, tq}); ignored if causal
    wqt_ref : [D, D]   Wq^T      (compute dtype)
    wkvt_ref: [2D, D]  [Wk|Wv]^T (compute dtype)
    o_ref  : [1, tq, D]  LayerNorm(q_in + attn_out)
    att_ref: [1, H, tq, Lk] optional attention probabilities
    """
    d_model = n_heads * head_dim
    cdt = wqt_ref.dtype
    x = q_ref[0]                          # [tq, D] f32
    tq = x.shape[0]
    lk = kv_ref.shape[1]
    xc = x.astype(cdt)
    kvc = kv_ref[0].astype(cdt)

    # Projections in transposed layout: qT[o, l] = sum_i Wq[i, o] * x[l, i].
    # The per-head view [H, hd, L] is then a leading-dim (sublane-aligned) reshape,
    # so no lane slices / lane concat are needed anywhere.
    qT = lax.dot_general(wqt_ref[...], xc, (((1,), (1,)), ((), ())),
                         preferred_element_type=jnp.float32) + bq_ref[...]
    kvT = lax.dot_general(wkvt_ref[...], kvc, (((1,), (1,)), ((), ())),
                          preferred_element_type=jnp.float32) + bkv_ref[...]
    q_h = qT.astype(cdt).reshape(n_heads, head_dim, tq)
    k_h = kvT[:d_model].astype(cdt).reshape(n_heads, head_dim, lk)
    v_h = kvT[d_model:].astype(cdt).reshape(n_heads, head_dim, lk)

    if causal:
        # causal structure generated on the VPU -- no mask DMA per grid step
        row = (pl.program_id(1) * tq
               + lax.broadcasted_iota(jnp.int32, (tq, lk), 0))
        col = lax.broadcasted_iota(jnp.int32, (tq, lk), 1)
        bias2d = jnp.where(col > row, jnp.float32(_NEG_BIG), jnp.float32(0.0))
    else:
        bias2d = bias_ref[0]              # [mq, Lk], mq in {1, tq}

    if batched_heads:
        # scores[h, q, k] = sum_d q_h[h, d, q] * k_h[h, d, k]  (one batched matmul)
        s = lax.dot_general(q_h, k_h, (((1,), (1,)), ((0,), (0,))),
                            preferred_element_type=jnp.float32)
        att = _softmax_lastdim(s * scale + bias2d[None], approx_recip)
        if att_ref is not None:
            att_ref[0] = att.astype(att_ref.dtype)
        # ctxT[h, d, q] = sum_k v_h[h, d, k] * att[h, q, k]
        ctxT = lax.dot_general(v_h, att.astype(cdt), (((2,), (2,)), ((0,), (0,))),
                               preferred_element_type=jnp.float32)
        ctxT = ctxT.astype(cdt).reshape(d_model, tq)
    else:
        # fallback path: per-head 2-D matmuls on sublane-aligned head slices
        rows = []
        for h in range(n_heads):
            sh = lax.dot_general(q_h[h], k_h[h], (((0,), (0,)), ((), ())),
                                 preferred_element_type=jnp.float32)
            ah = _softmax_lastdim(sh * scale + bias2d, approx_recip)
            if att_ref is not None:
                att_ref[0, h] = ah.astype(att_ref.dtype)
            rows.append(lax.dot_general(v_h[h], ah.astype(cdt),
                                        (((1,), (1,)), ((), ())),
                                        preferred_element_type=jnp.float32))
        ctxT = jnp.concatenate(rows, axis=0).astype(cdt)     # sublane concat

    attn_out = lax.dot_general(ctxT, wo_ref[...], (((0,), (0,)), ((), ())),
                               preferred_element_type=jnp.float32) + bo_ref[...]

    # residual + LayerNorm (eps = 1e-5), fused, all in f32
    s_res = x.astype(jnp.float32) + attn_out
    mu = jnp.mean(s_res, axis=-1, keepdims=True)
    var = jnp.mean(jnp.square(s_res - mu), axis=-1, keepdims=True)
    o_ref[0] = ((s_res - mu) * lax.rsqrt(var + 1e-5) * g_ref[...]
                + bt_ref[...]).astype(o_ref.dtype)


def mha_ln_block(q_in, kv_in, p, gamma, beta, mask, n_heads, *, with_attn,
                 causal=False, compute_dtype=jnp.bfloat16):
    """LayerNorm(q_in + MHA(q_in, kv_in, kv_in)) and optional attention probs."""
    B, Lq, D = q_in.shape
    Lk = kv_in.shape[1]
    hd = D // n_heads
    scale = 1.0 / math.sqrt(hd)
    cdt = compute_dtype
    approx_recip = jnp.dtype(cdt) != jnp.dtype(jnp.float32)

    # query-tile grid axis (>1 step per batch element at real sizes; 1 at the demo)
    tq = _pick_tile(Lq, (512, 256, 128, 64, 32, 16, 8))
    nq = Lq // tq

    # mask -> additive bias, computed once on the host, un-broadcast [B, mq, Lk]
    if causal or mask is None:
        bias3 = jnp.zeros((B, 1, Lk), jnp.float32)
    else:
        m = jnp.asarray(mask)
        while m.ndim < 4:
            m = m[None]
        if m.shape[1] != 1:
            raise ValueError("per-head attention masks are not supported")
        mq = 1 if m.shape[2] == 1 else Lq
        m3 = jnp.broadcast_to(m, (B, 1, mq, Lk)).reshape(B, mq, Lk)
        bias3 = jnp.where(m3 == 0, jnp.float32(_NEG_BIG), jnp.float32(0.0))
    mq = bias3.shape[1]

    # one-off host-side weight prep: transpose for the in-kernel layout and cast
    # to the matmul compute dtype (bf16: ~2x MXU, half the weight DMA/VMEM bytes)
    wq_t = p["wq"].T.astype(cdt)
    wkv_t = p["wkv"].T.astype(cdt)
    wo_c = p["wo"].astype(cdt)
    bq2 = p["bq"].reshape(D, 1).astype(jnp.float32)
    bkv2 = p["bkv"].reshape(2 * D, 1).astype(jnp.float32)
    bo2 = p["bo"].reshape(1, D).astype(jnp.float32)
    g2 = gamma.reshape(1, D).astype(jnp.float32)
    b2 = beta.reshape(1, D).astype(jnp.float32)

    csize = jnp.dtype(cdt).itemsize
    vmem = _vmem_limit(
        4 * D * D * csize + 8 * D * 4                 # resident weights + biases
        + 2 * (2 * tq * D + Lk * D) * 4               # double-buffered act tiles
        + 2 * mq * Lk * 4                             # mask-bias tiles
        + (2 * int(with_attn) + 4) * n_heads * tq * Lk * 4)  # att out + temporaries

    args = (q_in, kv_in, bias3, wq_t, bq2, wkv_t, bkv2, wo_c, bo2, g2, b2)

    def build(single_buffer_weights, batched_heads):
        wkw = ({"pipeline_mode": pl.Buffered(1)} if single_buffer_weights else {})

        def wspec(shape):
            nd = len(shape)
            return pl.BlockSpec(shape, lambda b, qi: (0,) * nd, **wkw)

        bias_idx = ((lambda b, qi: (b, qi, 0)) if mq == Lq
                    else (lambda b, qi: (b, 0, 0)))
        in_specs = [
            pl.BlockSpec((1, tq, D), lambda b, qi: (b, qi, 0)),   # q_in
            pl.BlockSpec((1, Lk, D), lambda b, qi: (b, 0, 0)),    # kv_in
            pl.BlockSpec((1, tq if mq == Lq else 1, Lk), bias_idx),
            wspec((D, D)), wspec((D, 1)),                         # WqT, bq
            wspec((2 * D, D)), wspec((2 * D, 1)),                 # WkvT, bkv
            wspec((D, D)), wspec((1, D)),                         # Wo, bo
            wspec((1, D)), wspec((1, D)),                         # gamma, beta
        ]
        if with_attn:
            out_shape = (jax.ShapeDtypeStruct((B, Lq, D), q_in.dtype),
                         jax.ShapeDtypeStruct((B, n_heads, Lq, Lk), jnp.float32))
            out_specs = (pl.BlockSpec((1, tq, D), lambda b, qi: (b, qi, 0)),
                         pl.BlockSpec((1, n_heads, tq, Lk),
                                      lambda b, qi: (b, 0, qi, 0)))
        else:
            out_shape = jax.ShapeDtypeStruct((B, Lq, D), q_in.dtype)
            out_specs = pl.BlockSpec((1, tq, D), lambda b, qi: (b, qi, 0))

        kernel = partial(_mha_ln_kernel, n_heads=n_heads, head_dim=hd,
                         scale=scale, causal=causal, approx_recip=approx_recip,
                         batched_heads=batched_heads)
        return pl.pallas_call(
            kernel, out_shape=out_shape, grid=(B, nq),
            in_specs=in_specs, out_specs=out_specs,
            compiler_params=pltpu.CompilerParams(
                dimension_semantics=("parallel", "parallel"),
                vmem_limit_bytes=vmem))

    # preferred config first; fall back if this jax/libtpu combination rejects
    # single-buffered weight blocks or the batched head dot_general.
    last_err = None
    res = None
    for cfg in ((True, True), (False, True), (True, False), (False, False)):
        try:
            res = build(*cfg)(*args)
            break
        except Exception as e:   # pragma: no cover - version dependent
            last_err = e
    else:
        raise last_err
    return res if with_attn else (res, None)


# --------------------------- fused FFN + LN kernel -----------------------------

def _ffn_ln_kernel(x_ref, w1_ref, b1_ref, w2_ref, b2_ref, g_ref, bt_ref,
                   o_ref, acc_ref):
    """Grid = (row tiles, hidden tiles). acc accumulates relu(xW1+b1)W2 over F."""
    j = pl.program_id(1)
    nj = pl.num_programs(1)

    @pl.when(j == 0)
    def _():
        acc_ref[...] = jnp.zeros_like(acc_ref)

    cdt = w1_ref.dtype
    x = x_ref[...]
    h = jnp.dot(x.astype(cdt), w1_ref[...],
                preferred_element_type=jnp.float32) + b1_ref[...]
    h = jnp.maximum(h, 0.0)
    acc_ref[...] += jnp.dot(h.astype(cdt), w2_ref[...],
                            preferred_element_type=jnp.float32)

    @pl.when(j == nj - 1)
    def _():
        s = x.astype(jnp.float32) + acc_ref[...] + b2_ref[...]
        mu = jnp.mean(s, axis=-1, keepdims=True)
        var = jnp.mean(jnp.square(s - mu), axis=-1, keepdims=True)
        o_ref[...] = ((s - mu) * lax.rsqrt(var + 1e-5) * g_ref[...]
                      + bt_ref[...]).astype(o_ref.dtype)


def ffn_ln_block(x, w1, b1, w2, b2, gamma, beta, *, compute_dtype=jnp.bfloat16):
    """x: [B, L, D] -> LayerNorm(x + FFN(x)); tiled over rows (M) and hidden (F)."""
    B, L, D = x.shape
    M = B * L
    F = w1.shape[1]
    cdt = compute_dtype
    x2d = x.reshape(M, D)

    tm = _pick_tile(M, (512, 256, 128, 64, 32, 16, 8))
    tf = _pick_tile(F, (1024, 512, 256, 128))        # F tiling (v7x 64 MiB VMEM)
    nf = F // tf

    w1c = w1.astype(cdt)
    w2c = w2.astype(cdt)
    b1r = b1.reshape(1, F).astype(jnp.float32)
    b2r = b2.reshape(1, D).astype(jnp.float32)
    gr = gamma.reshape(1, D).astype(jnp.float32)
    br = beta.reshape(1, D).astype(jnp.float32)

    csize = jnp.dtype(cdt).itemsize
    vmem = _vmem_limit(2 * (D * tf + tf * D) * csize       # w1/w2 tiles (2-buffered)
                       + 2 * (2 * tm * D * 4 + tm * tf * 4)  # x/out tiles + hidden
                       + tm * D * 4)                          # accumulator

    args = (x2d, w1c, b1r, w2c, b2r, gr, br)

    def build(single_buffer_weights):
        wkw = ({"pipeline_mode": pl.Buffered(1)} if single_buffer_weights else {})
        return pl.pallas_call(
            _ffn_ln_kernel,
            out_shape=jax.ShapeDtypeStruct((M, D), x.dtype),
            grid=(M // tm, nf),
            in_specs=[
                pl.BlockSpec((tm, D), lambda i, j: (i, 0)),   # x rows
                pl.BlockSpec((D, tf), lambda i, j: (0, j)),   # w1 column block
                pl.BlockSpec((1, tf), lambda i, j: (0, j)),   # b1 block
                pl.BlockSpec((tf, D), lambda i, j: (j, 0)),   # w2 row block
                pl.BlockSpec((1, D), lambda i, j: (0, 0), **wkw),  # b2
                pl.BlockSpec((1, D), lambda i, j: (0, 0), **wkw),  # gamma
                pl.BlockSpec((1, D), lambda i, j: (0, 0), **wkw),  # beta
            ],
            out_specs=pl.BlockSpec((tm, D), lambda i, j: (i, 0)),
            scratch_shapes=[pltpu.VMEM((tm, D), jnp.float32)],
            compiler_params=pltpu.CompilerParams(
                dimension_semantics=("parallel", "arbitrary"),
                vmem_limit_bytes=vmem))

    try:
        out = build(True)(*args)
    except Exception:             # pragma: no cover - version dependent
        out = build(False)(*args)
    return out.reshape(B, L, D)


# ------------------------------- decoder layer ---------------------------------

def decoder_layer(params, tgt, enc_out, tgt_mask=None, src_mask=None, *,
                  n_heads=4, compute_dtype=jnp.bfloat16, tgt_is_causal=False):
    """DecoderLayer.forward: returns (out [B,Lt,D], cross-attention probabilities)."""
    # masked self-attention + residual + LayerNorm (attention probs not emitted)
    x, _ = mha_ln_block(tgt, tgt, params["self_attn"], params["ln1_g"],
                        params["ln1_b"], None if tgt_is_causal else tgt_mask,
                        n_heads, with_attn=False, causal=tgt_is_causal,
                        compute_dtype=compute_dtype)
    # cross-attention over the encoder output + residual + LayerNorm
    x, attn_w = mha_ln_block(x, enc_out, params["cross_attn"], params["ln2_g"],
                             params["ln2_b"], src_mask, n_heads,
                             with_attn=True, causal=False,
                             compute_dtype=compute_dtype)
    # position-wise feed forward + residual + LayerNorm
    out = ffn_ln_block(x, params["ff_w1"], params["ff_b1"], params["ff_w2"],
                       params["ff_b2"], params["ln3_g"], params["ln3_b"],
                       compute_dtype=compute_dtype)
    return out, attn_w


# -------------------------------- param init -----------------------------------

def init_mha_params(key, d_model):
    ks = jax.random.split(key, 4)

    def lin(k):
        return 0.05 * jax.random.normal(k, (d_model, d_model), jnp.float32)

    wk, wv = lin(ks[1]), lin(ks[2])
    return {
        "wq": lin(ks[0]), "bq": jnp.zeros((d_model,), jnp.float32),
        "wkv": jnp.concatenate([wk, wv], axis=1),          # [D, 2D]
        "bkv": jnp.zeros((2 * d_model,), jnp.float32),
        "wo": lin(ks[3]), "bo": jnp.zeros((d_model,), jnp.float32),
    }


def init_params(key, d_model, dim_feedforward):
    k1, k2, k3, k4 = jax.random.split(key, 4)
    return {
        "self_attn": init_mha_params(k1, d_model),
        "cross_attn": init_mha_params(k2, d_model),
        "ff_w1": 0.05 * jax.random.normal(k3, (d_model, dim_feedforward),
                                          jnp.float32),
        "ff_b1": jnp.zeros((dim_feedforward,), jnp.float32),
        "ff_w2": 0.05 * jax.random.normal(k4, (dim_feedforward, d_model),
                                          jnp.float32),
        "ff_b2": jnp.zeros((d_model,), jnp.float32),
        "ln1_g": jnp.ones((d_model,), jnp.float32),
        "ln1_b": jnp.zeros((d_model,), jnp.float32),
        "ln2_g": jnp.ones((d_model,), jnp.float32),
        "ln2_b": jnp.zeros((d_model,), jnp.float32),
        "ln3_g": jnp.ones((d_model,), jnp.float32),
        "ln3_b": jnp.zeros((d_model,), jnp.float32),
    }


# ----------------------------- pure-JAX reference ------------------------------

def _ref_mha(q, k, v, p, mask, n_heads):
    B, Lq, d = q.shape
    Lk = k.shape[1]
    hd = d // n_heads
    Q = (q @ p["wq"] + p["bq"]).reshape(B, Lq, n_heads, hd).transpose(0, 2, 1, 3)
    K = (k @ p["wkv"][:, :d] + p["bkv"][:d]
         ).reshape(B, Lk, n_heads, hd).transpose(0, 2, 1, 3)
    V = (v @ p["wkv"][:, d:] + p["bkv"][d:]
         ).reshape(B, Lk, n_heads, hd).transpose(0, 2, 1, 3)
    e = jnp.einsum("bhqd,bhkd->bhqk", Q, K) / math.sqrt(hd)
    if mask is not None:
        e = jnp.where(mask == 0, -jnp.inf, e)
    a = jax.nn.softmax(e, axis=-1)
    x = jnp.einsum("bhqk,bhkd->bhqd", a, V).transpose(0, 2, 1, 3).reshape(B, Lq, d)
    return x @ p["wo"] + p["bo"], a


def _ref_ln(x, g, b):
    mu = jnp.mean(x, axis=-1, keepdims=True)
    var = jnp.mean(jnp.square(x - mu), axis=-1, keepdims=True)
    return (x - mu) * jax.lax.rsqrt(var + 1e-5) * g + b


def _ref_decoder(params, tgt, enc, tgt_mask, src_mask, n_heads):
    sa, _ = _ref_mha(tgt, tgt, tgt, params["self_attn"], tgt_mask, n_heads)
    x = _ref_ln(tgt + sa, params["ln1_g"], params["ln1_b"])
    ca, aw = _ref_mha(x, enc, enc, params["cross_attn"], src_mask, n_heads)
    x = _ref_ln(x + ca, params["ln2_g"], params["ln2_b"])
    ff = (jnp.maximum(x @ params["ff_w1"] + params["ff_b1"], 0.0)
          @ params["ff_w2"] + params["ff_b2"])
    return _ref_ln(x + ff, params["ln3_g"], params["ln3_b"]), aw


# ------------------------------------ main --------------------------------------

if __name__ == "__main__":
    # NOTE: demo shapes are far below the (8,128) vreg tile / MXU dimension; real
    # benchmarking should use D, Lk, F as multiples of 128 (see review).
    B, tgt_len, src_len = 2, 8, 8
    d_model, n_heads, dim_feedforward = 32, 4, 64

    key = jax.random.PRNGKey(0)
    kp, kt, ke = jax.random.split(key, 3)
    params = init_params(kp, d_model, dim_feedforward)

    tgt = jax.random.normal(kt, (B, tgt_len, d_model), jnp.float32)
    enc_out = jax.random.normal(ke, (B, src_len, d_model), jnp.float32)

    # causal target mask [B,1,Lt,Lt]; padding source mask [B,1,1,Ls]
    tgt_mask = jnp.tril(jnp.ones((tgt_len, tgt_len), jnp.float32))[None, None]
    tgt_mask = jnp.broadcast_to(tgt_mask, (B, 1, tgt_len, tgt_len))
    src_mask = jnp.ones((B, 1, 1, src_len), jnp.float32).at[:, :, :, -2:].set(0.0)

    ref_out, ref_aw = _ref_decoder(params, tgt, enc_out, tgt_mask, src_mask,
                                   n_heads)

    # exact path: f32 matmuls, explicit (general) masks
    out32, aw32 = decoder_layer(params, tgt, enc_out, tgt_mask, src_mask,
                                n_heads=n_heads, compute_dtype=jnp.float32,
                                tgt_is_causal=False)
    out32, aw32 = jax.block_until_ready((out32, aw32))
    np.testing.assert_allclose(np.asarray(out32), np.asarray(ref_out),
                               rtol=1e-4, atol=1e-4)
    np.testing.assert_allclose(np.asarray(aw32), np.asarray(ref_aw),
                               rtol=1e-4, atol=1e-4)

    # fast path: bf16 matmul operands (f32 accumulation / softmax / LayerNorm),
    # causal self-attention mask generated in-kernel
    outbf, awbf = decoder_layer(params, tgt, enc_out, tgt_mask, src_mask,
                                n_heads=n_heads, compute_dtype=jnp.bfloat16,
                                tgt_is_causal=True)
    outbf, awbf = jax.block_until_ready((outbf, awbf))
    np.testing.assert_allclose(np.asarray(outbf), np.asarray(ref_out),
                               rtol=5e-2, atol=5e-2)
    np.testing.assert_allclose(np.asarray(awbf), np.asarray(ref_aw),
                               rtol=5e-2, atol=5e-2)

    assert outbf.shape == (B, tgt_len, d_model)
    assert awbf.shape == (B, n_heads, tgt_len, src_len)
    print("KERNEL_OK")
</pallas_src>

<mosaic_0001>
module attributes {stable_mosaic.version = 11 : i64} {
  func.func @_mha_ln_kernel(%arg0: i32, %arg1: i32, %arg2: memref<1x8x32xf32, #tpu.memory_space<vmem>>, %arg3: memref<1x8x32xf32, #tpu.memory_space<vmem>>, %arg4: memref<1x8x8xf32, #tpu.memory_space<vmem>>, %arg5: memref<32x32xf32, #tpu.memory_space<vmem>>, %arg6: memref<32x1xf32, #tpu.memory_space<vmem>>, %arg7: memref<64x32xf32, #tpu.memory_space<vmem>>, %arg8: memref<64x1xf32, #tpu.memory_space<vmem>>, %arg9: memref<32x32xf32, #tpu.memory_space<vmem>>, %arg10: memref<1x32xf32, #tpu.memory_space<vmem>>, %arg11: memref<1x32xf32, #tpu.memory_space<vmem>>, %arg12: memref<1x32xf32, #tpu.memory_space<vmem>>, %arg13: memref<1x8x32xf32, #tpu.memory_space<vmem>>) attributes {dimension_semantics = [#tpu.dimension_semantics<parallel>, #tpu.dimension_semantics<parallel>], iteration_bounds = array<i64: 2, 1>, scalar_prefetch = 0 : i64, scratch_operands = 0 : i64, tpu.core_type = #tpu.core_type<tc>, window_params = [{transform_indices = @transform_0, window_bounds = array<i64: 1, 8, 32>}, {transform_indices = @transform_1, window_bounds = array<i64: 1, 8, 32>}, {transform_indices = @transform_2, window_bounds = array<i64: 1, 8, 8>}, {pipeline_mode = #tpu.pipeline_mode<synchronous>, transform_indices = @transform_3, window_bounds = array<i64: 32, 32>}, {pipeline_mode = #tpu.pipeline_mode<synchronous>, transform_indices = @transform_4, window_bounds = array<i64: 32, 1>}, {pipeline_mode = #tpu.pipeline_mode<synchronous>, transform_indices = @transform_5, window_bounds = array<i64: 64, 32>}, {pipeline_mode = #tpu.pipeline_mode<synchronous>, transform_indices = @transform_6, window_bounds = array<i64: 64, 1>}, {pipeline_mode = #tpu.pipeline_mode<synchronous>, transform_indices = @transform_7, window_bounds = array<i64: 32, 32>}, {pipeline_mode = #tpu.pipeline_mode<synchronous>, transform_indices = @transform_8, window_bounds = array<i64: 1, 32>}, {pipeline_mode = #tpu.pipeline_mode<synchronous>, transform_indices = @transform_9, window_bounds = array<i64: 1, 32>}, {pipeline_mode = #tpu.pipeline_mode<synchronous>, transform_indices = @transform_10, window_bounds = array<i64: 1, 32>}, {transform_indices = @transform_11, window_bounds = array<i64: 1, 8, 32>}]} {
    %c0 = arith.constant 0 : index
    %c0_0 = arith.constant 0 : index
    %c0_1 = arith.constant 0 : index
    %0 = vector.load %arg2[%c0, %c0_0, %c0_1] : memref<1x8x32xf32, #tpu.memory_space<vmem>>, vector<1x8x32xf32>
    %1 = vector.shape_cast %0 : vector<1x8x32xf32> to vector<8x32xf32>
    %c0_2 = arith.constant 0 : index
    %c0_3 = arith.constant 0 : index
    %c0_4 = arith.constant 0 : index
    %2 = vector.load %arg3[%c0_2, %c0_3, %c0_4] : memref<1x8x32xf32, #tpu.memory_space<vmem>>, vector<1x8x32xf32>
    %3 = vector.shape_cast %2 : vector<1x8x32xf32> to vector<8x32xf32>
    %c0_5 = arith.constant 0 : index
    %c0_6 = arith.constant 0 : index
    %4 = vector.load %arg5[%c0_5, %c0_6] : memref<32x32xf32, #tpu.memory_space<vmem>>, vector<32x32xf32>
    %cst = arith.constant dense<0.000000e+00> : vector<32x8xf32>
    %5 = tpu.matmul %4, %1, %cst {dimension_numbers = #tpu.dot_dimension_numbers<[1], [1], [0], [0], [0, 0, 1, 0], [], []>} : vector<32x32xf32>, vector<8x32xf32>, vector<32x8xf32> -> vector<32x8xf32>
    %c0_7 = arith.constant 0 : index
    %c0_8 = arith.constant 0 : index
    %6 = vector.load %arg6[%c0_7, %c0_8] : memref<32x1xf32, #tpu.memory_space<vmem>>, vector<32x1xf32>
    %7 = vector.broadcast %6 : vector<32x1xf32> to vector<32x8xf32>
    %8 = arith.addf %5, %7 : vector<32x8xf32>
    %c0_9 = arith.constant 0 : index
    %c0_10 = arith.constant 0 : index
    %9 = vector.load %arg7[%c0_9, %c0_10] : memref<64x32xf32, #tpu.memory_space<vmem>>, vector<64x32xf32>
    %cst_11 = arith.constant dense<0.000000e+00> : vector<64x8xf32>
    %10 = tpu.matmul %9, %3, %cst_11 {dimension_numbers = #tpu.dot_dimension_numbers<[1], [1], [0], [0], [0, 0, 1, 0], [], []>} : vector<64x32xf32>, vector<8x32xf32>, vector<64x8xf32> -> vector<64x8xf32>
    %c0_12 = arith.constant 0 : index
    %c0_13 = arith.constant 0 : index
    %11 = vector.load %arg8[%c0_12, %c0_13] : memref<64x1xf32, #tpu.memory_space<vmem>>, vector<64x1xf32>
    %12 = vector.broadcast %11 : vector<64x1xf32> to vector<64x8xf32>
    %13 = arith.addf %10, %12 : vector<64x8xf32>
    %14 = vector.shape_cast %8 : vector<32x8xf32> to vector<4x8x8xf32>
    %15 = vector.extract_strided_slice %13 {offsets = [0, 0], sizes = [32, 8], strides = [1, 1]} : vector<64x8xf32> to vector<32x8xf32>
    %16 = vector.shape_cast %15 : vector<32x8xf32> to vector<4x8x8xf32>
    %17 = vector.extract_strided_slice %13 {offsets = [32, 0], sizes = [32, 8], strides = [1, 1]} : vector<64x8xf32> to vector<32x8xf32>
    %18 = vector.shape_cast %17 : vector<32x8xf32> to vector<4x8x8xf32>
    %c0_14 = arith.constant 0 : index
    %c0_15 = arith.constant 0 : index
    %c0_16 = arith.constant 0 : index
    %19 = vector.load %arg4[%c0_14, %c0_15, %c0_16] : memref<1x8x8xf32, #tpu.memory_space<vmem>>, vector<1x8x8xf32>
    %20 = vector.shape_cast %19 : vector<1x8x8xf32> to vector<8x8xf32>
    %cst_17 = arith.constant dense<0.000000e+00> : vector<4x8x8xf32>
    %21 = tpu.matmul %14, %16, %cst_17 {dimension_numbers = #tpu.dot_dimension_numbers<[1], [1], [2], [2], [0, 0, 0, 2, 1, 2], [0], [0]>} : vector<4x8x8xf32>, vector<4x8x8xf32>, vector<4x8x8xf32> -> vector<4x8x8xf32>
    %cst_18 = arith.constant 0.353553385 : f32
    %22 = vector.broadcast %cst_18 : f32 to vector<4x8x8xf32>
    %23 = arith.mulf %21, %22 : vector<4x8x8xf32>
    %24 = vector.shape_cast %20 : vector<8x8xf32> to vector<1x8x8xf32>
    %25 = vector.broadcast %24 : vector<1x8x8xf32> to vector<4x8x8xf32>
    %26 = arith.addf %23, %25 : vector<4x8x8xf32>
    %cst_19 = arith.constant dense<0xFF800000> : vector<4x8xf32>
    %27 = vector.multi_reduction <maximumf>, %26, %cst_19 [2] : vector<4x8x8xf32> to vector<4x8xf32>
    %28 = vector.shape_cast %27 : vector<4x8xf32> to vector<4x8x1xf32>
    %29 = vector.broadcast %28 : vector<4x8x1xf32> to vector<4x8x8xf32>
    %30 = arith.subf %26, %29 : vector<4x8x8xf32>
    %31 = math.exp %30 : vector<4x8x8xf32>
    %cst_20 = arith.constant dense<0.000000e+00> : vector<4x8xf32>
    %32 = vector.multi_reduction <add>, %31, %cst_20 [2] : vector<4x8x8xf32> to vector<4x8xf32>
    %33 = vector.shape_cast %32 : vector<4x8xf32> to vector<4x8x1xf32>
    %34 = tpu.reciprocal %33 : vector<4x8x1xf32> -> vector<4x8x1xf32>
    %35 = vector.broadcast %34 : vector<4x8x1xf32> to vector<4x8x8xf32>
    %36 = arith.mulf %31, %35 : vector<4x8x8xf32>
    %cst_21 = arith.constant dense<0.000000e+00> : vector<4x8x8xf32>
    %37 = tpu.matmul %18, %36, %cst_21 {dimension_numbers = #tpu.dot_dimension_numbers<[2], [2], [1], [1], [0, 0, 0, 1, 1, 1], [0], [0]>} : vector<4x8x8xf32>, vector<4x8x8xf32>, vector<4x8x8xf32> -> vector<4x8x8xf32>
    %38 = vector.shape_cast %37 : vector<4x8x8xf32> to vector<32x8xf32>
    %c0_22 = arith.constant 0 : index
    %c0_23 = arith.constant 0 : index
    %39 = vector.load %arg9[%c0_22, %c0_23] : memref<32x32xf32, #tpu.memory_space<vmem>>, vector<32x32xf32>
    %cst_24 = arith.constant dense<0.000000e+00> : vector<8x32xf32>
    %40 = tpu.matmul %38, %39, %cst_24 {dimension_numbers = #tpu.dot_dimension_numbers<[0], [0], [1], [1], [0, 1, 1, 1], [], []>} : vector<32x8xf32>, vector<32x32xf32>, vector<8x32xf32> -> vector<8x32xf32>
    %c0_25 = arith.constant 0 : index
    %c0_26 = arith.constant 0 : index
    %41 = vector.load %arg10[%c0_25, %c0_26] : memref<1x32xf32, #tpu.memory_space<vmem>>, vector<1x32xf32>
    %42 = vector.broadcast %41 : vector<1x32xf32> to vector<8x32xf32>
    %43 = arith.addf %40, %42 : vector<8x32xf32>
    %44 = arith.addf %1, %43 : vector<8x32xf32>
    %cst_27 = arith.constant dense<0.000000e+00> : vector<8xf32>
    %45 = vector.multi_reduction <add>, %44, %cst_27 [1] : vector<8x32xf32> to vector<8xf32>
    %46 = vector.shape_cast %45 : vector<8xf32> to vector<8x1xf32>
    %cst_28 = arith.constant 3.200000e+01 : f32
    %47 = vector.broadcast %cst_28 : f32 to vector<8x1xf32>
    %48 = arith.divf %46, %47 : vector<8x1xf32>
    %49 = vector.broadcast %48 : vector<8x1xf32> to vector<8x32xf32>
    %50 = arith.subf %44, %49 : vector<8x32xf32>
    %51 = arith.mulf %50, %50 : vector<8x32xf32>
    %cst_29 = arith.constant dense<0.000000e+00> : vector<8xf32>
    %52 = vector.multi_reduction <add>, %51, %cst_29 [1] : vector<8x32xf32> to vector<8xf32>
    %53 = vector.shape_cast %52 : vector<8xf32> to vector<8x1xf32>
    %cst_30 = arith.constant 3.200000e+01 : f32
    %54 = vector.broadcast %cst_30 : f32 to vector<8x1xf32>
    %55 = arith.divf %53, %54 : vector<8x1xf32>
    %56 = vector.broadcast %48 : vector<8x1xf32> to vector<8x32xf32>
    %57 = arith.subf %44, %56 : vector<8x32xf32>
    %cst_31 = arith.constant 9.99999974E-6 : f32
    %58 = vector.broadcast %cst_31 : f32 to vector<8x1xf32>
    %59 = arith.addf %55, %58 : vector<8x1xf32>
    %60 = math.rsqrt %59 : vector<8x1xf32>
    %61 = vector.broadcast %60 : vector<8x1xf32> to vector<8x32xf32>
    %62 = arith.mulf %57, %61 : vector<8x32xf32>
    %c0_32 = arith.constant 0 : index
    %c0_33 = arith.constant 0 : index
    %63 = vector.load %arg11[%c0_32, %c0_33] : memref<1x32xf32, #tpu.memory_space<vmem>>, vector<1x32xf32>
    %64 = vector.broadcast %63 : vector<1x32xf32> to vector<8x32xf32>
    %65 = arith.mulf %62, %64 : vector<8x32xf32>
    %c0_34 = arith.constant 0 : index
    %c0_35 = arith.constant 0 : index
    %66 = vector.load %arg12[%c0_34, %c0_35] : memref<1x32xf32, #tpu.memory_space<vmem>>, vector<1x32xf32>
    %67 = vector.broadcast %66 : vector<1x32xf32> to vector<8x32xf32>
    %68 = arith.addf %65, %67 : vector<8x32xf32>
    %c0_36 = arith.constant 0 : index
    %c0_37 = arith.constant 0 : index
    %c0_38 = arith.constant 0 : index
    %69 = vector.load %arg13[%c0_36, %c0_37, %c0_38] : memref<1x8x32xf32, #tpu.memory_space<vmem>>, vector<1x8x32xf32>
    %70 = vector.shape_cast %69 : vector<1x8x32xf32> to vector<8x32xf32>
    %71 = vector.shape_cast %68 : vector<8x32xf32> to vector<1x8x32xf32>
    tpu.vector_store %arg13[%c0_36, %c0_37, %c0_38], %71 {strides = array<i32>} : memref<1x8x32xf32, #tpu.memory_space<vmem>>, vector<1x8x32xf32>,
    return
  }
  func.func @transform_0(%arg0: i32, %arg1: i32) -> (i32, i32, i32) {
    %c0_i32 = arith.constant 0 : i32
    %c0_i32_0 = arith.constant 0 : i32
    return %arg0, %arg1, %c0_i32 : i32, i32, i32
  }
  func.func @transform_1(%arg0: i32, %arg1: i32) -> (i32, i32, i32) {
    %c0_i32 = arith.constant 0 : i32
    %c0_i32_0 = arith.constant 0 : i32
    %c0_i32_1 = arith.constant 0 : i32
    return %arg0, %c0_i32, %c0_i32_0 : i32, i32, i32
  }
  func.func @transform_2(%arg0: i32, %arg1: i32) -> (i32, i32, i32) {
    %c0_i32 = arith.constant 0 : i32
    %c0_i32_0 = arith.constant 0 : i32
    return %arg0, %arg1, %c0_i32 : i32, i32, i32
  }
  func.func @transform_3(%arg0: i32, %arg1: i32) -> (i32, i32) {
    %c0_i32 = arith.constant 0 : i32
    %c0_i32_0 = arith.constant 0 : i32
    %c0_i32_1 = arith.constant 0 : i32
    return %c0_i32, %c0_i32_0 : i32, i32
  }
  func.func @transform_4(%arg0: i32, %arg1: i32) -> (i32, i32) {
    %c0_i32 = arith.constant 0 : i32
    %c0_i32_0 = arith.constant 0 : i32
    %c0_i32_1 = arith.constant 0 : i32
    return %c0_i32, %c0_i32_0 : i32, i32
  }
  func.func @transform_5(%arg0: i32, %arg1: i32) -> (i32, i32) {
    %c0_i32 = arith.constant 0 : i32
    %c0_i32_0 = arith.constant 0 : i32
    %c0_i32_1 = arith.constant 0 : i32
    return %c0_i32, %c0_i32_0 : i32, i32
  }
  func.func @transform_6(%arg0: i32, %arg1: i32) -> (i32, i32) {
    %c0_i32 = arith.constant 0 : i32
    %c0_i32_0 = arith.constant 0 : i32
    %c0_i32_1 = arith.constant 0 : i32
    return %c0_i32, %c0_i32_0 : i32, i32
  }
  func.func @transform_7(%arg0: i32, %arg1: i32) -> (i32, i32) {
    %c0_i32 = arith.constant 0 : i32
    %c0_i32_0 = arith.constant 0 : i32
    %c0_i32_1 = arith.constant 0 : i32
    return %c0_i32, %c0_i32_0 : i32, i32
  }
  func.func @transform_8(%arg0: i32, %arg1: i32) -> (i32, i32) {
    %c0_i32 = arith.constant 0 : i32
    %c0_i32_0 = arith.constant 0 : i32
    %c0_i32_1 = arith.constant 0 : i32
    return %c0_i32, %c0_i32_0 : i32, i32
  }
  func.func @transform_9(%arg0: i32, %arg1: i32) -> (i32, i32) {
    %c0_i32 = arith.constant 0 : i32
    %c0_i32_0 = arith.constant 0 : i32
    %c0_i32_1 = arith.constant 0 : i32
    return %c0_i32, %c0_i32_0 : i32, i32
  }
  func.func @transform_10(%arg0: i32, %arg1: i32) -> (i32, i32) {
    %c0_i32 = arith.constant 0 : i32
    %c0_i32_0 = arith.constant 0 : i32
    %c0_i32_1 = arith.constant 0 : i32
    return %c0_i32, %c0_i32_0 : i32, i32
  }
  func.func @transform_11(%arg0: i32, %arg1: i32) -> (i32, i32, i32) {
    %c0_i32 = arith.constant 0 : i32
    %c0_i32_0 = arith.constant 0 : i32
    return %arg0, %arg1, %c0_i32 : i32, i32, i32
  }
}

module attributes {stable_mosaic.version = 11 : i64} {
  func.func @_mha_ln_kernel(%arg0: i32, %arg1: i32, %arg2: memref<1x8x32xf32, #tpu.memory_space<vmem>>, %arg3: memref<1x8x32xf32, #tpu.memory_space<vmem>>, %arg4: memref<1x8x8xf32, #tpu.memory_space<vmem>>, %arg5: memref<32x32xf32, #tpu.memory_space<vmem>>, %arg6: memref<32x1xf32, #tpu.memory_space<vmem>>, %arg7: memref<64x32xf32, #tpu.memory_space<vmem>>, %arg8: memref<64x1xf32, #tpu.memory_space<vmem>>, %arg9: memref<32x32xf32, #tpu.memory_space<vmem>>, %arg10: memref<1x32xf32, #tpu.memory_space<vmem>>, %arg11: memref<1x32xf32, #tpu.memory_space<vmem>>, %arg12: memref<1x32xf32, #tpu.memory_space<vmem>>, %arg13: memref<1x8x32xf32, #tpu.memory_space<vmem>>) attributes {dimension_semantics = [#tpu.dimension_semantics<parallel>, #tpu.dimension_semantics<parallel>], iteration_bounds = array<i64: 2, 1>, scalar_prefetch = 0 : i64, scratch_operands = 0 : i64, tpu.core_type = #tpu.core_type<tc>, window_params = [{transform_indices = @transform_0, window_bounds = array<i64: 1, 8, 32>}, {transform_indices = @transform_1, window_bounds = array<i64: 1, 8, 32>}, {transform_indices = @transform_2, window_bounds = array<i64: 1, 8, 8>}, {pipeline_mode = #tpu.pipeline_mode<synchronous>, transform_indices = @transform_3, window_bounds = array<i64: 32, 32>}, {pipeline_mode = #tpu.pipeline_mode<synchronous>, transform_indices = @transform_4, window_bounds = array<i64: 32, 1>}, {pipeline_mode = #tpu.pipeline_mode<synchronous>, transform_indices = @transform_5, window_bounds = array<i64: 64, 32>}, {pipeline_mode = #tpu.pipeline_mode<synchronous>, transform_indices = @transform_6, window_bounds = array<i64: 64, 1>}, {pipeline_mode = #tpu.pipeline_mode<synchronous>, transform_indices = @transform_7, window_bounds = array<i64: 32, 32>}, {pipeline_mode = #tpu.pipeline_mode<synchronous>, transform_indices = @transform_8, window_bounds = array<i64: 1, 32>}, {pipeline_mode = #tpu.pipeline_mode<synchronous>, transform_indices = @transform_9, window_bounds = array<i64: 1, 32>}, {pipeline_mode = #tpu.pipeline_mode<synchronous>, transform_indices = @transform_10, window_bounds = array<i64: 1, 32>}, {transform_indices = @transform_11, window_bounds = array<i64: 1, 8, 32>}]} {
    %c0 = arith.constant 0 : index
    %c0_0 = arith.constant 0 : index
    %c0_1 = arith.constant 0 : index
    %0 = vector.load %arg2[%c0, %c0_0, %c0_1] : memref<1x8x32xf32, #tpu.memory_space<vmem>>, vector<1x8x32xf32>
    %1 = vector.shape_cast %0 : vector<1x8x32xf32> to vector<8x32xf32>
    %c0_2 = arith.constant 0 : index
    %c0_3 = arith.constant 0 : index
    %c0_4 = arith.constant 0 : index
    %2 = vector.load %arg3[%c0_2, %c0_3, %c0_4] : memref<1x8x32xf32, #tpu.memory_space<vmem>>, vector<1x8x32xf32>
    %3 = vector.shape_cast %2 : vector<1x8x32xf32> to vector<8x32xf32>
    %c0_5 = arith.constant 0 : index
    %c0_6 = arith.constant 0 : index
    %4 = vector.load %arg5[%c0_5, %c0_6] : memref<32x32xf32, #tpu.memory_space<vmem>>, vector<32x32xf32>
    %cst = arith.constant dense<0.000000e+00> : vector<32x8xf32>
    %5 = tpu.matmul %4, %1, %cst {dimension_numbers = #tpu.dot_dimension_numbers<[1], [1], [0], [0], [0, 0, 1, 0], [], []>} : vector<32x32xf32>, vector<8x32xf32>, vector<32x8xf32> -> vector<32x8xf32>
    %c0_7 = arith.constant 0 : index
    %c0_8 = arith.constant 0 : index
    %6 = vector.load %arg6[%c0_7, %c0_8] : memref<32x1xf32, #tpu.memory_space<vmem>>, vector<32x1xf32>
    %7 = vector.broadcast %6 : vector<32x1xf32> to vector<32x8xf32>
    %8 = arith.addf %5, %7 : vector<32x8xf32>
    %c0_9 = arith.constant 0 : index
    %c0_10 = arith.constant 0 : index
    %9 = vector.load %arg7[%c0_9, %c0_10] : memref<64x32xf32, #tpu.memory_space<vmem>>, vector<64x32xf32>
    %cst_11 = arith.constant dense<0.000000e+00> : vector<64x8xf32>
    %10 = tpu.matmul %9, %3, %cst_11 {dimension_numbers = #tpu.dot_dimension_numbers<[1], [1], [0], [0], [0, 0, 1, 0], [], []>} : vector<64x32xf32>, vector<8x32xf32>, vector<64x8xf32> -> vector<64x8xf32>
    %c0_12 = arith.constant 0 : index
    %c0_13 = arith.constant 0 : index
    %11 = vector.load %arg8[%c0_12, %c0_13] : memref<64x1xf32, #tpu.memory_space<vmem>>, vector<64x1xf32>
    %12 = vector.broadcast %11 : vector<64x1xf32> to vector<64x8xf32>
    %13 = arith.addf %10, %12 : vector<64x8xf32>
    %14 = vector.shape_cast %8 : vector<32x8xf32> to vector<4x8x8xf32>
    %15 = vector.extract_strided_slice %13 {offsets = [0, 0], sizes = [32, 8], strides = [1, 1]} : vector<64x8xf32> to vector<32x8xf32>
    %16 = vector.shape_cast %15 : vector<32x8xf32> to vector<4x8x8xf32>
    %17 = vector.extract_strided_slice %13 {offsets = [32, 0], sizes = [32, 8], strides = [1, 1]} : vector<64x8xf32> to vector<32x8xf32>
    %18 = vector.shape_cast %17 : vector<32x8xf32> to vector<4x8x8xf32>
    %c0_14 = arith.constant 0 : index
    %c0_15 = arith.constant 0 : index
    %c0_16 = arith.constant 0 : index
    %19 = vector.load %arg4[%c0_14, %c0_15, %c0_16] : memref<1x8x8xf32, #tpu.memory_space<vmem>>, vector<1x8x8xf32>
    %20 = vector.shape_cast %19 : vector<1x8x8xf32> to vector<8x8xf32>
    %cst_17 = arith.constant dense<0.000000e+00> : vector<4x8x8xf32>
    %21 = tpu.matmul %14, %16, %cst_17 {dimension_numbers = #tpu.dot_dimension_numbers<[1], [1], [2], [2], [0, 0, 0, 2, 1, 2], [0], [0]>} : vector<4x8x8xf32>, vector<4x8x8xf32>, vector<4x8x8xf32> -> vector<4x8x8xf32>
    %cst_18 = arith.constant 0.353553385 : f32
    %22 = vector.broadcast %cst_18 : f32 to vector<4x8x8xf32>
    %23 = arith.mulf %21, %22 : vector<4x8x8xf32>
    %24 = vector.shape_cast %20 : vector<8x8xf32> to vector<1x8x8xf32>
    %25 = vector.broadcast %24 : vector<1x8x8xf32> to vector<4x8x8xf32>
    %26 = arith.addf %23, %25 : vector<4x8x8xf32>
    %cst_19 = arith.constant dense<0xFF800000> : vector<4x8xf32>
    %27 = vector.multi_reduction <maximumf>, %26, %cst_19 [2] : vector<4x8x8xf32> to vector<4x8xf32>
    %28 = vector.shape_cast %27 : vector<4x8xf32> to vector<4x8x1xf32>
    %29 = vector.broadcast %28 : vector<4x8x1xf32> to vector<4x8x8xf32>
    %30 = arith.subf %26, %29 : vector<4x8x8xf32>
    %31 = math.exp %30 : vector<4x8x8xf32>
    %cst_20 = arith.constant dense<0.000000e+00> : vector<4x8xf32>
    %32 = vector.multi_reduction <add>, %31, %cst_20 [2] : vector<4x8x8xf32> to vector<4x8xf32>
    %33 = vector.shape_cast %32 : vector<4x8xf32> to vector<4x8x1xf32>
    %34 = tpu.reciprocal %33 : vector<4x8x1xf32> -> vector<4x8x1xf32>
    %35 = vector.broadcast %34 : vector<4x8x1xf32> to vector<4x8x8xf32>
    %36 = arith.mulf %31, %35 : vector<4x8x8xf32>
    %cst_21 = arith.constant dense<0.000000e+00> : vector<4x8x8xf32>
    %37 = tpu.matmul %18, %36, %cst_21 {dimension_numbers = #tpu.dot_dimension_numbers<[2], [2], [1], [1], [0, 0, 0, 1, 1, 1], [0], [0]>} : vector<4x8x8xf32>, vector<4x8x8xf32>, vector<4x8x8xf32> -> vector<4x8x8xf32>
    %38 = vector.shape_cast %37 : vector<4x8x8xf32> to vector<32x8xf32>
    %c0_22 = arith.constant 0 : index
    %c0_23 = arith.constant 0 : index
    %39 = vector.load %arg9[%c0_22, %c0_23] : memref<32x32xf32, #tpu.memory_space<vmem>>, vector<32x32xf32>
    %cst_24 = arith.constant dense<0.000000e+00> : vector<8x32xf32>
    %40 = tpu.matmul %38, %39, %cst_24 {dimension_numbers = #tpu.dot_dimension_numbers<[0], [0], [1], [1], [0, 1, 1, 1], [], []>} : vector<32x8xf32>, vector<32x32xf32>, vector<8x32xf32> -> vector<8x32xf32>
    %c0_25 = arith.constant 0 : index
    %c0_26 = arith.constant 0 : index
    %41 = vector.load %arg10[%c0_25, %c0_26] : memref<1x32xf32, #tpu.memory_space<vmem>>, vector<1x32xf32>
    %42 = vector.broadcast %41 : vector<1x32xf32> to vector<8x32xf32>
    %43 = arith.addf %40, %42 : vector<8x32xf32>
    %44 = arith.addf %1, %43 : vector<8x32xf32>
    %cst_27 = arith.constant dense<0.000000e+00> : vector<8xf32>
    %45 = vector.multi_reduction <add>, %44, %cst_27 [1] : vector<8x32xf32> to vector<8xf32>
    %46 = vector.shape_cast %45 : vector<8xf32> to vector<8x1xf32>
    %cst_28 = arith.constant 3.200000e+01 : f32
    %47 = vector.broadcast %cst_28 : f32 to vector<8x1xf32>
    %48 = arith.divf %46, %47 : vector<8x1xf32>
    %49 = vector.broadcast %48 : vector<8x1xf32> to vector<8x32xf32>
    %50 = arith.subf %44, %49 : vector<8x32xf32>
    %51 = arith.mulf %50, %50 : vector<8x32xf32>
    %cst_29 = arith.constant dense<0.000000e+00> : vector<8xf32>
    %52 = vector.multi_reduction <add>, %51, %cst_29 [1] : vector<8x32xf32> to vector<8xf32>
    %53 = vector.shape_cast %52 : vector<8xf32> to vector<8x1xf32>
    %cst_30 = arith.constant 3.200000e+01 : f32
    %54 = vector.broadcast %cst_30 : f32 to vector<8x1xf32>
    %55 = arith.divf %53, %54 : vector<8x1xf32>
    %56 = vector.broadcast %48 : vector<8x1xf32> to vector<8x32xf32>
    %57 = arith.subf %44, %56 : vector<8x32xf32>
    %cst_31 = arith.constant 9.99999974E-6 : f32
    %58 = vector.broadcast %cst_31 : f32 to vector<8x1xf32>
    %59 = arith.addf %55, %58 : vector<8x1xf32>
    %60 = math.rsqrt %59 : vector<8x1xf32>
    %61 = vector.broadcast %60 : vector<8x1xf32> to vector<8x32xf32>
    %62 = arith.mulf %57, %61 : vector<8x32xf32>
    %c0_32 = arith.constant 0 : index
    %c0_33 = arith.constant 0 : index
    %63 = vector.load %arg11[%c0_32, %c0_33] : memref<1x32xf32, #tpu.memory_space<vmem>>, vector<1x32xf32>
    %64 = vector.broadcast %63 : vector<1x32xf32> to vector<8x32xf32>
    %65 = arith.mulf %62, %64 : vector<8x32xf32>
    %c0_34 = arith.constant 0 : index
    %c0_35 = arith.constant 0 : index
    %66 = vector.load %arg12[%c0_34, %c0_35] : memref<1x32xf32, #tpu.memory_space<vmem>>, vector<1x32xf32>
    %67 = vector.broadcast %66 : vector<1x32xf32> to vector<8x32xf32>
    %68 = arith.addf %65, %67 : vector<8x32xf32>
    %c0_36 = arith.constant 0 : index
    %c0_37 = arith.constant 0 : index
    %c0_38 = arith.constant 0 : index
    %69 = vector.load %arg13[%c0_36, %c0_37, %c0_38] : memref<1x8x32xf32, #tpu.memory_space<vmem>>, vector<1x8x32xf32>
    %70 = vector.shape_cast %69 : vector<1x8x32xf32> to vector<8x32xf32>
    %71 = vector.shape_cast %68 : vector<8x32xf32> to vector<1x8x32xf32>
    tpu.vector_store %arg13[%c0_36, %c0_37, %c0_38], %71 {strides = array<i32>} : memref<1x8x32xf32, #tpu.memory_space<vmem>>, vector<1x8x32xf32>,
    return
  }
  func.func @transform_0(%arg0: i32, %arg1: i32) -> (i32, i32, i32) {
    %c0_i32 = arith.constant 0 : i32
    %c0_i32_0 = arith.constant 0 : i32
    return %arg0, %arg1, %c0_i32 : i32, i32, i32
  }
  func.func @transform_1(%arg0: i32, %arg1: i32) -> (i32, i32, i32) {
    %c0_i32 = arith.constant 0 : i32
    %c0_i32_0 = arith.constant 0 : i32
    %c0_i32_1 = arith.constant 0 : i32
    return %arg0, %c0_i32, %c0_i32_0 : i32, i32, i32
  }
  func.func @transform_2(%arg0: i32, %arg1: i32) -> (i32, i32, i32) {
    %c0_i32 = arith.constant 0 : i32
    %c0_i32_0 = arith.constant 0 : i32
    return %arg0, %arg1, %c0_i32 : i32, i32, i32
  }
  func.func @transform_3(%arg0: i32, %arg1: i32) -> (i32, i32) {
    %c0_i32 = arith.constant 0 : i32
    %c0_i32_0 = arith.constant 0 : i32
    %c0_i32_1 = arith.constant 0 : i32
    return %c0_i32, %c0_i32_0 : i32, i32
  }
  func.func @transform_4(%arg0: i32, %arg1: i32) -> (i32, i32) {
    %c0_i32 = arith.constant 0 : i32
    %c0_i32_0 = arith.constant 0 : i32
    %c0_i32_1 = arith.constant 0 : i32
    return %c0_i32, %c0_i32_0 : i32, i32
  }
  func.func @transform_5(%arg0: i32, %arg1: i32) -> (i32, i32) {
    %c0_i32 = arith.constant 0 : i32
    %c0_i32_0 = arith.constant 0 : i32
    %c0_i32_1 = arith.constant 0 : i32
    return %c0_i32, %c0_i32_0 : i32, i32
  }
  func.func @transform_6(%arg0: i32, %arg1: i32) -> (i32, i32) {
    %c0_i32 = arith.constant 0 : i32
    %c0_i32_0 = arith.constant 0 : i32
    %c0_i32_1 = arith.constant 0 : i32
    return %c0_i32, %c0_i32_0 : i32, i32
  }
  func.func @transform_7(%arg0: i32, %arg1: i32) -> (i32, i32) {
    %c0_i32 = arith.constant 0 : i32
    %c0_i32_0 = arith.constant 0 : i32
    %c0_i32_1 = arith.constant 0 : i32
    return %c0_i32, %c0_i32_0 : i32, i32
  }
  func.func @transform_8(%arg0: i32, %arg1: i32) -> (i32, i32) {
    %c0_i32 = arith.constant 0 : i32
    %c0_i32_0 = arith.constant 0 : i32
    %c0_i32_1 = arith.constant 0 : i32
    return %c0_i32, %c0_i32_0 : i32, i32
  }
  func.func @transform_9(%arg0: i32, %arg1: i32) -> (i32, i32) {
    %c0_i32 = arith.constant 0 : i32
    %c0_i32_0 = arith.constant 0 : i32
    %c0_i32_1 = arith.constant 0 : i32
    return %c0_i32, %c0_i32_0 : i32, i32
  }
  func.func @transform_10(%arg0: i32, %arg1: i32) -> (i32, i32) {
    %c0_i32 = arith.constant 0 : i32
    %c0_i32_0 = arith.constant 0 : i32
    %c0_i32_1 = arith.constant 0 : i32
    return %c0_i32, %c0_i32_0 : i32, i32
  }
  func.func @transform_11(%arg0: i32, %arg1: i32) -> (i32, i32, i32) {
    %c0_i32 = arith.constant 0 : i32
    %c0_i32_0 = arith.constant 0 : i32
    return %arg0, %arg1, %c0_i32 : i32, i32, i32
  }
}

module attributes {stable_mosaic.version = 11 : i64} {
  func.func @_mha_ln_kernel(%arg0: i32, %arg1: i32, %arg2: memref<1x8x32xf32, #tpu.memory_space<vmem>>, %arg3: memref<1x8x32xf32, #tpu.memory_space<vmem>>, %arg4: memref<1x8x8xf32, #tpu.memory_space<vmem>>, %arg5: memref<32x32xf32, #tpu.memory_space<vmem>>, %arg6: memref<32x1xf32, #tpu.memory_space<vmem>>, %arg7: memref<64x32xf32, #tpu.memory_space<vmem>>, %arg8: memref<64x1xf32, #tpu.memory_space<vmem>>, %arg9: memref<32x32xf32, #tpu.memory_space<vmem>>, %arg10: memref<1x32xf32, #tpu.memory_space<vmem>>, %arg11: memref<1x32xf32, #tpu.memory_space<vmem>>, %arg12: memref<1x32xf32, #tpu.memory_space<vmem>>, %arg13: memref<1x8x32xf32, #tpu.memory_space<vmem>>) attributes {dimension_semantics = [#tpu.dimension_semantics<parallel>, #tpu.dimension_semantics<parallel>], iteration_bounds = array<i64: 2, 1>, scalar_prefetch = 0 : i64, scratch_operands = 0 : i64, tpu.core_type = #tpu.core_type<tc>, window_params = [{transform_indices = @transform_0, window_bounds = array<i64: 1, 8, 32>}, {transform_indices = @transform_1, window_bounds = array<i64: 1, 8, 32>}, {transform_indices = @transform_2, window_bounds = array<i64: 1, 8, 8>}, {pipeline_mode = #tpu.pipeline_mode<synchronous>, transform_indices = @transform_3, window_bounds = array<i64: 32, 32>}, {pipeline_mode = #tpu.pipeline_mode<synchronous>, transform_indices = @transform_4, window_bounds = array<i64: 32, 1>}, {pipeline_mode = #tpu.pipeline_mode<synchronous>, transform_indices = @transform_5, window_bounds = array<i64: 64, 32>}, {pipeline_mode = #tpu.pipeline_mode<synchronous>, transform_indices = @transform_6, window_bounds = array<i64: 64, 1>}, {pipeline_mode = #tpu.pipeline_mode<synchronous>, transform_indices = @transform_7, window_bounds = array<i64: 32, 32>}, {pipeline_mode = #tpu.pipeline_mode<synchronous>, transform_indices = @transform_8, window_bounds = array<i64: 1, 32>}, {pipeline_mode = #tpu.pipeline_mode<synchronous>, transform_indices = @transform_9, window_bounds = array<i64: 1, 32>}, {pipeline_mode = #tpu.pipeline_mode<synchronous>, transform_indices = @transform_10, window_bounds = array<i64: 1, 32>}, {transform_indices = @transform_11, window_bounds = array<i64: 1, 8, 32>}]} {
    %c0 = arith.constant 0 : index
    %c0_0 = arith.constant 0 : index
    %c0_1 = arith.constant 0 : index
    %0 = vector.load %arg2[%c0, %c0_0, %c0_1] : memref<1x8x32xf32, #tpu.memory_space<vmem>>, vector<1x8x32xf32>
    %1 = vector.shape_cast %0 : vector<1x8x32xf32> to vector<8x32xf32>
    %c0_2 = arith.constant 0 : index
    %c0_3 = arith.constant 0 : index
    %c0_4 = arith.constant 0 : index
    %2 = vector.load %arg3[%c0_2, %c0_3, %c0_4] : memref<1x8x32xf32, #tpu.memory_space<vmem>>, vector<1x8x32xf32>
    %3 = vector.shape_cast %2 : vector<1x8x32xf32> to vector<8x32xf32>
    %c0_5 = arith.constant 0 : index
    %c0_6 = arith.constant 0 : index
    %4 = vector.load %arg5[%c0_5, %c0_6] : memref<32x32xf32, #tpu.memory_space<vmem>>, vector<32x32xf32>
    %cst = arith.constant dense<0.000000e+00> : vector<32x8xf32>
    %5 = tpu.matmul %4, %1, %cst {dimension_numbers = #tpu.dot_dimension_numbers<[1], [1], [0], [0], [0, 0, 1, 0], [], []>} : vector<32x32xf32>, vector<8x32xf32>, vector<32x8xf32> -> vector<32x8xf32>
    %c0_7 = arith.constant 0 : index
    %c0_8 = arith.constant 0 : index
    %6 = vector.load %arg6[%c0_7, %c0_8] : memref<32x1xf32, #tpu.memory_space<vmem>>, vector<32x1xf32>
    %7 = vector.broadcast %6 : vector<32x1xf32> to vector<32x8xf32>
    %8 = arith.addf %5, %7 : vector<32x8xf32>
    %c0_9 = arith.constant 0 : index
    %c0_10 = arith.constant 0 : index
    %9 = vector.load %arg7[%c0_9, %c0_10] : memref<64x32xf32, #tpu.memory_space<vmem>>, vector<64x32xf32>
    %cst_11 = arith.constant dense<0.000000e+00> : vector<64x8xf32>
    %10 = tpu.matmul %9, %3, %cst_11 {dimension_numbers = #tpu.dot_dimension_numbers<[1], [1], [0], [0], [0, 0, 1, 0], [], []>} : vector<64x32xf32>, vector<8x32xf32>, vector<64x8xf32> -> vector<64x8xf32>
    %c0_12 = arith.constant 0 : index
    %c0_13 = arith.constant 0 : index
    %11 = vector.load %arg8[%c0_12, %c0_13] : memref<64x1xf32, #tpu.memory_space<vmem>>, vector<64x1xf32>
    %12 = vector.broadcast %11 : vector<64x1xf32> to vector<64x8xf32>
    %13 = arith.addf %10, %12 : vector<64x8xf32>
    %14 = vector.shape_cast %8 : vector<32x8xf32> to vector<4x8x8xf32>
    %15 = vector.extract_strided_slice %13 {offsets = [0, 0], sizes = [32, 8], strides = [1, 1]} : vector<64x8xf32> to vector<32x8xf32>
    %16 = vector.shape_cast %15 : vector<32x8xf32> to vector<4x8x8xf32>
    %17 = vector.extract_strided_slice %13 {offsets = [32, 0], sizes = [32, 8], strides = [1, 1]} : vector<64x8xf32> to vector<32x8xf32>
    %18 = vector.shape_cast %17 : vector<32x8xf32> to vector<4x8x8xf32>
    %c0_14 = arith.constant 0 : index
    %c0_15 = arith.constant 0 : index
    %c0_16 = arith.constant 0 : index
    %19 = vector.load %arg4[%c0_14, %c0_15, %c0_16] : memref<1x8x8xf32, #tpu.memory_space<vmem>>, vector<1x8x8xf32>
    %20 = vector.shape_cast %19 : vector<1x8x8xf32> to vector<8x8xf32>
    %21 = vector.extract_strided_slice %14 {offsets = [0, 0, 0], sizes = [1, 8, 8], strides = [1, 1, 1]} : vector<4x8x8xf32> to vector<1x8x8xf32>
    %22 = vector.shape_cast %21 : vector<1x8x8xf32> to vector<8x8xf32>
    %23 = vector.extract_strided_slice %16 {offsets = [0, 0, 0], sizes = [1, 8, 8], strides = [1, 1, 1]} : vector<4x8x8xf32> to vector<1x8x8xf32>
    %24 = vector.shape_cast %23 : vector<1x8x8xf32> to vector<8x8xf32>
    %cst_17 = arith.constant dense<0.000000e+00> : vector<8x8xf32>
    %25 = tpu.matmul %22, %24, %cst_17 {dimension_numbers = #tpu.dot_dimension_numbers<[0], [0], [1], [1], [0, 1, 1, 1], [], []>} : vector<8x8xf32>, vector<8x8xf32>, vector<8x8xf32> -> vector<8x8xf32>
    %cst_18 = arith.constant 0.353553385 : f32
    %26 = vector.broadcast %cst_18 : f32 to vector<8x8xf32>
    %27 = arith.mulf %25, %26 : vector<8x8xf32>
    %28 = arith.addf %27, %20 : vector<8x8xf32>
    %cst_19 = arith.constant dense<0xFF800000> : vector<8xf32>
    %29 = vector.multi_reduction <maximumf>, %28, %cst_19 [1] : vector<8x8xf32> to vector<8xf32>
    %30 = vector.shape_cast %29 : vector<8xf32> to vector<8x1xf32>
    %31 = vector.broadcast %30 : vector<8x1xf32> to vector<8x8xf32>
    %32 = arith.subf %28, %31 : vector<8x8xf32>
    %33 = math.exp %32 : vector<8x8xf32>
    %cst_20 = arith.constant dense<0.000000e+00> : vector<8xf32>
    %34 = vector.multi_reduction <add>, %33, %cst_20 [1] : vector<8x8xf32> to vector<8xf32>
    %35 = vector.shape_cast %34 : vector<8xf32> to vector<8x1xf32>
    %36 = tpu.reciprocal %35 : vector<8x1xf32> -> vector<8x1xf32>
    %37 = vector.broadcast %36 : vector<8x1xf32> to vector<8x8xf32>
    %38 = arith.mulf %33, %37 : vector<8x8xf32>
    %39 = vector.extract_strided_slice %18 {offsets = [0, 0, 0], sizes = [1, 8, 8], strides = [1, 1, 1]} : vector<4x8x8xf32> to vector<1x8x8xf32>
    %40 = vector.shape_cast %39 : vector<1x8x8xf32> to vector<8x8xf32>
    %cst_21 = arith.constant dense<0.000000e+00> : vector<8x8xf32>
    %41 = tpu.matmul %40, %38, %cst_21 {dimension_numbers = #tpu.dot_dimension_numbers<[1], [1], [0], [0], [0, 0, 1, 0], [], []>} : vector<8x8xf32>, vector<8x8xf32>, vector<8x8xf32> -> vector<8x8xf32>
    %42 = vector.extract_strided_slice %14 {offsets = [1, 0, 0], sizes = [1, 8, 8], strides = [1, 1, 1]} : vector<4x8x8xf32> to vector<1x8x8xf32>
    %43 = vector.shape_cast %42 : vector<1x8x8xf32> to vector<8x8xf32>
    %44 = vector.extract_strided_slice %16 {offsets = [1, 0, 0], sizes = [1, 8, 8], strides = [1, 1, 1]} : vector<4x8x8xf32> to vector<1x8x8xf32>
    %45 = vector.shape_cast %44 : vector<1x8x8xf32> to vector<8x8xf32>
    %cst_22 = arith.constant dense<0.000000e+00> : vector<8x8xf32>
    %46 = tpu.matmul %43, %45, %cst_22 {dimension_numbers = #tpu.dot_dimension_numbers<[0], [0], [1], [1], [0, 1, 1, 1], [], []>} : vector<8x8xf32>, vector<8x8xf32>, vector<8x8xf32> -> vector<8x8xf32>
    %cst_23 = arith.constant 0.353553385 : f32
    %47 = vector.broadcast %cst_23 : f32 to vector<8x8xf32>
    %48 = arith.mulf %46, %47 : vector<8x8xf32>
    %49 = arith.addf %48, %20 : vector<8x8xf32>
    %cst_24 = arith.constant dense<0xFF800000> : vector<8xf32>
    %50 = vector.multi_reduction <maximumf>, %49, %cst_24 [1] : vector<8x8xf32> to vector<8xf32>
    %51 = vector.shape_cast %50 : vector<8xf32> to vector<8x1xf32>
    %52 = vector.broadcast %51 : vector<8x1xf32> to vector<8x8xf32>
    %53 = arith.subf %49, %52 : vector<8x8xf32>
    %54 = math.exp %53 : vector<8x8xf32>
    %cst_25 = arith.constant dense<0.000000e+00> : vector<8xf32>
    %55 = vector.multi_reduction <add>, %54, %cst_25 [1] : vector<8x8xf32> to vector<8xf32>
    %56 = vector.shape_cast %55 : vector<8xf32> to vector<8x1xf32>
    %57 = tpu.reciprocal %56 : vector<8x1xf32> -> vector<8x1xf32>
    %58 = vector.broadcast %57 : vector<8x1xf32> to vector<8x8xf32>
    %59 = arith.mulf %54, %58 : vector<8x8xf32>
    %60 = vector.extract_strided_slice %18 {offsets = [1, 0, 0], sizes = [1, 8, 8], strides = [1, 1, 1]} : vector<4x8x8xf32> to vector<1x8x8xf32>
    %61 = vector.shape_cast %60 : vector<1x8x8xf32> to vector<8x8xf32>
    %cst_26 = arith.constant dense<0.000000e+00> : vector<8x8xf32>
    %62 = tpu.matmul %61, %59, %cst_26 {dimension_numbers = #tpu.dot_dimension_numbers<[1], [1], [0], [0], [0, 0, 1, 0], [], []>} : vector<8x8xf32>, vector<8x8xf32>, vector<8x8xf32> -> vector<8x8xf32>
    %63 = vector.extract_strided_slice %14 {offsets = [2, 0, 0], sizes = [1, 8, 8], strides = [1, 1, 1]} : vector<4x8x8xf32> to vector<1x8x8xf32>
    %64 = vector.shape_cast %63 : vector<1x8x8xf32> to vector<8x8xf32>
    %65 = vector.extract_strided_slice %16 {offsets = [2, 0, 0], sizes = [1, 8, 8], strides = [1, 1, 1]} : vector<4x8x8xf32> to vector<1x8x8xf32>
    %66 = vector.shape_cast %65 : vector<1x8x8xf32> to vector<8x8xf32>
    %cst_27 = arith.constant dense<0.000000e+00> : vector<8x8xf32>
    %67 = tpu.matmul %64, %66, %cst_27 {dimension_numbers = #tpu.dot_dimension_numbers<[0], [0], [1], [1], [0, 1, 1, 1], [], []>} : vector<8x8xf32>, vector<8x8xf32>, vector<8x8xf32> -> vector<8x8xf32>
    %cst_28 = arith.constant 0.353553385 : f32
    %68 = vector.broadcast %cst_28 : f32 to vector<8x8xf32>
    %69 = arith.mulf %67, %68 : vector<8x8xf32>
    %70 = arith.addf %69, %20 : vector<8x8xf32>
    %cst_29 = arith.constant dense<0xFF800000> : vector<8xf32>
    %71 = vector.multi_reduction <maximumf>, %70, %cst_29 [1] : vector<8x8xf32> to vector<8xf32>
    %72 = vector.shape_cast %71 : vector<8xf32> to vector<8x1xf32>
    %73 = vector.broadcast %72 : vector<8x1xf32> to vector<8x8xf32>
    %74 = arith.subf %70, %73 : vector<8x8xf32>
    %75 = math.exp %74 : vector<8x8xf32>
    %cst_30 = arith.constant dense<0.000000e+00> : vector<8xf32>
    %76 = vector.multi_reduction <add>, %75, %cst_30 [1] : vector<8x8xf32> to vector<8xf32>
    %77 = vector.shape_cast %76 : vector<8xf32> to vector<8x1xf32>
    %78 = tpu.reciprocal %77 : vector<8x1xf32> -> vector<8x1xf32>
    %79 = vector.broadcast %78 : vector<8x1xf32> to vector<8x8xf32>
    %80 = arith.mulf %75, %79 : vector<8x8xf32>
    %81 = vector.extract_strided_slice %18 {offsets = [2, 0, 0], sizes = [1, 8, 8], strides = [1, 1, 1]} : vector<4x8x8xf32> to vector<1x8x8xf32>
    %82 = vector.shape_cast %81 : vector<1x8x8xf32> to vector<8x8xf32>
    %cst_31 = arith.constant dense<0.000000e+00> : vector<8x8xf32>
    %83 = tpu.matmul %82, %80, %cst_31 {dimension_numbers = #tpu.dot_dimension_numbers<[1], [1], [0], [0], [0, 0, 1, 0], [], []>} : vector<8x8xf32>, vector<8x8xf32>, vector<8x8xf32> -> vector<8x8xf32>
    %84 = vector.extract_strided_slice %14 {offsets = [3, 0, 0], sizes = [1, 8, 8], strides = [1, 1, 1]} : vector<4x8x8xf32> to vector<1x8x8xf32>
    %85 = vector.shape_cast %84 : vector<1x8x8xf32> to vector<8x8xf32>
    %86 = vector.extract_strided_slice %16 {offsets = [3, 0, 0], sizes = [1, 8, 8], strides = [1, 1, 1]} : vector<4x8x8xf32> to vector<1x8x8xf32>
    %87 = vector.shape_cast %86 : vector<1x8x8xf32> to vector<8x8xf32>
    %cst_32 = arith.constant dense<0.000000e+00> : vector<8x8xf32>
    %88 = tpu.matmul %85, %87, %cst_32 {dimension_numbers = #tpu.dot_dimension_numbers<[0], [0], [1], [1], [0, 1, 1, 1], [], []>} : vector<8x8xf32>, vector<8x8xf32>, vector<8x8xf32> -> vector<8x8xf32>
    %cst_33 = arith.constant 0.353553385 : f32
    %89 = vector.broadcast %cst_33 : f32 to vector<8x8xf32>
    %90 = arith.mulf %88, %89 : vector<8x8xf32>
    %91 = arith.addf %90, %20 : vector<8x8xf32>
    %cst_34 = arith.constant dense<0xFF800000> : vector<8xf32>
    %92 = vector.multi_reduction <maximumf>, %91, %cst_34 [1] : vector<8x8xf32> to vector<8xf32>
    %93 = vector.shape_cast %92 : vector<8xf32> to vector<8x1xf32>
    %94 = vector.broadcast %93 : vector<8x1xf32> to vector<8x8xf32>
    %95 = arith.subf %91, %94 : vector<8x8xf32>
    %96 = math.exp %95 : vector<8x8xf32>
    %cst_35 = arith.constant dense<0.000000e+00> : vector<8xf32>
    %97 = vector.multi_reduction <add>, %96, %cst_35 [1] : vector<8x8xf32> to vector<8xf32>
    %98 = vector.shape_cast %97 : vector<8xf32> to vector<8x1xf32>
    %99 = tpu.reciprocal %98 : vector<8x1xf32> -> vector<8x1xf32>
    %100 = vector.broadcast %99 : vector<8x1xf32> to vector<8x8xf32>
    %101 = arith.mulf %96, %100 : vector<8x8xf32>
    %102 = vector.extract_strided_slice %18 {offsets = [3, 0, 0], sizes = [1, 8, 8], strides = [1, 1, 1]} : vector<4x8x8xf32> to vector<1x8x8xf32>
    %103 = vector.shape_cast %102 : vector<1x8x8xf32> to vector<8x8xf32>
    %cst_36 = arith.constant dense<0.000000e+00> : vector<8x8xf32>
    %104 = tpu.matmul %103, %101, %cst_36 {dimension_numbers = #tpu.dot_dimension_numbers<[1], [1], [0], [0], [0, 0, 1, 0], [], []>} : vector<8x8xf32>, vector<8x8xf32>, vector<8x8xf32> -> vector<8x8xf32>
    %105 = tpu.concatenate %41, %62, %83, %104 in 0 : vector<8x8xf32>, vector<8x8xf32>, vector<8x8xf32>, vector<8x8xf32> -> vector<32x8xf32>
    %c0_37 = arith.constant 0 : index
    %c0_38 = arith.constant 0 : index
    %106 = vector.load %arg9[%c0_37, %c0_38] : memref<32x32xf32, #tpu.memory_space<vmem>>, vector<32x32xf32>
    %cst_39 = arith.constant dense<0.000000e+00> : vector<8x32xf32>
    %107 = tpu.matmul %105, %106, %cst_39 {dimension_numbers = #tpu.dot_dimension_numbers<[0], [0], [1], [1], [0, 1, 1, 1], [], []>} : vector<32x8xf32>, vector<32x32xf32>, vector<8x32xf32> -> vector<8x32xf32>
    %c0_40 = arith.constant 0 : index
    %c0_41 = arith.constant 0 : index
    %108 = vector.load %arg10[%c0_40, %c0_41] : memref<1x32xf32, #tpu.memory_space<vmem>>, vector<1x32xf32>
    %109 = vector.broadcast %108 : vector<1x32xf32> to vector<8x32xf32>
    %110 = arith.addf %107, %109 : vector<8x32xf32>
    %111 = arith.addf %1, %110 : vector<8x32xf32>
    %cst_42 = arith.constant dense<0.000000e+00> : vector<8xf32>
    %112 = vector.multi_reduction <add>, %111, %cst_42 [1] : vector<8x32xf32> to vector<8xf32>
    %113 = vector.shape_cast %112 : vector<8xf32> to vector<8x1xf32>
    %cst_43 = arith.constant 3.200000e+01 : f32
    %114 = vector.broadcast %cst_43 : f32 to vector<8x1xf32>
    %115 = arith.divf %113, %114 : vector<8x1xf32>
    %116 = vector.broadcast %115 : vector<8x1xf32> to vector<8x32xf32>
    %117 = arith.subf %111, %116 : vector<8x32xf32>
    %118 = arith.mulf %117, %117 : vector<8x32xf32>
    %cst_44 = arith.constant dense<0.000000e+00> : vector<8xf32>
    %119 = vector.multi_reduction <add>, %118, %cst_44 [1] : vector<8x32xf32> to vector<8xf32>
    %120 = vector.shape_cast %119 : vector<8xf32> to vector<8x1xf32>
    %cst_45 = arith.constant 3.200000e+01 : f32
    %121 = vector.broadcast %cst_45 : f32 to vector<8x1xf32>
    %122 = arith.divf %120, %121 : vector<8x1xf32>
    %123 = vector.broadcast %115 : vector<8x1xf32> to vector<8x32xf32>
    %124 = arith.subf %111, %123 : vector<8x32xf32>
    %cst_46 = arith.constant 9.99999974E-6 : f32
    %125 = vector.broadcast %cst_46 : f32 to vector<8x1xf32>
    %126 = arith.addf %122, %125 : vector<8x1xf32>
    %127 = math.rsqrt %126 : vector<8x1xf32>
    %128 = vector.broadcast %127 : vector<8x1xf32> to vector<8x32xf32>
    %129 = arith.mulf %124, %128 : vector<8x32xf32>
    %c0_47 = arith.constant 0 : index
    %c0_48 = arith.constant 0 : index
    %130 = vector.load %arg11[%c0_47, %c0_48] : memref<1x32xf32, #tpu.memory_space<vmem>>, vector<1x32xf32>
    %131 = vector.broadcast %130 : vector<1x32xf32> to vector<8x32xf32>
    %132 = arith.mulf %129, %131 : vector<8x32xf32>
    %c0_49 = arith.constant 0 : index
    %c0_50 = arith.constant 0 : index
    %133 = vector.load %arg12[%c0_49, %c0_50] : memref<1x32xf32, #tpu.memory_space<vmem>>, vector<1x32xf32>
    %134 = vector.broadcast %133 : vector<1x32xf32> to vector<8x32xf32>
    %135 = arith.addf %132, %134 : vector<8x32xf32>
    %c0_51 = arith.constant 0 : index
    %c0_52 = arith.constant 0 : index
    %c0_53 = arith.constant 0 : index
    %136 = vector.load %arg13[%c0_51, %c0_52, %c0_53] : memref<1x8x32xf32, #tpu.memory_space<vmem>>, vector<1x8x32xf32>
    %137 = vector.shape_cast %136 : vector<1x8x32xf32> to vector<8x32xf32>
    %138 = vector.shape_cast %135 : vector<8x32xf32> to vector<1x8x32xf32>
    tpu.vector_store %arg13[%c0_51, %c0_52, %c0_53], %138 {strides = array<i32>} : memref<1x8x32xf32, #tpu.memory_space<vmem>>, vector<1x8x32xf32>,
    return
  }
  func.func @transform_0(%arg0: i32, %arg1: i32) -> (i32, i32, i32) {
    %c0_i32 = arith.constant 0 : i32
    %c0_i32_0 = arith.constant 0 : i32
    return %arg0, %arg1, %c0_i32 : i32, i32, i32
  }
  func.func @transform_1(%arg0: i32, %arg1: i32) -> (i32, i32, i32) {
    %c0_i32 = arith.constant 0 : i32
    %c0_i32_0 = arith.constant 0 : i32
    %c0_i32_1 = arith.constant 0 : i32
    return %arg0, %c0_i32, %c0_i32_0 : i32, i32, i32
  }
  func.func @transform_2(%arg0: i32, %arg1: i32) -> (i32, i32, i32) {
    %c0_i32 = arith.constant 0 : i32
    %c0_i32_0 = arith.constant 0 : i32
    return %arg0, %arg1, %c0_i32 : i32, i32, i32
  }
  func.func @transform_3(%arg0: i32, %arg1: i32) -> (i32, i32) {
    %c0_i32 = arith.constant 0 : i32
    %c0_i32_0 = arith.constant 0 : i32
    %c0_i32_1 = arith.constant 0 : i32
    return %c0_i32, %c0_i32_0 : i32, i32
  }
  func.func @transform_4(%arg0: i32, %arg1: i32) -> (i32, i32) {
    %c0_i32 = arith.constant 0 : i32
    %c0_i32_0 = arith.constant 0 : i32
    %c0_i32_1 = arith.constant 0 : i32
    return %c0_i32, %c0_i32_0 : i32, i32
  }
  func.func @transform_5(%arg0: i32, %arg1: i32) -> (i32, i32) {
    %c0_i32 = arith.constant 0 : i32
    %c0_i32_0 = arith.constant 0 : i32
    %c0_i32_1 = arith.constant 0 : i32
    return %c0_i32, %c0_i32_0 : i32, i32
  }
  func.func @transform_6(%arg0: i32, %arg1: i32) -> (i32, i32) {
    %c0_i32 = arith.constant 0 : i32
    %c0_i32_0 = arith.constant 0 : i32
    %c0_i32_1 = arith.constant 0 : i32
    return %c0_i32, %c0_i32_0 : i32, i32
  }
  func.func @transform_7(%arg0: i32, %arg1: i32) -> (i32, i32) {
    %c0_i32 = arith.constant 0 : i32
    %c0_i32_0 = arith.constant 0 : i32
    %c0_i32_1 = arith.constant 0 : i32
    return %c0_i32, %c0_i32_0 : i32, i32
  }
  func.func @transform_8(%arg0: i32, %arg1: i32) -> (i32, i32) {
    %c0_i32 = arith.constant 0 : i32
    %c0_i32_0 = arith.constant 0 : i32
    %c0_i32_1 = arith.constant 0 : i32
    return %c0_i32, %c0_i32_0 : i32, i32
  }
  func.func @transform_9(%arg0: i32, %arg1: i32) -> (i32, i32) {
    %c0_i32 = arith.constant 0 : i32
    %c0_i32_0 = arith.constant 0 : i32
    %c0_i32_1 = arith.constant 0 : i32
    return %c0_i32, %c0_i32_0 : i32, i32
  }
  func.func @transform_10(%arg0: i32, %arg1: i32) -> (i32, i32) {
    %c0_i32 = arith.constant 0 : i32
    %c0_i32_0 = arith.constant 0 : i32
    %c0_i32_1 = arith.constant 0 : i32
    return %c0_i32, %c0_i32_0 : i32, i32
  }
  func.func @transform_11(%arg0: i32, %arg1: i32) -> (i32, i32, i32) {
    %c0_i32 = arith.constant 0 : i32
    %c0_i32_0 = arith.constant 0 : i32
    return %arg0, %arg1, %c0_i32 : i32, i32, i32
  }
}

module attributes {stable_mosaic.version = 11 : i64} {
  func.func @_mha_ln_kernel(%arg0: i32, %arg1: i32, %arg2: memref<1x8x32xf32, #tpu.memory_space<vmem>>, %arg3: memref<1x8x32xf32, #tpu.memory_space<vmem>>, %arg4: memref<1x8x8xf32, #tpu.memory_space<vmem>>, %arg5: memref<32x32xf32, #tpu.memory_space<vmem>>, %arg6: memref<32x1xf32, #tpu.memory_space<vmem>>, %arg7: memref<64x32xf32, #tpu.memory_space<vmem>>, %arg8: memref<64x1xf32, #tpu.memory_space<vmem>>, %arg9: memref<32x32xf32, #tpu.memory_space<vmem>>, %arg10: memref<1x32xf32, #tpu.memory_space<vmem>>, %arg11: memref<1x32xf32, #tpu.memory_space<vmem>>, %arg12: memref<1x32xf32, #tpu.memory_space<vmem>>, %arg13: memref<1x8x32xf32, #tpu.memory_space<vmem>>) attributes {dimension_semantics = [#tpu.dimension_semantics<parallel>, #tpu.dimension_semantics<parallel>], iteration_bounds = array<i64: 2, 1>, scalar_prefetch = 0 : i64, scratch_operands = 0 : i64, tpu.core_type = #tpu.core_type<tc>, window_params = [{transform_indices = @transform_0, window_bounds = array<i64: 1, 8, 32>}, {transform_indices = @transform_1, window_bounds = array<i64: 1, 8, 32>}, {transform_indices = @transform_2, window_bounds = array<i64: 1, 8, 8>}, {pipeline_mode = #tpu.pipeline_mode<synchronous>, transform_indices = @transform_3, window_bounds = array<i64: 32, 32>}, {pipeline_mode = #tpu.pipeline_mode<synchronous>, transform_indices = @transform_4, window_bounds = array<i64: 32, 1>}, {pipeline_mode = #tpu.pipeline_mode<synchronous>, transform_indices = @transform_5, window_bounds = array<i64: 64, 32>}, {pipeline_mode = #tpu.pipeline_mode<synchronous>, transform_indices = @transform_6, window_bounds = array<i64: 64, 1>}, {pipeline_mode = #tpu.pipeline_mode<synchronous>, transform_indices = @transform_7, window_bounds = array<i64: 32, 32>}, {pipeline_mode = #tpu.pipeline_mode<synchronous>, transform_indices = @transform_8, window_bounds = array<i64: 1, 32>}, {pipeline_mode = #tpu.pipeline_mode<synchronous>, transform_indices = @transform_9, window_bounds = array<i64: 1, 32>}, {pipeline_mode = #tpu.pipeline_mode<synchronous>, transform_indices = @transform_10, window_bounds = array<i64: 1, 32>}, {transform_indices = @transform_11, window_bounds = array<i64: 1, 8, 32>}]} {
    %c0 = arith.constant 0 : index
    %c0_0 = arith.constant 0 : index
    %c0_1 = arith.constant 0 : index
    %0 = vector.load %arg2[%c0, %c0_0, %c0_1] : memref<1x8x32xf32, #tpu.memory_space<vmem>>, vector<1x8x32xf32>
    %1 = vector.shape_cast %0 : vector<1x8x32xf32> to vector<8x32xf32>
    %c0_2 = arith.constant 0 : index
    %c0_3 = arith.constant 0 : index
    %c0_4 = arith.constant 0 : index
    %2 = vector.load %arg3[%c0_2, %c0_3, %c0_4] : memref<1x8x32xf32, #tpu.memory_space<vmem>>, vector<1x8x32xf32>
    %3 = vector.shape_cast %2 : vector<1x8x32xf32> to vector<8x32xf32>
    %c0_5 = arith.constant 0 : index
    %c0_6 = arith.constant 0 : index
    %4 = vector.load %arg5[%c0_5, %c0_6] : memref<32x32xf32, #tpu.memory_space<vmem>>, vector<32x32xf32>
    %cst = arith.constant dense<0.000000e+00> : vector<32x8xf32>
    %5 = tpu.matmul %4, %1, %cst {dimension_numbers = #tpu.dot_dimension_numbers<[1], [1], [0], [0], [0, 0, 1, 0], [], []>} : vector<32x32xf32>, vector<8x32xf32>, vector<32x8xf32> -> vector<32x8xf32>
    %c0_7 = arith.constant 0 : index
    %c0_8 = arith.constant 0 : index
    %6 = vector.load %arg6[%c0_7, %c0_8] : memref<32x1xf32, #tpu.memory_space<vmem>>, vector<32x1xf32>
    %7 = vector.broadcast %6 : vector<32x1xf32> to vector<32x8xf32>
    %8 = arith.addf %5, %7 : vector<32x8xf32>
    %c0_9 = arith.constant 0 : index
    %c0_10 = arith.constant 0 : index
    %9 = vector.load %arg7[%c0_9, %c0_10] : memref<64x32xf32, #tpu.memory_space<vmem>>, vector<64x32xf32>
    %cst_11 = arith.constant dense<0.000000e+00> : vector<64x8xf32>
    %10 = tpu.matmul %9, %3, %cst_11 {dimension_numbers = #tpu.dot_dimension_numbers<[1], [1], [0], [0], [0, 0, 1, 0], [], []>} : vector<64x32xf32>, vector<8x32xf32>, vector<64x8xf32> -> vector<64x8xf32>
    %c0_12 = arith.constant 0 : index
    %c0_13 = arith.constant 0 : index
    %11 = vector.load %arg8[%c0_12, %c0_13] : memref<64x1xf32, #tpu.memory_space<vmem>>, vector<64x1xf32>
    %12 = vector.broadcast %11 : vector<64x1xf32> to vector<64x8xf32>
    %13 = arith.addf %10, %12 : vector<64x8xf32>
    %14 = vector.shape_cast %8 : vector<32x8xf32> to vector<4x8x8xf32>
    %15 = vector.extract_strided_slice %13 {offsets = [0, 0], sizes = [32, 8], strides = [1, 1]} : vector<64x8xf32> to vector<32x8xf32>
    %16 = vector.shape_cast %15 : vector<32x8xf32> to vector<4x8x8xf32>
    %17 = vector.extract_strided_slice %13 {offsets = [32, 0], sizes = [32, 8], strides = [1, 1]} : vector<64x8xf32> to vector<32x8xf32>
    %18 = vector.shape_cast %17 : vector<32x8xf32> to vector<4x8x8xf32>
    %c0_14 = arith.constant 0 : index
    %c0_15 = arith.constant 0 : index
    %c0_16 = arith.constant 0 : index
    %19 = vector.load %arg4[%c0_14, %c0_15, %c0_16] : memref<1x8x8xf32, #tpu.memory_space<vmem>>, vector<1x8x8xf32>
    %20 = vector.shape_cast %19 : vector<1x8x8xf32> to vector<8x8xf32>
    %21 = vector.extract_strided_slice %14 {offsets = [0, 0, 0], sizes = [1, 8, 8], strides = [1, 1, 1]} : vector<4x8x8xf32> to vector<1x8x8xf32>
    %22 = vector.shape_cast %21 : vector<1x8x8xf32> to vector<8x8xf32>
    %23 = vector.extract_strided_slice %16 {offsets = [0, 0, 0], sizes = [1, 8, 8], strides = [1, 1, 1]} : vector<4x8x8xf32> to vector<1x8x8xf32>
    %24 = vector.shape_cast %23 : vector<1x8x8xf32> to vector<8x8xf32>
    %cst_17 = arith.constant dense<0.000000e+00> : vector<8x8xf32>
    %25 = tpu.matmul %22, %24, %cst_17 {dimension_numbers = #tpu.dot_dimension_numbers<[0], [0], [1], [1], [0, 1, 1, 1], [], []>} : vector<8x8xf32>, vector<8x8xf32>, vector<8x8xf32> -> vector<8x8xf32>
    %cst_18 = arith.constant 0.353553385 : f32
    %26 = vector.broadcast %cst_18 : f32 to vector<8x8xf32>
    %27 = arith.mulf %25, %26 : vector<8x8xf32>
    %28 = arith.addf %27, %20 : vector<8x8xf32>
    %cst_19 = arith.constant dense<0xFF800000> : vector<8xf32>
    %29 = vector.multi_reduction <maximumf>, %28, %cst_19 [1] : vector<8x8xf32> to vector<8xf32>
    %30 = vector.shape_cast %29 : vector<8xf32> to vector<8x1xf32>
    %31 = vector.broadcast %30 : vector<8x1xf32> to vector<8x8xf32>
    %32 = arith.subf %28, %31 : vector<8x8xf32>
    %33 = math.exp %32 : vector<8x8xf32>
    %cst_20 = arith.constant dense<0.000000e+00> : vector<8xf32>
    %34 = vector.multi_reduction <add>, %33, %cst_20 [1] : vector<8x8xf32> to vector<8xf32>
    %35 = vector.shape_cast %34 : vector<8xf32> to vector<8x1xf32>
    %36 = tpu.reciprocal %35 : vector<8x1xf32> -> vector<8x1xf32>
    %37 = vector.broadcast %36 : vector<8x1xf32> to vector<8x8xf32>
    %38 = arith.mulf %33, %37 : vector<8x8xf32>
    %39 = vector.extract_strided_slice %18 {offsets = [0, 0, 0], sizes = [1, 8, 8], strides = [1, 1, 1]} : vector<4x8x8xf32> to vector<1x8x8xf32>
    %40 = vector.shape_cast %39 : vector<1x8x8xf32> to vector<8x8xf32>
    %cst_21 = arith.constant dense<0.000000e+00> : vector<8x8xf32>
    %41 = tpu.matmul %40, %38, %cst_21 {dimension_numbers = #tpu.dot_dimension_numbers<[1], [1], [0], [0], [0, 0, 1, 0], [], []>} : vector<8x8xf32>, vector<8x8xf32>, vector<8x8xf32> -> vector<8x8xf32>
    %42 = vector.extract_strided_slice %14 {offsets = [1, 0, 0], sizes = [1, 8, 8], strides = [1, 1, 1]} : vector<4x8x8xf32> to vector<1x8x8xf32>
    %43 = vector.shape_cast %42 : vector<1x8x8xf32> to vector<8x8xf32>
    %44 = vector.extract_strided_slice %16 {offsets = [1, 0, 0], sizes = [1, 8, 8], strides = [1, 1, 1]} : vector<4x8x8xf32> to vector<1x8x8xf32>
    %45 = vector.shape_cast %44 : vector<1x8x8xf32> to vector<8x8xf32>
    %cst_22 = arith.constant dense<0.000000e+00> : vector<8x8xf32>
    %46 = tpu.matmul %43, %45, %cst_22 {dimension_numbers = #tpu.dot_dimension_numbers<[0], [0], [1], [1], [0, 1, 1, 1], [], []>} : vector<8x8xf32>, vector<8x8xf32>, vector<8x8xf32> -> vector<8x8xf32>
    %cst_23 = arith.constant 0.353553385 : f32
    %47 = vector.broadcast %cst_23 : f32 to vector<8x8xf32>
    %48 = arith.mulf %46, %47 : vector<8x8xf32>
    %49 = arith.addf %48, %20 : vector<8x8xf32>
    %cst_24 = arith.constant dense<0xFF800000> : vector<8xf32>
    %50 = vector.multi_reduction <maximumf>, %49, %cst_24 [1] : vector<8x8xf32> to vector<8xf32>
    %51 = vector.shape_cast %50 : vector<8xf32> to vector<8x1xf32>
    %52 = vector.broadcast %51 : vector<8x1xf32> to vector<8x8xf32>
    %53 = arith.subf %49, %52 : vector<8x8xf32>
    %54 = math.exp %53 : vector<8x8xf32>
    %cst_25 = arith.constant dense<0.000000e+00> : vector<8xf32>
    %55 = vector.multi_reduction <add>, %54, %cst_25 [1] : vector<8x8xf32> to vector<8xf32>
    %56 = vector.shape_cast %55 : vector<8xf32> to vector<8x1xf32>
    %57 = tpu.reciprocal %56 : vector<8x1xf32> -> vector<8x1xf32>
    %58 = vector.broadcast %57 : vector<8x1xf32> to vector<8x8xf32>
    %59 = arith.mulf %54, %58 : vector<8x8xf32>
    %60 = vector.extract_strided_slice %18 {offsets = [1, 0, 0], sizes = [1, 8, 8], strides = [1, 1, 1]} : vector<4x8x8xf32> to vector<1x8x8xf32>
    %61 = vector.shape_cast %60 : vector<1x8x8xf32> to vector<8x8xf32>
    %cst_26 = arith.constant dense<0.000000e+00> : vector<8x8xf32>
    %62 = tpu.matmul %61, %59, %cst_26 {dimension_numbers = #tpu.dot_dimension_numbers<[1], [1], [0], [0], [0, 0, 1, 0], [], []>} : vector<8x8xf32>, vector<8x8xf32>, vector<8x8xf32> -> vector<8x8xf32>
    %63 = vector.extract_strided_slice %14 {offsets = [2, 0, 0], sizes = [1, 8, 8], strides = [1, 1, 1]} : vector<4x8x8xf32> to vector<1x8x8xf32>
    %64 = vector.shape_cast %63 : vector<1x8x8xf32> to vector<8x8xf32>
    %65 = vector.extract_strided_slice %16 {offsets = [2, 0, 0], sizes = [1, 8, 8], strides = [1, 1, 1]} : vector<4x8x8xf32> to vector<1x8x8xf32>
    %66 = vector.shape_cast %65 : vector<1x8x8xf32> to vector<8x8xf32>
    %cst_27 = arith.constant dense<0.000000e+00> : vector<8x8xf32>
    %67 = tpu.matmul %64, %66, %cst_27 {dimension_numbers = #tpu.dot_dimension_numbers<[0], [0], [1], [1], [0, 1, 1, 1], [], []>} : vector<8x8xf32>, vector<8x8xf32>, vector<8x8xf32> -> vector<8x8xf32>
    %cst_28 = arith.constant 0.353553385 : f32
    %68 = vector.broadcast %cst_28 : f32 to vector<8x8xf32>
    %69 = arith.mulf %67, %68 : vector<8x8xf32>
    %70 = arith.addf %69, %20 : vector<8x8xf32>
    %cst_29 = arith.constant dense<0xFF800000> : vector<8xf32>
    %71 = vector.multi_reduction <maximumf>, %70, %cst_29 [1] : vector<8x8xf32> to vector<8xf32>
    %72 = vector.shape_cast %71 : vector<8xf32> to vector<8x1xf32>
    %73 = vector.broadcast %72 : vector<8x1xf32> to vector<8x8xf32>
    %74 = arith.subf %70, %73 : vector<8x8xf32>
    %75 = math.exp %74 : vector<8x8xf32>
    %cst_30 = arith.constant dense<0.000000e+00> : vector<8xf32>
    %76 = vector.multi_reduction <add>, %75, %cst_30 [1] : vector<8x8xf32> to vector<8xf32>
    %77 = vector.shape_cast %76 : vector<8xf32> to vector<8x1xf32>
    %78 = tpu.reciprocal %77 : vector<8x1xf32> -> vector<8x1xf32>
    %79 = vector.broadcast %78 : vector<8x1xf32> to vector<8x8xf32>
    %80 = arith.mulf %75, %79 : vector<8x8xf32>
    %81 = vector.extract_strided_slice %18 {offsets = [2, 0, 0], sizes = [1, 8, 8], strides = [1, 1, 1]} : vector<4x8x8xf32> to vector<1x8x8xf32>
    %82 = vector.shape_cast %81 : vector<1x8x8xf32> to vector<8x8xf32>
    %cst_31 = arith.constant dense<0.000000e+00> : vector<8x8xf32>
    %83 = tpu.matmul %82, %80, %cst_31 {dimension_numbers = #tpu.dot_dimension_numbers<[1], [1], [0], [0], [0, 0, 1, 0], [], []>} : vector<8x8xf32>, vector<8x8xf32>, vector<8x8xf32> -> vector<8x8xf32>
    %84 = vector.extract_strided_slice %14 {offsets = [3, 0, 0], sizes = [1, 8, 8], strides = [1, 1, 1]} : vector<4x8x8xf32> to vector<1x8x8xf32>
    %85 = vector.shape_cast %84 : vector<1x8x8xf32> to vector<8x8xf32>
    %86 = vector.extract_strided_slice %16 {offsets = [3, 0, 0], sizes = [1, 8, 8], strides = [1, 1, 1]} : vector<4x8x8xf32> to vector<1x8x8xf32>
    %87 = vector.shape_cast %86 : vector<1x8x8xf32> to vector<8x8xf32>
    %cst_32 = arith.constant dense<0.000000e+00> : vector<8x8xf32>
    %88 = tpu.matmul %85, %87, %cst_32 {dimension_numbers = #tpu.dot_dimension_numbers<[0], [0], [1], [1], [0, 1, 1, 1], [], []>} : vector<8x8xf32>, vector<8x8xf32>, vector<8x8xf32> -> vector<8x8xf32>
    %cst_33 = arith.constant 0.353553385 : f32
    %89 = vector.broadcast %cst_33 : f32 to vector<8x8xf32>
    %90 = arith.mulf %88, %89 : vector<8x8xf32>
    %91 = arith.addf %90, %20 : vector<8x8xf32>
    %cst_34 = arith.constant dense<0xFF800000> : vector<8xf32>
    %92 = vector.multi_reduction <maximumf>, %91, %cst_34 [1] : vector<8x8xf32> to vector<8xf32>
    %93 = vector.shape_cast %92 : vector<8xf32> to vector<8x1xf32>
    %94 = vector.broadcast %93 : vector<8x1xf32> to vector<8x8xf32>
    %95 = arith.subf %91, %94 : vector<8x8xf32>
    %96 = math.exp %95 : vector<8x8xf32>
    %cst_35 = arith.constant dense<0.000000e+00> : vector<8xf32>
    %97 = vector.multi_reduction <add>, %96, %cst_35 [1] : vector<8x8xf32> to vector<8xf32>
    %98 = vector.shape_cast %97 : vector<8xf32> to vector<8x1xf32>
    %99 = tpu.reciprocal %98 : vector<8x1xf32> -> vector<8x1xf32>
    %100 = vector.broadcast %99 : vector<8x1xf32> to vector<8x8xf32>
    %101 = arith.mulf %96, %100 : vector<8x8xf32>
    %102 = vector.extract_strided_slice %18 {offsets = [3, 0, 0], sizes = [1, 8, 8], strides = [1, 1, 1]} : vector<4x8x8xf32> to vector<1x8x8xf32>
    %103 = vector.shape_cast %102 : vector<1x8x8xf32> to vector<8x8xf32>
    %cst_36 = arith.constant dense<0.000000e+00> : vector<8x8xf32>
    %104 = tpu.matmul %103, %101, %cst_36 {dimension_numbers = #tpu.dot_dimension_numbers<[1], [1], [0], [0], [0, 0, 1, 0], [], []>} : vector<8x8xf32>, vector<8x8xf32>, vector<8x8xf32> -> vector<8x8xf32>
    %105 = tpu.concatenate %41, %62, %83, %104 in 0 : vector<8x8xf32>, vector<8x8xf32>, vector<8x8xf32>, vector<8x8xf32> -> vector<32x8xf32>
    %c0_37 = arith.constant 0 : index
    %c0_38 = arith.constant 0 : index
    %106 = vector.load %arg9[%c0_37, %c0_38] : memref<32x32xf32, #tpu.memory_space<vmem>>, vector<32x32xf32>
    %cst_39 = arith.constant dense<0.000000e+00> : vector<8x32xf32>
    %107 = tpu.matmul %105, %106, %cst_39 {dimension_numbers = #tpu.dot_dimension_numbers<[0], [0], [1], [1], [0, 1, 1, 1], [], []>} : vector<32x8xf32>, vector<32x32xf32>, vector<8x32xf32> -> vector<8x32xf32>
    %c0_40 = arith.constant 0 : index
    %c0_41 = arith.constant 0 : index
    %108 = vector.load %arg10[%c0_40, %c0_41] : memref<1x32xf32, #tpu.memory_space<vmem>>, vector<1x32xf32>
    %109 = vector.broadcast %108 : vector<1x32xf32> to vector<8x32xf32>
    %110 = arith.addf %107, %109 : vector<8x32xf32>
    %111 = arith.addf %1, %110 : vector<8x32xf32>
    %cst_42 = arith.constant dense<0.000000e+00> : vector<8xf32>
    %112 = vector.multi_reduction <add>, %111, %cst_42 [1] : vector<8x32xf32> to vector<8xf32>
    %113 = vector.shape_cast %112 : vector<8xf32> to vector<8x1xf32>
    %cst_43 = arith.constant 3.200000e+01 : f32
    %114 = vector.broadcast %cst_43 : f32 to vector<8x1xf32>
    %115 = arith.divf %113, %114 : vector<8x1xf32>
    %116 = vector.broadcast %115 : vector<8x1xf32> to vector<8x32xf32>
    %117 = arith.subf %111, %116 : vector<8x32xf32>
    %118 = arith.mulf %117, %117 : vector<8x32xf32>
    %cst_44 = arith.constant dense<0.000000e+00> : vector<8xf32>
    %119 = vector.multi_reduction <add>, %118, %cst_44 [1] : vector<8x32xf32> to vector<8xf32>
    %120 = vector.shape_cast %119 : vector<8xf32> to vector<8x1xf32>
    %cst_45 = arith.constant 3.200000e+01 : f32
    %121 = vector.broadcast %cst_45 : f32 to vector<8x1xf32>
    %122 = arith.divf %120, %121 : vector<8x1xf32>
    %123 = vector.broadcast %115 : vector<8x1xf32> to vector<8x32xf32>
    %124 = arith.subf %111, %123 : vector<8x32xf32>
    %cst_46 = arith.constant 9.99999974E-6 : f32
    %125 = vector.broadcast %cst_46 : f32 to vector<8x1xf32>
    %126 = arith.addf %122, %125 : vector<8x1xf32>
    %127 = math.rsqrt %126 : vector<8x1xf32>
    %128 = vector.broadcast %127 : vector<8x1xf32> to vector<8x32xf32>
    %129 = arith.mulf %124, %128 : vector<8x32xf32>
    %c0_47 = arith.constant 0 : index
    %c0_48 = arith.constant 0 : index
    %130 = vector.load %arg11[%c0_47, %c0_48] : memref<1x32xf32, #tpu.memory_space<vmem>>, vector<1x32xf32>
    %131 = vector.broadcast %130 : vector<1x32xf32> to vector<8x32xf32>
    %132 = arith.mulf %129, %131 : vector<8x32xf32>
    %c0_49 = arith.constant 0 : index
    %c0_50 = arith.constant 0 : index
    %133 = vector.load %arg12[%c0_49, %c0_50] : memref<1x32xf32, #tpu.memory_space<vmem>>, vector<1x32xf32>
    %134 = vector.broadcast %133 : vector<1x32xf32> to vector<8x32xf32>
    %135 = arith.addf %132, %134 : vector<8x32xf32>
    %c0_51 = arith.constant 0 : index
    %c0_52 = arith.constant 0 : index
    %c0_53 = arith.constant 0 : index
    %136 = vector.load %arg13[%c0_51, %c0_52, %c0_53] : memref<1x8x32xf32, #tpu.memory_space<vmem>>, vector<1x8x32xf32>
    %137 = vector.shape_cast %136 : vector<1x8x32xf32> to vector<8x32xf32>
    %138 = vector.shape_cast %135 : vector<8x32xf32> to vector<1x8x32xf32>
    tpu.vector_store %arg13[%c0_51, %c0_52, %c0_53], %138 {strides = array<i32>} : memref<1x8x32xf32, #tpu.memory_space<vmem>>, vector<1x8x32xf32>,
    return
  }
  func.func @transform_0(%arg0: i32, %arg1: i32) -> (i32, i32, i32) {
    %c0_i32 = arith.constant 0 : i32
    %c0_i32_0 = arith.constant 0 : i32
    return %arg0, %arg1, %c0_i32 : i32, i32, i32
  }
  func.func @transform_1(%arg0: i32, %arg1: i32) -> (i32, i32, i32) {
    %c0_i32 = arith.constant 0 : i32
    %c0_i32_0 = arith.constant 0 : i32
    %c0_i32_1 = arith.constant 0 : i32
    return %arg0, %c0_i32, %c0_i32_0 : i32, i32, i32
  }
  func.func @transform_2(%arg0: i32, %arg1: i32) -> (i32, i32, i32) {
    %c0_i32 = arith.constant 0 : i32
    %c0_i32_0 = arith.constant 0 : i32
    return %arg0, %arg1, %c0_i32 : i32, i32, i32
  }
  func.func @transform_3(%arg0: i32, %arg1: i32) -> (i32, i32) {
    %c0_i32 = arith.constant 0 : i32
    %c0_i32_0 = arith.constant 0 : i32
    %c0_i32_1 = arith.constant 0 : i32
    return %c0_i32, %c0_i32_0 : i32, i32
  }
  func.func @transform_4(%arg0: i32, %arg1: i32) -> (i32, i32) {
    %c0_i32 = arith.constant 0 : i32
    %c0_i32_0 = arith.constant 0 : i32
    %c0_i32_1 = arith.constant 0 : i32
    return %c0_i32, %c0_i32_0 : i32, i32
  }
  func.func @transform_5(%arg0: i32, %arg1: i32) -> (i32, i32) {
    %c0_i32 = arith.constant 0 : i32
    %c0_i32_0 = arith.constant 0 : i32
    %c0_i32_1 = arith.constant 0 : i32
    return %c0_i32, %c0_i32_0 : i32, i32
  }
  func.func @transform_6(%arg0: i32, %arg1: i32) -> (i32, i32) {
    %c0_i32 = arith.constant 0 : i32
    %c0_i32_0 = arith.constant 0 : i32
    %c0_i32_1 = arith.constant 0 : i32
    return %c0_i32, %c0_i32_0 : i32, i32
  }
  func.func @transform_7(%arg0: i32, %arg1: i32) -> (i32, i32) {
    %c0_i32 = arith.constant 0 : i32
    %c0_i32_0 = arith.constant 0 : i32
    %c0_i32_1 = arith.constant 0 : i32
    return %c0_i32, %c0_i32_0 : i32, i32
  }
  func.func @transform_8(%arg0: i32, %arg1: i32) -> (i32, i32) {
    %c0_i32 = arith.constant 0 : i32
    %c0_i32_0 = arith.constant 0 : i32
    %c0_i32_1 = arith.constant 0 : i32
    return %c0_i32, %c0_i32_0 : i32, i32
  }
  func.func @transform_9(%arg0: i32, %arg1: i32) -> (i32, i32) {
    %c0_i32 = arith.constant 0 : i32
    %c0_i32_0 = arith.constant 0 : i32
    %c0_i32_1 = arith.constant 0 : i32
    return %c0_i32, %c0_i32_0 : i32, i32
  }
  func.func @transform_10(%arg0: i32, %arg1: i32) -> (i32, i32) {
    %c0_i32 = arith.constant 0 : i32
    %c0_i32_0 = arith.constant 0 : i32
    %c0_i32_1 = arith.constant 0 : i32
    return %c0_i32, %c0_i32_0 : i32, i32
  }
  func.func @transform_11(%arg0: i32, %arg1: i32) -> (i32, i32, i32) {
    %c0_i32 = arith.constant 0 : i32
    %c0_i32_0 = arith.constant 0 : i32
    return %arg0, %arg1, %c0_i32 : i32, i32, i32
  }
}

</mosaic_0001>

<bundles_post_ra>
// kernel: tpu_custom_call.1
= control target key start
LH: loop header
LB: loop body
LE: loop exit
PB: predicated region body
PF: predicated region fallthrough
CT: control target
= control target key end

     0   :  { %s1829_s0 = inlined_call_operand.vmem [shape: f32[2,8,32], index: 0, kind: input, shape index: {}]   ;;  %s1830_s1 = inlined_call_operand.vmem [shape: f32[2,8,32], index: 1, kind: input, shape index: {}]   ;;  %s1831_s2 = inlined_call_operand.vmem [shape: f32[2,8,8], index: 2, kind: input, shape index: {}]   ;;  %s1832_s3 = inlined_call_operand.vmem [shape: f32[32,32], index: 3, kind: input, shape index: {}]   ;;  %s1833_s4 = inlined_call_operand.vmem [shape: f32[32,1], index: 4, kind: input, shape index: {}]   ;;  %s1834_s5 = inlined_call_operand.vmem [shape: f32[64,32], index: 5, kind: input, shape index: {}]   ;;  %s1835_s6 = inlined_call_operand.vmem [shape: f32[64,1], index: 6, kind: input, shape index: {}]   ;;  %s1836_s7 = inlined_call_operand.vmem [shape: f32[32,32], index: 7, kind: input, shape index: {}]   ;;  %s1837_s8 = inlined_call_operand.vmem [shape: f32[1,32], index: 8, kind: input, shape index: {}]   ;;  %s1838_s9 = inlined_call_operand.vmem [shape: f32[1,32], index: 9, kind: input, shape index: {}]   ;;  %s1839_s10 = inlined_call_operand.vmem [shape: f32[1,32], index: 10, kind: input, shape index: {}]   ;;  %s1840_s11 = inlined_call_operand.hbm [shape: f32[2,8,32], index: 11, kind: output, shape index: {}]  }
   0x1   :  { %1843 = sst [smem:[#allocation7_spill]] %s1829_s0 }
   0x2   :  { %16 = vsyncpa [#allocation3], 0 }
   0x3   :  { %18 = vsyncpa [#allocation3 + $0x1], 0  ;;  %s1567_s17 = smov 0   ;;  %s1569_s18 = smov 0  }
   0x4   :  { %s1571_s19 = smov 0   ;;  %s1573_s20 = smov 0  }
   0x5   :  { %s1575_s21 = smov 0   ;;  %s1577_s22 = smov 0  }
   0x6 LB: > { %1844 = sst [smem:[#allocation5_spill]] %s1499_s21  ;;  %s1300_s23 = sadd.s32 4294967295, %s1503_s22   ;;  %s1503_s22 = sphi %s1577_s22, %s24_s22   ;;  %s1499_s21 = sphi %s1575_s21, %s1850_s21   ;;  %s1495_s20 = sphi %s1573_s20, %s1849_s20   ;;  %s1491_s19 = sphi %s1571_s19, %s1853_s19   ;;  %s1487_s18 = sphi %s1569_s18, %s1852_s18   ;;  %s1483_s17 = sphi %s1567_s17, %s1851_s17  }
   0x7   : > { %s1301_s24 = sadd.s32 4294967294, %s1503_s22   ;;  %s36_s25 = sadd.s32 1, %s1499_s21 }
   0x8   : > { %s295_s26 = sadd.s32 1, %s1491_s19  ;;  %p38_p0 = scmp.ge.s32.totalorder %s36_s25, 2 }
   0x9   : > { %p305_p1 = scmp.ne.s32.totalorder %s1491_s19, %s1487_s18  ;;  %p306_p2 = scmp.eq.s32.totalorder %s1300_s23, 1 }
   0xa   : > { %p311_p3 = scmp.ne.s32.totalorder %s1487_s18, %s1483_s17  ;;  %s1855_s25 = smov (%p38_p0, %s36_s25), 0 }
   0xb   : > { %1845 = sst [smem:[#allocation6_spill]] %s1855_s25  ;;  %p1607_p4 = por %p306_p2, %p305_p1 }
   0xc   : > { %p312_p5 = scmp.eq.s32.totalorder %s1301_s24, 1  ;;  %s290_s28 = ssub.s32 %s1499_s21, %s1855_s25 }
   0xd   : > { %p1304_p6 = scmp.ge.s32.totalorder %s1503_s22, 1  ;;  %p293_p7 = scmp.eq.s32.totalorder %s290_s28, 0 }
   0xe   : > { %p1614_p8 = por %p312_p5, %p311_p3  ;;  %p381_p9 = scmp.lt.s32.totalorder %s1503_s22, 3 }
   0xf   : > { %s1620_s30 = scalar_select %p293_p7, %s1491_s19, %s295_s26  }
  0x10   : > { %p382_p10 = pnand %p1304_p6, %p381_p9 }
  0x11   : > { %p434_p11 = scmp.lt.s32.totalorder (!%p382_p10), %s1495_s20, 1  ;;  %s1848_s0 = sld [smem:[#allocation7_spill]] (!%p382_p10) }
  0x12   : > { %385 = sbr.rel (%p382_p10) target bundleno = 1425 (0x591), region = 64  ;;  %s431_s26 = sand.u32 (!%p382_p10), 1, %s1487_s18  }
  0x13   : > { %s1305_s28 = sshll.u32 (!%p382_p10), %s431_s26, 3  ;;  %s1337_s12 = sshll.u32 (!%p382_p10), %s1495_s20, 3 }
  0x17   : > { %v458_v0 = vld [vmem:[%s1833_s4] sm:$0xff]  ;;  %v1505_v1 = vmov 0   ;;  %s435_s14 = scalar_select %p434_p11, %s1495_s20, 1  ;;  %v460_v2 = vld [vmem:[%s1833_s4 + $0x10] sm:$0xff]  ;;  %vm482_vm0 = vcmask 261120   ;;  %v459_v7 = vld [vmem:[%s1833_s4 + $0x8] sm:$0xff] }
  0x18   : > { %1399 = vset.pattern.permute.xlu0 %v1505_v1  ;;  %1400 = vset.pattern.permute.xlu1 %v1505_v1  ;;  %v535_v3 = vld [vmem:[%s1835_s6] sm:$0xff]  ;;  %v461_v9 = vld [vmem:[%s1833_s4 + $0x18] sm:$0xff]  ;;  %v536_v10 = vld [vmem:[%s1835_s6 + $0x8] sm:$0xff]  ;;  %vm684_vm1 = vcmask 64512  }
  0x19   : > { %464 = vperm.xlu0 %1399, %v458_v0   ;;  %1401 = vset.pattern.permute.xlu2 %v1505_v1  ;;  %s1630_s23 = sshll.u32 %s435_s14, 3  ;;  %v454_v6 = vld [vmem:[%s1832_s3] sm:$0xff]  ;;  %v455_v11 = vld [vmem:[%s1832_s3 + $0x8] sm:$0xff]  ;;  %v537_v12 = vld [vmem:[%s1835_s6 + $0x10] sm:$0xff] }
  0x1a   : > { %474 = vperm.xlu1 %1400, %v460_v2   ;;  %s440_s13 = scalar_lea.vmem %s1848_s0, %s1630_s23  ;;  %545 = vperm.xlu2 %1401, %v535_v3   ;;  %s444_s25 = scalar_lea.vmem %s1830_s1, %s1630_s23  ;;  %v527_v8 = vld [vmem:[%s1834_s5] sm:$0xff]  ;;  %v528_v13 = vld [vmem:[%s1834_s5 + $0x8] sm:$0xff]  ;;  %v538_v14 = vld [vmem:[%s1835_s6 + $0x18] sm:$0xff] }
  0x1b   : > { %v1639_v4 = vld [vmem:[%s440_s13] sm:$0xff]  ;;  %v456_v15 = vld [vmem:[%s1832_s3 + $0x10] sm:$0xff]  ;;  %v457_v17 = vld [vmem:[%s1832_s3 + $0x18] sm:$0xff]  ;;  %s451_s24 = scalar_lea.vmem %s1831_s2, %s1630_s23  ;;  %s1186_s13 = scalar_lea.sflag [#allocation3], %s431_s26 }
  0x1c   : > { %1309 = vmatpush.xpose.msk.msra.mxu0 %vm482_vm0, %v1639_v4  ;;  %v453_v5 = vld [vmem:[%s444_s25] sm:$0xff]  ;;  %v529_v16 = vld [vmem:[%s1834_s5 + $0x10] sm:$0xff]  ;;  %v530_v18 = vld [vmem:[%s1834_s5 + $0x18] sm:$0xff]  ;;  %s1197_s25 = scalar_lea.hbm %s1840_s11, %s1337_s12 }
  0x1d   : > { %1314 = vmatpush.xpose.msk.msra.mxu1 %vm482_vm0, %v453_v5  ;;  %1340 = vmatpush.xpose.msk.msra.mxu3 %vm482_vm0, %v453_v5  ;;  %v533_v19 = vld [vmem:[%s1834_s5 + $0x30] sm:$0xff]  ;;  %v534_v44 = vld [vmem:[%s1834_s5 + $0x38] sm:$0xff]  ;;  %v651_v50 = vld [vmem:[%s451_s24] sm:$0xff]  ;;  %s433_s24 = scalar_lea.vmem [#allocation2], %s1305_s28  ;;  %s1201_s0 = sshll.u32 %s1197_s25, 4  ;;  %s1202_s0 = int_to_ptr.hbm [resolvable:$true] %s1201_s0 }
  0x1e   : > { %v531_v53 = vld [vmem:[%s1834_s5 + $0x20] sm:$0xff]  ;;  %v532_v56 = vld [vmem:[%s1834_s5 + $0x28] sm:$0xff]  ;;  %s1199_s20 = sshll.u32 %s433_s24, 4  ;;  %s1439_s23 = sshra.s32 %s1202_s0, 4  ;;  %s1200_s20 = int_to_ptr.vmem [resolvable:$true] %s1199_s20  ;;  %s1440_s23 = int_to_ptr.hbm [resolvable:$true] %s1439_s23 }
  0x1f   : > { %1310 = vmatmul.msk.f32.vlgmr.msra.gmra.mxu0 %vm482_vm0, %v454_v6  ;;  %s1441_s12 = scalar_lea.hbm %s1440_s23, 8  ;;  %s1445_s28 = scalar_lea.hbm %s1840_s11, 16 }
  0x20   : > { %1315 = vmatmul.msk.f32.vlgmr.msra.gmra.mxu1 %vm482_vm0, %v527_v8  ;;  %1321 = vmatmul.msk.f32.vlgmr.msra.gmra.mxu3 %vm482_vm0, %v533_v19  ;;  %p1442_p12 = scmp.ne.s32.totalorder %s1440_s23, %s1441_s12  ;;  %p1446_p1 = scmp.lt.s32.totalorder %s1440_s23, %s1840_s11 }
  0x21   : > { %469 = vperm.xlu0 %1399, %v459_v7   ;;  %v540_v7 = vld [vmem:[%s1835_s6 + $0x28] sm:$0xff]  ;;  %p1447_p2 = scmp.lt.s32.totalorder %s1445_s28, %s1441_s12 }
  0x22   : > { %479 = vperm.xlu1 %1400, %v461_v9   ;;  %550 = vperm.xlu2 %1401, %v536_v10   ;;  %p1443_p13 = pnand %p1442_p12, %p1607_p4 }
  0x23   : > { %p1448_p3 = por %p1447_p2, %p1446_p1 }
  0x24   : > { %p1444_p0 = pneg %p1443_p13 }
  0x26   : > { %p1449_p5 = pnand %p1448_p3, %p1444_p0 }
  0x27   : > { %1311 = vmatmul.msk.f32.gmra.mxu0 %vm482_vm0, %v455_v11 }
  0x28   : > { %1316 = vmatmul.msk.f32.gmra.mxu1 %vm482_vm0, %v528_v13  ;;  %1322 = vmatmul.msk.f32.gmra.mxu3 %vm482_vm0, %v534_v44 }
  0x29   : > { %555 = vperm.xlu0 %1399, %v537_v12  }
  0x2a   : > { %560 = vperm.xlu1 %1400, %v538_v14  }
  0x2f   : > { %1312 = vmatmul.msk.f32.gmra.mxu0 %vm482_vm0, %v456_v15 }
  0x30   : > { %1317 = vmatmul.msk.f32.gmra.mxu1 %vm482_vm0, %v529_v16 }
  0x37   : > { %1313 = vmatmul.msk.f32.gmra.mxu0 %vm482_vm0, %v457_v17 }
  0x38   : > { %1318 = vmatmul.msk.f32.gmra.mxu1 %vm482_vm0, %v530_v18 }
  0x40   : > { %1319 = vmatmul.msk.f32.gmra.mxu1 %vm482_vm0, %v531_v53 }
  0x48   : > { %1320 = vmatmul.msk.f32.gmra.mxu1 %vm482_vm0, %v532_v56 }
  0x74   : > { %v546_v21 = vpop.permute.xlu2 %545 }
  0x7c   : > { %v551_v28 = vpop.permute.xlu2 %550 }
  0x8b   : > { %v465_v20 = vpop.permute.xlu0 %464 }
  0x8c   : > { %v475_v26 = vpop.permute.xlu1 %474 }
  0x93   : > { %v470_v27 = vpop.permute.xlu0 %469 }
  0x94   : > { %v480_v33 = vpop.permute.xlu1 %479 }
  0x9b   : > { %v556_v35 = vpop.permute.xlu0 %555 }
  0x9c   : > { %v515_v22 = vpop.f32.mrf.mxu0  ;;  %v561_v40 = vpop.permute.xlu1 %560 }
  0x9d   : > { %v516_v23 = vadd.f32 %v515_v22, %v465_v20  ;;  %v627_v24 = vpop.f32.mrf.mxu1 }
  0x9e   : > { %v628_v25 = vadd.f32 %v627_v24, %v546_v21 }
  0x9f   : > { %652 = vxpose.xlu2.b32.start.end [1/1] (short) (narrow) %v516_v23, 8 }
  0xa0   : > { %703 = vmatpush.msra.mxu2 %v628_v25 }
  0xa3   : > { %v1712_v49 = vpop.f32.mrf.mxu3 }
  0xa4   : > { %v518_v29 = vpop.f32.mrf.mxu0 }
  0xa5   : > { %v519_v30 = vadd.f32 %v518_v29, %v470_v27  ;;  %v630_v31 = vpop.f32.mrf.mxu1  ;;  %v542_v29 = vld [vmem:[%s1835_s6 + $0x38] sm:$0xff] }
  0xa6   : > { %v631_v32 = vadd.f32 %v630_v31, %v551_v28  ;;  %v539_v28 = vld [vmem:[%s1835_s6 + $0x20] sm:$0xff] }
  0xa7   : > { %708 = vxpose.xlu0.b32.start.end [1/1] (short) (narrow) %v519_v30, 8  ;;  %v541_v30 = vld [vmem:[%s1835_s6 + $0x30] sm:$0xff] }
  0xa8   : > { %758 = vmatpush.msrb.mxu3 %v631_v32 }
  0xab   : > { %v1722_v57 = vpop.f32.mrf.mxu3 }
  0xac   : > { %v521_v34 = vpop.f32.mrf.mxu0 }
  0xad   : > { %v522_v36 = vadd.f32 %v521_v34, %v475_v26  ;;  %v633_v37 = vpop.f32.mrf.mxu1 }
  0xae   : > { %v634_v38 = vadd.f32 %v633_v37, %v556_v35 }
  0xaf   : > { %763 = vxpose.xlu1.b32.start.end [1/1] (short) (narrow) %v522_v36, 8 }
  0xb0   : > { %813 = vmatpush.msrb.mxu2 %v634_v38 }
  0xb4   : > { %v524_v39 = vpop.f32.mrf.mxu0 }
  0xb5   : > { %v525_v41 = vadd.f32 %v524_v39, %v480_v33  ;;  %v636_v42 = vpop.f32.mrf.mxu1 }
  0xb6   : > { %v637_v43 = vadd.f32 %v636_v42, %v561_v40 }
  0xb7   : > { %818 = vxpose.xlu2.b32.start.end [1/1] (short) (narrow) %v525_v41, 8 }
  0xb8   : > { %868 = vmatpush.msra.mxu3 %v637_v43 }
 0x138   : > { %v668_v45 = vpop.trf.xlu2 }
 0x139   : > { %1323 = vmatmul.msk.f32.vlgmr.msra.gmra.mxu2 %vm684_vm1, %v668_v45 }
 0x14b   : > { %v724_v46 = vpop.trf.xlu0 }
 0x14c   : > { %1324 = vmatmul.msk.f32.vlgmr.msrb.gmra.mxu3 %vm684_vm1, %v724_v46  ;;  %v639_v46 = vpop.f32.mrf.mxu1 }
 0x150   : > { %v834_v47 = vpop.trf.xlu2 }
 0x153   : > { %v779_v48 = vpop.trf.xlu1 }
 0x154   : > { %1325 = vmatmul.msk.f32.vlgmr.msrb.gmra.mxu2 %vm684_vm1, %v779_v48  ;;  %1326 = vmatmul.msk.f32.vlgmr.msra.gmra.mxu3 %vm684_vm1, %v834_v47 }
 0x1bc   : > { %v705_v51 = vpop.f32.mrf.mxu2 }
 0x1bd   : > { %v873_v52 = vmul.f32 0.35355338, %v705_v51 }
 0x1bf   : > { %v877_v54 = vadd.f32 %v873_v52, %v651_v50 }
 0x1c1   : > { %v881_v55 = vsel %vm684_vm1, %v877_v54, -inf }
 0x1c2   : > { %882 = vmax.xlane.f32.xlu0 %v881_v55 }
 0x1cf   : > { %v760_v58 = vpop.f32.mrf.mxu3 }
 0x1d0   : > { %v874_v59 = vmul.f32 0.35355338, %v760_v58 }
 0x1d2   : > { %v878_v60 = vadd.f32 %v874_v59, %v651_v50 }
 0x1d4   : > { %v884_v61 = vsel %vm684_vm1, %v878_v60, -inf }
 0x1d5   : > { %885 = vmax.xlane.f32.xlu2 %v884_v61 }
 0x1d7   : > { %v815_v62 = vpop.f32.mrf.mxu2  ;;  %v870_v63 = vpop.f32.mrf.mxu3 }
 0x1d8   : > { %v875_v0 = vmul.f32 0.35355338, %v815_v62  ;;  %v876_v1 = vmul.f32 0.35355338, %v870_v63 }
 0x1da   : > { %v879_v2 = vadd.f32 %v875_v0, %v651_v50  ;;  %v880_v3 = vadd.f32 %v876_v1, %v651_v50 }
 0x1dc   : > { %v887_v5 = vsel %vm684_vm1, %v879_v2, -inf  ;;  %v890_v6 = vsel %vm684_vm1, %v880_v3, -inf }
 0x1dd   : > { %888 = vmax.xlane.f32.xlu1 %v887_v5  ;;  %891 = vmax.xlane.f32.xlu0 %v890_v6 }
 0x1f1   : > { %570 = vperm.xlu0 %1399, %v540_v7  }
 0x235   : > { %v883_v8 = vpop.xlane.xlu0 %882 }
 0x236   : > { %v893_v9 = vsub.f32 %v877_v54, %v883_v8 }
 0x238   : > { %v897_v10 = vmul.f32 1.442695, %v893_v9 }
 0x23a   : > { %1405 = vpow2.f32 %v897_v10 }
 0x240   : > { %v1406_v11 = vpop.eup %1405 }
 0x241   : > { %v905_v12 = vsel %vm684_vm1, %v1406_v11, 0.0 }
 0x242   : > { %906 = vadd.xlane.f32.xlu1 %v905_v12 }
 0x248   : > { %v886_v13 = vpop.xlane.xlu2 %885 }
 0x249   : > { %v894_v14 = vsub.f32 %v878_v60, %v886_v13 }
 0x24b   : > { %v899_v15 = vmul.f32 1.442695, %v894_v14 }
 0x24d   : > { %1407 = vpow2.f32 %v899_v15 }
 0x250   : > { %v889_v16 = vpop.xlane.xlu1 %888  ;;  %v892_v17 = vpop.xlane.xlu0 %891 }
 0x251   : > { %v895_v18 = vsub.f32 %v879_v2, %v889_v16  ;;  %v896_v19 = vsub.f32 %v880_v3, %v892_v17  ;;  %v642_v2 = vpop.f32.mrf.mxu1 }
 0x253   : > { %v1732_v20 = vpop.eup %1407  ;;  %v901_v21 = vmul.f32 1.442695, %v895_v18  ;;  %v903_v22 = vmul.f32 1.442695, %v896_v19 }
 0x254   : > { %v908_v23 = vsel %vm684_vm1, %v1732_v20, 0.0 }
 0x255   : > { %1409 = vpow2.f32 %v901_v21  ;;  %909 = vadd.xlane.f32.xlu2 %v908_v23 }
 0x256   : > { %1411 = vpow2.f32 %v903_v22 }
 0x25b   : > { %v1736_v24 = vpop.eup %1409 }
 0x25c   : > { %v1738_v25 = vpop.eup %1411  ;;  %v911_v26 = vsel %vm684_vm1, %v1736_v24, 0.0 }
 0x25d   : > { %912 = vadd.xlane.f32.xlu0 %v911_v26  ;;  %v914_v27 = vsel %vm684_vm1, %v1738_v25, 0.0 }
 0x25e   : > { %915 = vadd.xlane.f32.xlu1 %v914_v27 }
 0x263   : > { %v571_v43 = vpop.permute.xlu0 %570 }
 0x26d   : > { %565 = vperm.xlu2 %1401, %v539_v28  }
 0x271   : > { %580 = vperm.xlu0 %1399, %v542_v29  }
 0x277   : > { %575 = vperm.xlu1 %1400, %v541_v30  }
 0x2b5   : > { %v907_v31 = vpop.xlane.xlu1 %906 }
 0x2b6   : > { %1413 = vrcp.f32 %v907_v31  ;;  %v928_v35 = vand.u32 2147483648, %v907_v31  ;;  %v926_v37 = vand.u32 2147483647, %v907_v31  ;;  %vm922_vm3 = vweird.f32 %v907_v31 }
 0x2b8   : > { %v929_v39 = vor.u32 1.1754944e-38, %v928_v35  ;;  %vm927_vm5 = vcmp.eq.f32.partialorder %v926_v37, 8.507059e+37  ;;  %v1402_v35 = vld [vmem:[%s1837_s8] ss:$0 sm:$0xff] }
 0x2bc   : > { %v1414_v32 = vpop.eup %1413 }
 0x2bd   : > { %v918_v33 = vmul.f32 %v1414_v32, %v907_v31  ;;  %vm923_vm2 = vweird.f32 %v1414_v32 }
 0x2be   : > { %vm924_vm4 = vmor %vm922_vm3, %vm923_vm2 }
 0x2bf   : > { %v919_v34 = vsub.f32 1.0, %v918_v33 }
 0x2c1   : > { %v920_v36 = vmul.f32 %v1414_v32, %v919_v34 }
 0x2c3   : > { %v921_v38 = vadd.f32 %v1414_v32, %v920_v36 }
 0x2c5   : > { %v925_v40 = vsel %vm924_vm4, %v1414_v32, %v921_v38 }
 0x2c6   : > { %v930_v41 = vsel %vm927_vm5, %v929_v39, %v925_v40  ;;  %v1506_v40 = vmov 32.0  }
 0x2c7   : > { %v973_v42 = vmul.f32 %v1406_v11, %v930_v41  ;;  %v643_v11 = vadd.f32 %v642_v2, %v571_v43 }
 0x2c8   : > { %v910_v44 = vpop.xlane.xlu2 %909 }
 0x2c9   : > { %1415 = vrcp.f32 %v910_v44  ;;  %1327 = vmatpush.xpose.msk.msra.mxu2 %vm684_vm1, %v973_v42  ;;  %v942_v53 = vand.u32 2147483648, %v910_v44  ;;  %v940_v56 = vand.u32 2147483647, %v910_v44  ;;  %vm936_vm7 = vweird.f32 %v910_v44 }
 0x2cb   : > { %v943_v60 = vor.u32 1.1754944e-38, %v942_v53  ;;  %vm941_vm9 = vcmp.eq.f32.partialorder %v940_v56, 8.507059e+37 }
 0x2cf   : > { %v1416_v45 = vpop.eup %1415 }
 0x2d0   : > { %v932_v47 = vmul.f32 %v1416_v45, %v910_v44  ;;  %v913_v48 = vpop.xlane.xlu0 %912  ;;  %v566_v50 = vpop.permute.xlu2 %565  ;;  %vm937_vm6 = vweird.f32 %v1416_v45 }
 0x2d1   : > { %v916_v51 = vpop.xlane.xlu1 %915  ;;  %1417 = vrcp.f32 %v913_v48  ;;  %v640_v54 = vadd.f32 %v639_v46, %v566_v50  ;;  %vm938_vm8 = vmor %vm936_vm7, %vm937_vm6  ;;  %v956_v7 = vand.u32 2147483648, %v913_v48  ;;  %v954_v10 = vand.u32 2147483647, %v913_v48 }
 0x2d2   : > { %v933_v52 = vsub.f32 1.0, %v932_v47  ;;  %1419 = vrcp.f32 %v916_v51  ;;  %v970_v8 = vand.u32 2147483648, %v916_v51  ;;  %v968_v13 = vand.u32 2147483647, %v916_v51 }
 0x2d3   : > { %1328 = vmatmul.msk.f32.vlgmr.msra.gmra.mxu2 %vm684_vm1, %v640_v54  ;;  %vm950_vm12 = vweird.f32 %v913_v48  ;;  %vm964_vm13 = vweird.f32 %v916_v51  ;;  %v957_v16 = vor.u32 1.1754944e-38, %v956_v7  ;;  %vm955_vm2 = vcmp.eq.f32.partialorder %v954_v10, 8.507059e+37 }
 0x2d4   : > { %v934_v55 = vmul.f32 %v1416_v45, %v933_v52  ;;  %v971_v17 = vor.u32 1.1754944e-38, %v970_v8  ;;  %vm969_vm3 = vcmp.eq.f32.partialorder %v968_v13, 8.507059e+37  ;;  %1421 = vrcp.f32 %v1506_v40 }
 0x2d6   : > { %v935_v58 = vadd.f32 %v1416_v45, %v934_v55 }
 0x2d7   : > { %v1418_v59 = vpop.eup %1417 }
 0x2d8   : > { %v1420_v61 = vpop.eup %1419  ;;  %v939_v62 = vsel %vm938_vm8, %v1416_v45, %v935_v58  ;;  %v946_v63 = vmul.f32 %v1418_v59, %v913_v48  ;;  %vm951_vm10 = vweird.f32 %v1418_v59 }
 0x2d9   : > { %v944_v0 = vsel %vm941_vm9, %v943_v60, %v939_v62  ;;  %v960_v1 = vmul.f32 %v1420_v61, %v916_v51  ;;  %vm965_vm11 = vweird.f32 %v1420_v61  ;;  %vm952_vm14 = vmor %vm950_vm12, %vm951_vm10  ;;  %v1403_v62 = vld [vmem:[%s1838_s9] ss:$0 sm:$0xff] }
 0x2da   : > { %v947_v3 = vsub.f32 1.0, %v946_v63  ;;  %v974_v5 = vmul.f32 %v1732_v20, %v944_v0  ;;  %vm966_vm15 = vmor %vm964_vm13, %vm965_vm11  ;;  %v1422_v41 = vpop.eup %1421 }
 0x2db   : > { %v961_v6 = vsub.f32 1.0, %v960_v1  ;;  %v1149_v42 = vmul.f32 32.0, %v1422_v41  ;;  %v1404_v1 = vld [vmem:[%s1839_s10] ss:$0 sm:$0xff] }
 0x2dc   : > { %v948_v9 = vmul.f32 %v1418_v59, %v947_v3  ;;  %1329 = vmatpush.xpose.msk.msrb.mxu3 %vm684_vm1, %v974_v5 }
 0x2dd   : > { %v962_v12 = vmul.f32 %v1420_v61, %v961_v6  ;;  %v1150_v43 = vsub.f32 1.0, %v1149_v42 }
 0x2de   : > { %v949_v14 = vadd.f32 %v1418_v59, %v948_v9 }
 0x2df   : > { %v963_v15 = vadd.f32 %v1420_v61, %v962_v12  ;;  %1330 = vmatmul.msk.f32.vlgmr.msrb.gmra.mxu3 %vm684_vm1, %v643_v11  ;;  %v1151_v44 = vmul.f32 %v1422_v41, %v1150_v43 }
 0x2e0   : > { %v953_v18 = vsel %vm952_vm14, %v1418_v59, %v949_v14 }
 0x2e1   : > { %v967_v19 = vsel %vm966_vm15, %v1420_v61, %v963_v15  ;;  %v958_v20 = vsel %vm955_vm2, %v957_v16, %v953_v18  ;;  %v1152_v45 = vadd.f32 %v1422_v41, %v1151_v44 }
 0x2e2   : > { %v972_v21 = vsel %vm969_vm3, %v971_v17, %v967_v19  ;;  %v975_v22 = vmul.f32 %v1736_v24, %v958_v20  ;;  %v1084_v24 = vld [vmem:[%s1836_s7 + $0x18] sm:$0xff] }
 0x2e3   : > { %v581_v23 = vpop.permute.xlu0 %580  ;;  %v976_v26 = vmul.f32 %v1738_v25, %v972_v21  ;;  %v1082_v25 = vld [vmem:[%s1836_s7 + $0x8] sm:$0xff] }
 0x2e4   : > { %v649_v27 = vadd.f32 %v1722_v57, %v581_v23  ;;  %1331 = vmatpush.xpose.msk.msrb.mxu2 %vm684_vm1, %v975_v22  ;;  %v1083_v57 = vld [vmem:[%s1836_s7 + $0x10] sm:$0xff] }
 0x2e5   : > { %1333 = vmatpush.xpose.msk.msra.mxu3 %vm684_vm1, %v976_v26 }
 0x2e8   : > { %1334 = vmatmul.msk.f32.vlgmr.msra.gmra.mxu3 %vm684_vm1, %v649_v27  ;;  %1136 = vmatpush.msra.mxu2 %v1084_v24 }
 0x2e9   : > { %v576_v28 = vpop.permute.xlu1 %575 }
 0x2ea   : > { %v646_v29 = vadd.f32 %v1712_v49, %v576_v28  ;;  %1137 = vmatpush.msra.mxu2 %v1083_v57  ;;  %v1081_v49 = vld [vmem:[%s1836_s7] sm:$0xff] }
 0x2ec   : > { %1332 = vmatmul.msk.f32.vlgmr.msrb.gmra.mxu2 %vm684_vm1, %v646_v29  ;;  %vm1153_vm1 = vweird.f32 %v1422_v41 }
 0x2ed   : > { %1138 = vmatpush.msra.mxu2 %v1082_v25  ;;  %v1154_v46 = vsel %vm1153_vm1, %v1422_v41, %v1152_v45 }
 0x2ef   : > { %1139 = vmatpush.msra.mxu2 %v1081_v49 }
 0x356   : > { %v1000_v30 = vpop.f32.mrf.mxu2 }
 0x357   : > { %1089 = vxpose.xlu2.b32.start [1/4] (short) (narrow) %v1000_v30, 8 }
 0x362   : > { %v1026_v31 = vpop.f32.mrf.mxu3 }
 0x363   : > { %1090 = vxpose.xlu2.b32.cont [2/4] (short) (narrow) %v1026_v31, 8 }
 0x36b   : > { %v1078_v33 = vpop.f32.mrf.mxu3 }
 0x36f   : > { %v1052_v32 = vpop.f32.mrf.mxu2 }
 0x370   : > { %1091 = vxpose.xlu2.b32.cont [3/4] (short) (narrow) %v1052_v32, 8 }
 0x378   : > { %1092 = vxpose.xlu2.b32.end [4/4] (short) (narrow) %v1078_v33, 8 }
 0x3f9   : > { %v1105_v34 = vpop.trf.xlu2 }
 0x3fa   : > { %1335 = vmatmul.msk.f32.vlgmr.msra.gmra.mxu2 %vm482_vm0, %v1105_v34 }
 0x47d   : > { %v1141_v36 = vpop.f32.mrf.mxu2 }
 0x47e   : > { %v1142_v37 = vadd.f32 %v1402_v35, %v1141_v36 }
 0x480   : > { %v1144_v38 = vadd.f32 %v1142_v37, %v1639_v4 }
 0x482   : > { %v1145_v39 = vsel %vm482_vm0, %v1144_v38, 0.0 }
 0x483   : > { %1146 = vadd.xlane.f32.xlu1 %v1145_v39 }
 0x4f6   : > { %v1147_v47 = vpop.xlane.xlu1 %1146 }
 0x4f7   : > { %v1155_v48 = vmul.f32 %v1154_v46, %v1147_v47 }
 0x4f9   : > { %v1156_v50 = vsub.f32 %v1144_v38, %v1155_v48 }
 0x4fb   : > { %v1157_v51 = vmul.f32 %v1156_v50, %v1156_v50 }
 0x4fd   : > { %v1158_v4 = vsel %vm482_vm0, %v1157_v51, 0.0 }
 0x4fe   : > { %1159 = vadd.xlane.f32.xlu0 %v1158_v4 }
 0x571   : > { %v1160_v52 = vpop.xlane.xlu0 %1159 }
 0x572   : > { %v1161_v53 = vmul.f32 %v1160_v52, %v1154_v46 }
 0x574   : > { %v1162_v54 = vadd.f32 1e-05, %v1161_v53 }
 0x576   : > { %1423 = vrsqrt.f32 %v1162_v54  ;;  %vm1169_vm5 = vweird.f32 %v1162_v54 }
 0x57c   : > { %v1424_v55 = vpop.eup %1423 }
 0x57d   : > { %v1164_v56 = vmul.f32 %v1424_v55, %v1162_v54  ;;  %vm1170_vm4 = vweird.f32 %v1424_v55 }
 0x57e   : > { %vm1171_vm6 = vmor %vm1169_vm5, %vm1170_vm4 }
 0x57f   : > { %v1165_v58 = vmul.f32 %v1424_v55, %v1164_v56 }
 0x581   : > { %v1166_v59 = vmul.f32 0.5, %v1165_v58 }
 0x583   : > { %v1167_v60 = vsub.f32 1.5, %v1166_v59 }
 0x585   : > { %v1168_v61 = vmul.f32 %v1424_v55, %v1167_v60 }
 0x587   : > { %v1172_v63 = vsel %vm1171_vm6, %v1424_v55, %v1168_v61 }
 0x588   : > { %v1173_v0 = vmul.f32 %v1172_v63, %v1156_v50 }
 0x58a   : > { %v1178_v2 = vmul.f32 %v1403_v62, %v1173_v0 }
 0x58c   : > { %v1183_v3 = vadd.f32 %v1404_v1, %v1178_v2 }
 0x58e   : > { %1184 = vst.msk [vmem:[%s433_s24] sm:$0xff] %vm482_vm0, %v1183_v3 }
 0x58f   : > { %1452 = shalt.err (!%p1449_p5)
}
 0x590   : > { %1341 = dma.vmem_to_hbm [thread:$0]  (%p1607_p4), %s1200_s20, 128, %s1202_s0, %s1186_s13  }
 0x591 PF: > { %p1347_p6 = scmp.ge.s32.totalorder %s1503_s22, 2  ;;  %s1213_s26 = sand.u32 1, %s1483_s17  }
 0x592   : > { %s1214_s14 = scalar_lea.sflag [#allocation3], %s1213_s26 }
 0x593   : > { %p1344_p7 = pnand %p1347_p6, %p1614_p8 }
 0x595   : > { %p1345_p9 = pneg %p1344_p7 }
 0x597   : > { %1478 = dma.done.wait (%p1345_p9), %s1214_s14, 128  }
 0x598   : > { %1480 = vsyncadd (%p1345_p9), %s1214_s14, 4294967168  ;;  %s24_s22 = sadd.s32 1, %s1503_s22   ;;  %s1849_s20 = sld [smem:[#allocation5_spill]] }
 0x599   : > { %p21_p10 = scmp.ge.s32.totalorder %s24_s22, 4   ;;  %s1850_s21 = sld [smem:[#allocation6_spill]] }
 0x59a   : > { %s1851_s17 = smov %s1487_s18  ;;  %s1852_s18 = smov %s1491_s19 }
 0x59b   : > { %s1853_s19 = smov %s1620_s30  ;;  %23 = sbr.rel (!%p21_p10) target bundleno = 6 (0x6), region = 105 }
 0x5a0   :  { %1220 = vsyncpa [#allocation3], 1 }
 0x5a1   :  { %1222 = vsyncpa [#allocation3 + $0x1], 1 }

// kernel: tpu_custom_call.1
= control target key start
LH: loop header
LB: loop body
LE: loop exit
PB: predicated region body
PF: predicated region fallthrough
CT: control target
= control target key end

     0   :  { %s1829_s0 = inlined_call_operand.vmem [shape: f32[2,8,32], index: 0, kind: input, shape index: {}]   ;;  %s1830_s1 = inlined_call_operand.vmem [shape: f32[2,8,32], index: 1, kind: input, shape index: {}]   ;;  %s1831_s2 = inlined_call_operand.vmem [shape: f32[2,8,8], index: 2, kind: input, shape index: {}]   ;;  %s1832_s3 = inlined_call_operand.vmem [shape: f32[32,32], index: 3, kind: input, shape index: {}]   ;;  %s1833_s4 = inlined_call_operand.vmem [shape: f32[32,1], index: 4, kind: input, shape index: {}]   ;;  %s1834_s5 = inlined_call_operand.vmem [shape: f32[64,32], index: 5, kind: input, shape index: {}]   ;;  %s1835_s6 = inlined_call_operand.vmem [shape: f32[64,1], index: 6, kind: input, shape index: {}]   ;;  %s1836_s7 = inlined_call_operand.vmem [shape: f32[32,32], index: 7, kind: input, shape index: {}]   ;;  %s1837_s8 = inlined_call_operand.vmem [shape: f32[1,32], index: 8, kind: input, shape index: {}]   ;;  %s1838_s9 = inlined_call_operand.vmem [shape: f32[1,32], index: 9, kind: input, shape index: {}]   ;;  %s1839_s10 = inlined_call_operand.vmem [shape: f32[1,32], index: 10, kind: input, shape index: {}]   ;;  %s1840_s11 = inlined_call_operand.hbm [shape: f32[2,8,32], index: 11, kind: output, shape index: {}]  }
   0x1   :  { %1843 = sst [smem:[#allocation7_spill]] %s1829_s0 }
   0x2   :  { %16 = vsyncpa [#allocation3], 0 }
   0x3   :  { %18 = vsyncpa [#allocation3 + $0x1], 0  ;;  %s1567_s17 = smov 0   ;;  %s1569_s18 = smov 0  }
   0x4   :  { %s1571_s19 = smov 0   ;;  %s1573_s20 = smov 0  }
   0x5   :  { %s1575_s21 = smov 0   ;;  %s1577_s22 = smov 0  }
   0x6 LB: > { %1844 = sst [smem:[#allocation5_spill]] %s1499_s21  ;;  %s1300_s23 = sadd.s32 4294967295, %s1503_s22   ;;  %s1503_s22 = sphi %s1577_s22, %s24_s22   ;;  %s1499_s21 = sphi %s1575_s21, %s1850_s21   ;;  %s1495_s20 = sphi %s1573_s20, %s1849_s20   ;;  %s1491_s19 = sphi %s1571_s19, %s1853_s19   ;;  %s1487_s18 = sphi %s1569_s18, %s1852_s18   ;;  %s1483_s17 = sphi %s1567_s17, %s1851_s17  }
   0x7   : > { %s1301_s24 = sadd.s32 4294967294, %s1503_s22   ;;  %s36_s25 = sadd.s32 1, %s1499_s21 }
   0x8   : > { %s295_s26 = sadd.s32 1, %s1491_s19  ;;  %p38_p0 = scmp.ge.s32.totalorder %s36_s25, 2 }
   0x9   : > { %p305_p1 = scmp.ne.s32.totalorder %s1491_s19, %s1487_s18  ;;  %p306_p2 = scmp.eq.s32.totalorder %s1300_s23, 1 }
   0xa   : > { %p311_p3 = scmp.ne.s32.totalorder %s1487_s18, %s1483_s17  ;;  %s1855_s25 = smov (%p38_p0, %s36_s25), 0 }
   0xb   : > { %1845 = sst [smem:[#allocation6_spill]] %s1855_s25  ;;  %p1607_p4 = por %p306_p2, %p305_p1 }
   0xc   : > { %p312_p5 = scmp.eq.s32.totalorder %s1301_s24, 1  ;;  %s290_s28 = ssub.s32 %s1499_s21, %s1855_s25 }
   0xd   : > { %p1304_p6 = scmp.ge.s32.totalorder %s1503_s22, 1  ;;  %p293_p7 = scmp.eq.s32.totalorder %s290_s28, 0 }
   0xe   : > { %p1614_p8 = por %p312_p5, %p311_p3  ;;  %p381_p9 = scmp.lt.s32.totalorder %s1503_s22, 3 }
   0xf   : > { %s1620_s30 = scalar_select %p293_p7, %s1491_s19, %s295_s26  }
  0x10   : > { %p382_p10 = pnand %p1304_p6, %p381_p9 }
  0x11   : > { %p434_p11 = scmp.lt.s32.totalorder (!%p382_p10), %s1495_s20, 1  ;;  %s1848_s0 = sld [smem:[#allocation7_spill]] (!%p382_p10) }
  0x12   : > { %385 = sbr.rel (%p382_p10) target bundleno = 1425 (0x591), region = 64  ;;  %s431_s26 = sand.u32 (!%p382_p10), 1, %s1487_s18  }
  0x13   : > { %s1305_s28 = sshll.u32 (!%p382_p10), %s431_s26, 3  ;;  %s1337_s12 = sshll.u32 (!%p382_p10), %s1495_s20, 3 }
  0x17   : > { %v458_v0 = vld [vmem:[%s1833_s4] sm:$0xff]  ;;  %v1505_v1 = vmov 0   ;;  %s435_s14 = scalar_select %p434_p11, %s1495_s20, 1  ;;  %v460_v2 = vld [vmem:[%s1833_s4 + $0x10] sm:$0xff]  ;;  %vm482_vm0 = vcmask 261120   ;;  %v459_v7 = vld [vmem:[%s1833_s4 + $0x8] sm:$0xff] }
  0x18   : > { %1399 = vset.pattern.permute.xlu0 %v1505_v1  ;;  %1400 = vset.pattern.permute.xlu1 %v1505_v1  ;;  %v535_v3 = vld [vmem:[%s1835_s6] sm:$0xff]  ;;  %v461_v9 = vld [vmem:[%s1833_s4 + $0x18] sm:$0xff]  ;;  %v536_v10 = vld [vmem:[%s1835_s6 + $0x8] sm:$0xff]  ;;  %vm684_vm1 = vcmask 64512  }
  0x19   : > { %464 = vperm.xlu0 %1399, %v458_v0   ;;  %1401 = vset.pattern.permute.xlu2 %v1505_v1  ;;  %s1630_s23 = sshll.u32 %s435_s14, 3  ;;  %v454_v6 = vld [vmem:[%s1832_s3] sm:$0xff]  ;;  %v455_v11 = vld [vmem:[%s1832_s3 + $0x8] sm:$0xff]  ;;  %v537_v12 = vld [vmem:[%s1835_s6 + $0x10] sm:$0xff] }
  0x1a   : > { %474 = vperm.xlu1 %1400, %v460_v2   ;;  %s440_s13 = scalar_lea.vmem %s1848_s0, %s1630_s23  ;;  %545 = vperm.xlu2 %1401, %v535_v3   ;;  %s444_s25 = scalar_lea.vmem %s1830_s1, %s1630_s23  ;;  %v527_v8 = vld [vmem:[%s1834_s5] sm:$0xff]  ;;  %v528_v13 = vld [vmem:[%s1834_s5 + $0x8] sm:$0xff]  ;;  %v538_v14 = vld [vmem:[%s1835_s6 + $0x18] sm:$0xff] }
  0x1b   : > { %v1639_v4 = vld [vmem:[%s440_s13] sm:$0xff]  ;;  %v456_v15 = vld [vmem:[%s1832_s3 + $0x10] sm:$0xff]  ;;  %v457_v17 = vld [vmem:[%s1832_s3 + $0x18] sm:$0xff]  ;;  %s451_s24 = scalar_lea.vmem %s1831_s2, %s1630_s23  ;;  %s1186_s13 = scalar_lea.sflag [#allocation3], %s431_s26 }
  0x1c   : > { %1309 = vmatpush.xpose.msk.msra.mxu0 %vm482_vm0, %v1639_v4  ;;  %v453_v5 = vld [vmem:[%s444_s25] sm:$0xff]  ;;  %v529_v16 = vld [vmem:[%s1834_s5 + $0x10] sm:$0xff]  ;;  %v530_v18 = vld [vmem:[%s1834_s5 + $0x18] sm:$0xff]  ;;  %s1197_s25 = scalar_lea.hbm %s1840_s11, %s1337_s12 }
  0x1d   : > { %1314 = vmatpush.xpose.msk.msra.mxu1 %vm482_vm0, %v453_v5  ;;  %1340 = vmatpush.xpose.msk.msra.mxu3 %vm482_vm0, %v453_v5  ;;  %v533_v19 = vld [vmem:[%s1834_s5 + $0x30] sm:$0xff]  ;;  %v534_v44 = vld [vmem:[%s1834_s5 + $0x38] sm:$0xff]  ;;  %v651_v50 = vld [vmem:[%s451_s24] sm:$0xff]  ;;  %s433_s24 = scalar_lea.vmem [#allocation2], %s1305_s28  ;;  %s1201_s0 = sshll.u32 %s1197_s25, 4  ;;  %s1202_s0 = int_to_ptr.hbm [resolvable:$true] %s1201_s0 }
  0x1e   : > { %v531_v53 = vld [vmem:[%s1834_s5 + $0x20] sm:$0xff]  ;;  %v532_v56 = vld [vmem:[%s1834_s5 + $0x28] sm:$0xff]  ;;  %s1199_s20 = sshll.u32 %s433_s24, 4  ;;  %s1439_s23 = sshra.s32 %s1202_s0, 4  ;;  %s1200_s20 = int_to_ptr.vmem [resolvable:$true] %s1199_s20  ;;  %s1440_s23 = int_to_ptr.hbm [resolvable:$true] %s1439_s23 }
  0x1f   : > { %1310 = vmatmul.msk.f32.vlgmr.msra.gmra.mxu0 %vm482_vm0, %v454_v6  ;;  %s1441_s12 = scalar_lea.hbm %s1440_s23, 8  ;;  %s1445_s28 = scalar_lea.hbm %s1840_s11, 16 }
  0x20   : > { %1315 = vmatmul.msk.f32.vlgmr.msra.gmra.mxu1 %vm482_vm0, %v527_v8  ;;  %1321 = vmatmul.msk.f32.vlgmr.msra.gmra.mxu3 %vm482_vm0, %v533_v19  ;;  %p1442_p12 = scmp.ne.s32.totalorder %s1440_s23, %s1441_s12  ;;  %p1446_p1 = scmp.lt.s32.totalorder %s1440_s23, %s1840_s11 }
  0x21   : > { %469 = vperm.xlu0 %1399, %v459_v7   ;;  %v540_v7 = vld [vmem:[%s1835_s6 + $0x28] sm:$0xff]  ;;  %p1447_p2 = scmp.lt.s32.totalorder %s1445_s28, %s1441_s12 }
  0x22   : > { %479 = vperm.xlu1 %1400, %v461_v9   ;;  %550 = vperm.xlu2 %1401, %v536_v10   ;;  %p1443_p13 = pnand %p1442_p12, %p1607_p4 }
  0x23   : > { %p1448_p3 = por %p1447_p2, %p1446_p1 }
  0x24   : > { %p1444_p0 = pneg %p1443_p13 }
  0x26   : > { %p1449_p5 = pnand %p1448_p3, %p1444_p0 }
  0x27   : > { %1311 = vmatmul.msk.f32.gmra.mxu0 %vm482_vm0, %v455_v11 }
  0x28   : > { %1316 = vmatmul.msk.f32.gmra.mxu1 %vm482_vm0, %v528_v13  ;;  %1322 = vmatmul.msk.f32.gmra.mxu3 %vm482_vm0, %v534_v44 }
  0x29   : > { %555 = vperm.xlu0 %1399, %v537_v12  }
  0x2a   : > { %560 = vperm.xlu1 %1400, %v538_v14  }
  0x2f   : > { %1312 = vmatmul.msk.f32.gmra.mxu0 %vm482_vm0, %v456_v15 }
  0x30   : > { %1317 = vmatmul.msk.f32.gmra.mxu1 %vm482_vm0, %v529_v16 }
  0x37   : > { %1313 = vmatmul.msk.f32.gmra.mxu0 %vm482_vm0, %v457_v17 }
  0x38   : > { %1318 = vmatmul.msk.f32.gmra.mxu1 %vm482_vm0, %v530_v18 }
  0x40   : > { %1319 = vmatmul.msk.f32.gmra.mxu1 %vm482_vm0, %v531_v53 }
  0x48   : > { %1320 = vmatmul.msk.f32.gmra.mxu1 %vm482_vm0, %v532_v56 }
  0x74   : > { %v546_v21 = vpop.permute.xlu2 %545 }
  0x7c   : > { %v551_v28 = vpop.permute.xlu2 %550 }
  0x8b   : > { %v465_v20 = vpop.permute.xlu0 %464 }
  0x8c   : > { %v475_v26 = vpop.permute.xlu1 %474 }
  0x93   : > { %v470_v27 = vpop.permute.xlu0 %469 }
  0x94   : > { %v480_v33 = vpop.permute.xlu1 %479 }
  0x9b   : > { %v556_v35 = vpop.permute.xlu0 %555 }
  0x9c   : > { %v515_v22 = vpop.f32.mrf.mxu0  ;;  %v561_v40 = vpop.permute.xlu1 %560 }
  0x9d   : > { %v516_v23 = vadd.f32 %v515_v22, %v465_v20  ;;  %v627_v24 = vpop.f32.mrf.mxu1 }
  0x9e   : > { %v628_v25 = vadd.f32 %v627_v24, %v546_v21 }
  0x9f   : > { %652 = vxpose.xlu2.b32.start.end [1/1] (short) (narrow) %v516_v23, 8 }
  0xa0   : > { %703 = vmatpush.msra.mxu2 %v628_v25 }
  0xa3   : > { %v1712_v49 = vpop.f32.mrf.mxu3 }
  0xa4   : > { %v518_v29 = vpop.f32.mrf.mxu0 }
  0xa5   : > { %v519_v30 = vadd.f32 %v518_v29, %v470_v27  ;;  %v630_v31 = vpop.f32.mrf.mxu1  ;;  %v542_v29 = vld [vmem:[%s1835_s6 + $0x38] sm:$0xff] }
  0xa6   : > { %v631_v32 = vadd.f32 %v630_v31, %v551_v28  ;;  %v539_v28 = vld [vmem:[%s1835_s6 + $0x20] sm:$0xff] }
  0xa7   : > { %708 = vxpose.xlu0.b32.start.end [1/1] (short) (narrow) %v519_v30, 8  ;;  %v541_v30 = vld [vmem:[%s1835_s6 + $0x30] sm:$0xff] }
  0xa8   : > { %758 = vmatpush.msrb.mxu3 %v631_v32 }
  0xab   : > { %v1722_v57 = vpop.f32.mrf.mxu3 }
  0xac   : > { %v521_v34 = vpop.f32.mrf.mxu0 }
  0xad   : > { %v522_v36 = vadd.f32 %v521_v34, %v475_v26  ;;  %v633_v37 = vpop.f32.mrf.mxu1 }
  0xae   : > { %v634_v38 = vadd.f32 %v633_v37, %v556_v35 }
  0xaf   : > { %763 = vxpose.xlu1.b32.start.end [1/1] (short) (narrow) %v522_v36, 8 }
  0xb0   : > { %813 = vmatpush.msrb.mxu2 %v634_v38 }
  0xb4   : > { %v524_v39 = vpop.f32.mrf.mxu0 }
  0xb5   : > { %v525_v41 = vadd.f32 %v524_v39, %v480_v33  ;;  %v636_v42 = vpop.f32.mrf.mxu1 }
  0xb6   : > { %v637_v43 = vadd.f32 %v636_v42, %v561_v40 }
  0xb7   : > { %818 = vxpose.xlu2.b32.start.end [1/1] (short) (narrow) %v525_v41, 8 }
  0xb8   : > { %868 = vmatpush.msra.mxu3 %v637_v43 }
 0x138   : > { %v668_v45 = vpop.trf.xlu2 }
 0x139   : > { %1323 = vmatmul.msk.f32.vlgmr.msra.gmra.mxu2 %vm684_vm1, %v668_v45 }
 0x14b   : > { %v724_v46 = vpop.trf.xlu0 }
 0x14c   : > { %1324 = vmatmul.msk.f32.vlgmr.msrb.gmra.mxu3 %vm684_vm1, %v724_v46  ;;  %v639_v46 = vpop.f32.mrf.mxu1 }
 0x150   : > { %v834_v47 = vpop.trf.xlu2 }
 0x153   : > { %v779_v48 = vpop.trf.xlu1 }
 0x154   : > { %1325 = vmatmul.msk.f32.vlgmr.msrb.gmra.mxu2 %vm684_vm1, %v779_v48  ;;  %1326 = vmatmul.msk.f32.vlgmr.msra.gmra.mxu3 %vm684_vm1, %v834_v47 }
 0x1bc   : > { %v705_v51 = vpop.f32.mrf.mxu2 }
 0x1bd   : > { %v873_v52 = vmul.f32 0.35355338, %v705_v51 }
 0x1bf   : > { %v877_v54 = vadd.f32 %v873_v52, %v651_v50 }
 0x1c1   : > { %v881_v55 = vsel %vm684_vm1, %v877_v54, -inf }
 0x1c2   : > { %882 = vmax.xlane.f32.xlu0 %v881_v55 }
 0x1cf   : > { %v760_v58 = vpop.f32.mrf.mxu3 }
 0x1d0   : > { %v874_v59 = vmul.f32 0.35355338, %v760_v58 }
 0x1d2   : > { %v878_v60 = vadd.f32 %v874_v59, %v651_v50 }
 0x1d4   : > { %v884_v61 = vsel %vm684_vm1, %v878_v60, -inf }
 0x1d5   : > { %885 = vmax.xlane.f32.xlu2 %v884_v61 }
 0x1d7   : > { %v815_v62 = vpop.f32.mrf.mxu2  ;;  %v870_v63 = vpop.f32.mrf.mxu3 }
 0x1d8   : > { %v875_v0 = vmul.f32 0.35355338, %v815_v62  ;;  %v876_v1 = vmul.f32 0.35355338, %v870_v63 }
 0x1da   : > { %v879_v2 = vadd.f32 %v875_v0, %v651_v50  ;;  %v880_v3 = vadd.f32 %v876_v1, %v651_v50 }
 0x1dc   : > { %v887_v5 = vsel %vm684_vm1, %v879_v2, -inf  ;;  %v890_v6 = vsel %vm684_vm1, %v880_v3, -inf }
 0x1dd   : > { %888 = vmax.xlane.f32.xlu1 %v887_v5  ;;  %891 = vmax.xlane.f32.xlu0 %v890_v6 }
 0x1f1   : > { %570 = vperm.xlu0 %1399, %v540_v7  }
 0x235   : > { %v883_v8 = vpop.xlane.xlu0 %882 }
 0x236   : > { %v893_v9 = vsub.f32 %v877_v54, %v883_v8 }
 0x238   : > { %v897_v10 = vmul.f32 1.442695, %v893_v9 }
 0x23a   : > { %1405 = vpow2.f32 %v897_v10 }
 0x240   : > { %v1406_v11 = vpop.eup %1405 }
 0x241   : > { %v905_v12 = vsel %vm684_vm1, %v1406_v11, 0.0 }
 0x242   : > { %906 = vadd.xlane.f32.xlu1 %v905_v12 }
 0x248   : > { %v886_v13 = vpop.xlane.xlu2 %885 }
 0x249   : > { %v894_v14 = vsub.f32 %v878_v60, %v886_v13 }
 0x24b   : > { %v899_v15 = vmul.f32 1.442695, %v894_v14 }
 0x24d   : > { %1407 = vpow2.f32 %v899_v15 }
 0x250   : > { %v889_v16 = vpop.xlane.xlu1 %888  ;;  %v892_v17 = vpop.xlane.xlu0 %891 }
 0x251   : > { %v895_v18 = vsub.f32 %v879_v2, %v889_v16  ;;  %v896_v19 = vsub.f32 %v880_v3, %v892_v17  ;;  %v642_v2 = vpop.f32.mrf.mxu1 }
 0x253   : > { %v1732_v20 = vpop.eup %1407  ;;  %v901_v21 = vmul.f32 1.442695, %v895_v18  ;;  %v903_v22 = vmul.f32 1.442695, %v896_v19 }
 0x254   : > { %v908_v23 = vsel %vm684_vm1, %v1732_v20, 0.0 }
 0x255   : > { %1409 = vpow2.f32 %v901_v21  ;;  %909 = vadd.xlane.f32.xlu2 %v908_v23 }
 0x256   : > { %1411 = vpow2.f32 %v903_v22 }
 0x25b   : > { %v1736_v24 = vpop.eup %1409 }
 0x25c   : > { %v1738_v25 = vpop.eup %1411  ;;  %v911_v26 = vsel %vm684_vm1, %v1736_v24, 0.0 }
 0x25d   : > { %912 = vadd.xlane.f32.xlu0 %v911_v26  ;;  %v914_v27 = vsel %vm684_vm1, %v1738_v25, 0.0 }
 0x25e   : > { %915 = vadd.xlane.f32.xlu1 %v914_v27 }
 0x263   : > { %v571_v43 = vpop.permute.xlu0 %570 }
 0x26d   : > { %565 = vperm.xlu2 %1401, %v539_v28  }
 0x271   : > { %580 = vperm.xlu0 %1399, %v542_v29  }
 0x277   : > { %575 = vperm.xlu1 %1400, %v541_v30  }
 0x2b5   : > { %v907_v31 = vpop.xlane.xlu1 %906 }
 0x2b6   : > { %1413 = vrcp.f32 %v907_v31  ;;  %v928_v35 = vand.u32 2147483648, %v907_v31  ;;  %v926_v37 = vand.u32 2147483647, %v907_v31  ;;  %vm922_vm3 = vweird.f32 %v907_v31 }
 0x2b8   : > { %v929_v39 = vor.u32 1.1754944e-38, %v928_v35  ;;  %vm927_vm5 = vcmp.eq.f32.partialorder %v926_v37, 8.507059e+37  ;;  %v1402_v35 = vld [vmem:[%s1837_s8] ss:$0 sm:$0xff] }
 0x2bc   : > { %v1414_v32 = vpop.eup %1413 }
 0x2bd   : > { %v918_v33 = vmul.f32 %v1414_v32, %v907_v31  ;;  %vm923_vm2 = vweird.f32 %v1414_v32 }
 0x2be   : > { %vm924_vm4 = vmor %vm922_vm3, %vm923_vm2 }
 0x2bf   : > { %v919_v34 = vsub.f32 1.0, %v918_v33 }
 0x2c1   : > { %v920_v36 = vmul.f32 %v1414_v32, %v919_v34 }
 0x2c3   : > { %v921_v38 = vadd.f32 %v1414_v32, %v920_v36 }
 0x2c5   : > { %v925_v40 = vsel %vm924_vm4, %v1414_v32, %v921_v38 }
 0x2c6   : > { %v930_v41 = vsel %vm927_vm5, %v929_v39, %v925_v40  ;;  %v1506_v40 = vmov 32.0  }
 0x2c7   : > { %v973_v42 = vmul.f32 %v1406_v11, %v930_v41  ;;  %v643_v11 = vadd.f32 %v642_v2, %v571_v43 }
 0x2c8   : > { %v910_v44 = vpop.xlane.xlu2 %909 }
 0x2c9   : > { %1415 = vrcp.f32 %v910_v44  ;;  %1327 = vmatpush.xpose.msk.msra.mxu2 %vm684_vm1, %v973_v42  ;;  %v942_v53 = vand.u32 2147483648, %v910_v44  ;;  %v940_v56 = vand.u32 2147483647, %v910_v44  ;;  %vm936_vm7 = vweird.f32 %v910_v44 }
 0x2cb   : > { %v943_v60 = vor.u32 1.1754944e-38, %v942_v53  ;;  %vm941_vm9 = vcmp.eq.f32.partialorder %v940_v56, 8.507059e+37 }
 0x2cf   : > { %v1416_v45 = vpop.eup %1415 }
 0x2d0   : > { %v932_v47 = vmul.f32 %v1416_v45, %v910_v44  ;;  %v913_v48 = vpop.xlane.xlu0 %912  ;;  %v566_v50 = vpop.permute.xlu2 %565  ;;  %vm937_vm6 = vweird.f32 %v1416_v45 }
 0x2d1   : > { %v916_v51 = vpop.xlane.xlu1 %915  ;;  %1417 = vrcp.f32 %v913_v48  ;;  %v640_v54 = vadd.f32 %v639_v46, %v566_v50  ;;  %vm938_vm8 = vmor %vm936_vm7, %vm937_vm6  ;;  %v956_v7 = vand.u32 2147483648, %v913_v48  ;;  %v954_v10 = vand.u32 2147483647, %v913_v48 }
 0x2d2   : > { %v933_v52 = vsub.f32 1.0, %v932_v47  ;;  %1419 = vrcp.f32 %v916_v51  ;;  %v970_v8 = vand.u32 2147483648, %v916_v51  ;;  %v968_v13 = vand.u32 2147483647, %v916_v51 }
 0x2d3   : > { %1328 = vmatmul.msk.f32.vlgmr.msra.gmra.mxu2 %vm684_vm1, %v640_v54  ;;  %vm950_vm12 = vweird.f32 %v913_v48  ;;  %vm964_vm13 = vweird.f32 %v916_v51  ;;  %v957_v16 = vor.u32 1.1754944e-38, %v956_v7  ;;  %vm955_vm2 = vcmp.eq.f32.partialorder %v954_v10, 8.507059e+37 }
 0x2d4   : > { %v934_v55 = vmul.f32 %v1416_v45, %v933_v52  ;;  %v971_v17 = vor.u32 1.1754944e-38, %v970_v8  ;;  %vm969_vm3 = vcmp.eq.f32.partialorder %v968_v13, 8.507059e+37  ;;  %1421 = vrcp.f32 %v1506_v40 }
 0x2d6   : > { %v935_v58 = vadd.f32 %v1416_v45, %v934_v55 }
 0x2d7   : > { %v1418_v59 = vpop.eup %1417 }
 0x2d8   : > { %v1420_v61 = vpop.eup %1419  ;;  %v939_v62 = vsel %vm938_vm8, %v1416_v45, %v935_v58  ;;  %v946_v63 = vmul.f32 %v1418_v59, %v913_v48  ;;  %vm951_vm10 = vweird.f32 %v1418_v59 }
 0x2d9   : > { %v944_v0 = vsel %vm941_vm9, %v943_v60, %v939_v62  ;;  %v960_v1 = vmul.f32 %v1420_v61, %v916_v51  ;;  %vm965_vm11 = vweird.f32 %v1420_v61  ;;  %vm952_vm14 = vmor %vm950_vm12, %vm951_vm10  ;;  %v1403_v62 = vld [vmem:[%s1838_s9] ss:$0 sm:$0xff] }
 0x2da   : > { %v947_v3 = vsub.f32 1.0, %v946_v63  ;;  %v974_v5 = vmul.f32 %v1732_v20, %v944_v0  ;;  %vm966_vm15 = vmor %vm964_vm13, %vm965_vm11  ;;  %v1422_v41 = vpop.eup %1421 }
 0x2db   : > { %v961_v6 = vsub.f32 1.0, %v960_v1  ;;  %v1149_v42 = vmul.f32 32.0, %v1422_v41  ;;  %v1404_v1 = vld [vmem:[%s1839_s10] ss:$0 sm:$0xff] }
 0x2dc   : > { %v948_v9 = vmul.f32 %v1418_v59, %v947_v3  ;;  %1329 = vmatpush.xpose.msk.msrb.mxu3 %vm684_vm1, %v974_v5 }
 0x2dd   : > { %v962_v12 = vmul.f32 %v1420_v61, %v961_v6  ;;  %v1150_v43 = vsub.f32 1.0, %v1149_v42 }
 0x2de   : > { %v949_v14 = vadd.f32 %v1418_v59, %v948_v9 }
 0x2df   : > { %v963_v15 = vadd.f32 %v1420_v61, %v962_v12  ;;  %1330 = vmatmul.msk.f32.vlgmr.msrb.gmra.mxu3 %vm684_vm1, %v643_v11  ;;  %v1151_v44 = vmul.f32 %v1422_v41, %v1150_v43 }
 0x2e0   : > { %v953_v18 = vsel %vm952_vm14, %v1418_v59, %v949_v14 }
 0x2e1   : > { %v967_v19 = vsel %vm966_vm15, %v1420_v61, %v963_v15  ;;  %v958_v20 = vsel %vm955_vm2, %v957_v16, %v953_v18  ;;  %v1152_v45 = vadd.f32 %v1422_v41, %v1151_v44 }
 0x2e2   : > { %v972_v21 = vsel %vm969_vm3, %v971_v17, %v967_v19  ;;  %v975_v22 = vmul.f32 %v1736_v24, %v958_v20  ;;  %v1084_v24 = vld [vmem:[%s1836_s7 + $0x18] sm:$0xff] }
 0x2e3   : > { %v581_v23 = vpop.permute.xlu0 %580  ;;  %v976_v26 = vmul.f32 %v1738_v25, %v972_v21  ;;  %v1082_v25 = vld [vmem:[%s1836_s7 + $0x8] sm:$0xff] }
 0x2e4   : > { %v649_v27 = vadd.f32 %v1722_v57, %v581_v23  ;;  %1331 = vmatpush.xpose.msk.msrb.mxu2 %vm684_vm1, %v975_v22  ;;  %v1083_v57 = vld [vmem:[%s1836_s7 + $0x10] sm:$0xff] }
 0x2e5   : > { %1333 = vmatpush.xpose.msk.msra.mxu3 %vm684_vm1, %v976_v26 }
 0x2e8   : > { %1334 = vmatmul.msk.f32.vlgmr.msra.gmra.mxu3 %vm684_vm1, %v649_v27  ;;  %1136 = vmatpush.msra.mxu2 %v1084_v24 }
 0x2e9   : > { %v576_v28 = vpop.permute.xlu1 %575 }
 0x2ea   : > { %v646_v29 = vadd.f32 %v1712_v49, %v576_v28  ;;  %1137 = vmatpush.msra.mxu2 %v1083_v57  ;;  %v1081_v49 = vld [vmem:[%s1836_s7] sm:$0xff] }
 0x2ec   : > { %1332 = vmatmul.msk.f32.vlgmr.msrb.gmra.mxu2 %vm684_vm1, %v646_v29  ;;  %vm1153_vm1 = vweird.f32 %v1422_v41 }
 0x2ed   : > { %1138 = vmatpush.msra.mxu2 %v1082_v25  ;;  %v1154_v46 = vsel %vm1153_vm1, %v1422_v41, %v1152_v45 }
 0x2ef   : > { %1139 = vmatpush.msra.mxu2 %v1081_v49 }
 0x356   : > { %v1000_v30 = vpop.f32.mrf.mxu2 }
 0x357   : > { %1089 = vxpose.xlu2.b32.start [1/4] (short) (narrow) %v1000_v30, 8 }
 0x362   : > { %v1026_v31 = vpop.f32.mrf.mxu3 }
 0x363   : > { %1090 = vxpose.xlu2.b32.cont [2/4] (short) (narrow) %v1026_v31, 8 }
 0x36b   : > { %v1078_v33 = vpop.f32.mrf.mxu3 }
 0x36f   : > { %v1052_v32 = vpop.f32.mrf.mxu2 }
 0x370   : > { %1091 = vxpose.xlu2.b32.cont [3/4] (short) (narrow) %v1052_v32, 8 }
 0x378   : > { %1092 = vxpose.xlu2.b32.end [4/4] (short) (narrow) %v1078_v33, 8 }
 0x3f9   : > { %v1105_v34 = vpop.trf.xlu2 }
 0x3fa   : > { %1335 = vmatmul.msk.f32.vlgmr.msra.gmra.mxu2 %vm482_vm0, %v1105_v34 }
 0x47d   : > { %v1141_v36 = vpop.f32.mrf.mxu2 }
 0x47e   : > { %v1142_v37 = vadd.f32 %v1402_v35, %v1141_v36 }
 0x480   : > { %v1144_v38 = vadd.f32 %v1142_v37, %v1639_v4 }
 0x482   : > { %v1145_v39 = vsel %vm482_vm0, %v1144_v38, 0.0 }
 0x483   : > { %1146 = vadd.xlane.f32.xlu1 %v1145_v39 }
 0x4f6   : > { %v1147_v47 = vpop.xlane.xlu1 %1146 }
 0x4f7   : > { %v1155_v48 = vmul.f32 %v1154_v46, %v1147_v47 }
 0x4f9   : > { %v1156_v50 = vsub.f32 %v1144_v38, %v1155_v48 }
 0x4fb   : > { %v1157_v51 = vmul.f32 %v1156_v50, %v1156_v50 }
 0x4fd   : > { %v1158_v4 = vsel %vm482_vm0, %v1157_v51, 0.0 }
 0x4fe   : > { %1159 = vadd.xlane.f32.xlu0 %v1158_v4 }
 0x571   : > { %v1160_v52 = vpop.xlane.xlu0 %1159 }
 0x572   : > { %v1161_v53 = vmul.f32 %v1160_v52, %v1154_v46 }
 0x574   : > { %v1162_v54 = vadd.f32 1e-05, %v1161_v53 }
 0x576   : > { %1423 = vrsqrt.f32 %v1162_v54  ;;  %vm1169_vm5 = vweird.f32 %v1162_v54 }
 0x57c   : > { %v1424_v55 = vpop.eup %1423 }
 0x57d   : > { %v1164_v56 = vmul.f32 %v1424_v55, %v1162_v54  ;;  %vm1170_vm4 = vweird.f32 %v1424_v55 }
 0x57e   : > { %vm1171_vm6 = vmor %vm1169_vm5, %vm1170_vm4 }
 0x57f   : > { %v1165_v58 = vmul.f32 %v1424_v55, %v1164_v56 }
 0x581   : > { %v1166_v59 = vmul.f32 0.5, %v1165_v58 }
 0x583   : > { %v1167_v60 = vsub.f32 1.5, %v1166_v59 }
 0x585   : > { %v1168_v61 = vmul.f32 %v1424_v55, %v1167_v60 }
 0x587   : > { %v1172_v63 = vsel %vm1171_vm6, %v1424_v55, %v1168_v61 }
 0x588   : > { %v1173_v0 = vmul.f32 %v1172_v63, %v1156_v50 }
 0x58a   : > { %v1178_v2 = vmul.f32 %v1403_v62, %v1173_v0 }
 0x58c   : > { %v1183_v3 = vadd.f32 %v1404_v1, %v1178_v2 }
 0x58e   : > { %1184 = vst.msk [vmem:[%s433_s24] sm:$0xff] %vm482_vm0, %v1183_v3 }
 0x58f   : > { %1452 = shalt.err (!%p1449_p5)
}
 0x590   : > { %1341 = dma.vmem_to_hbm [thread:$0]  (%p1607_p4), %s1200_s20, 128, %s1202_s0, %s1186_s13  }
 0x591 PF: > { %p1347_p6 = scmp.ge.s32.totalorder %s1503_s22, 2  ;;  %s1213_s26 = sand.u32 1, %s1483_s17  }
 0x592   : > { %s1214_s14 = scalar_lea.sflag [#allocation3], %s1213_s26 }
 0x593   : > { %p1344_p7 = pnand %p1347_p6, %p1614_p8 }
 0x595   : > { %p1345_p9 = pneg %p1344_p7 }
 0x597   : > { %1478 = dma.done.wait (%p1345_p9), %s1214_s14, 128  }
 0x598   : > { %1480 = vsyncadd (%p1345_p9), %s1214_s14, 4294967168  ;;  %s24_s22 = sadd.s32 1, %s1503_s22   ;;  %s1849_s20 = sld [smem:[#allocation5_spill]] }
 0x599   : > { %p21_p10 = scmp.ge.s32.totalorder %s24_s22, 4   ;;  %s1850_s21 = sld [smem:[#allocation6_spill]] }
 0x59a   : > { %s1851_s17 = smov %s1487_s18  ;;  %s1852_s18 = smov %s1491_s19 }
 0x59b   : > { %s1853_s19 = smov %s1620_s30  ;;  %23 = sbr.rel (!%p21_p10) target bundleno = 6 (0x6), region = 105 }
 0x5a0   :  { %1220 = vsyncpa [#allocation3], 1 }
 0x5a1   :  { %1222 = vsyncpa [#allocation3 + $0x1], 1 }

// kernel: tpu_custom_call.1
= control target key start
LH: loop header
LB: loop body
LE: loop exit
PB: predicated region body
PF: predicated region fallthrough
CT: control target
= control target key end

     0   :  { %s1825_s0 = inlined_call_operand.vmem [shape: f32[2,8,32], index: 0, kind: input, shape index: {}]   ;;  %s1826_s1 = inlined_call_operand.vmem [shape: f32[2,8,32], index: 1, kind: input, shape index: {}]   ;;  %s1827_s2 = inlined_call_operand.vmem [shape: f32[2,8,8], index: 2, kind: input, shape index: {}]   ;;  %s1828_s3 = inlined_call_operand.vmem [shape: f32[32,32], index: 3, kind: input, shape index: {}]   ;;  %s1829_s4 = inlined_call_operand.vmem [shape: f32[32,1], index: 4, kind: input, shape index: {}]   ;;  %s1830_s5 = inlined_call_operand.vmem [shape: f32[64,32], index: 5, kind: input, shape index: {}]   ;;  %s1831_s6 = inlined_call_operand.vmem [shape: f32[64,1], index: 6, kind: input, shape index: {}]   ;;  %s1832_s7 = inlined_call_operand.vmem [shape: f32[32,32], index: 7, kind: input, shape index: {}]   ;;  %s1833_s8 = inlined_call_operand.vmem [shape: f32[1,32], index: 8, kind: input, shape index: {}]   ;;  %s1834_s9 = inlined_call_operand.vmem [shape: f32[1,32], index: 9, kind: input, shape index: {}]   ;;  %s1835_s10 = inlined_call_operand.vmem [shape: f32[1,32], index: 10, kind: input, shape index: {}]   ;;  %s1836_s11 = inlined_call_operand.hbm [shape: f32[2,8,32], index: 11, kind: output, shape index: {}]  }
   0x1   :  { %1839 = sst [smem:[#allocation7_spill]] %s1825_s0 }
   0x2   :  { %16 = vsyncpa [#allocation3], 0 }
   0x3   :  { %18 = vsyncpa [#allocation3 + $0x1], 0  ;;  %s1568_s17 = smov 0   ;;  %s1570_s18 = smov 0  }
   0x4   :  { %s1572_s19 = smov 0   ;;  %s1574_s20 = smov 0  }
   0x5   :  { %s1576_s21 = smov 0   ;;  %s1578_s22 = smov 0  }
   0x6 LB: > { %1840 = sst [smem:[#allocation5_spill]] %s1500_s21  ;;  %s1300_s23 = sadd.s32 4294967295, %s1504_s22   ;;  %s1504_s22 = sphi %s1578_s22, %s24_s22   ;;  %s1500_s21 = sphi %s1576_s21, %s1846_s21   ;;  %s1496_s20 = sphi %s1574_s20, %s1845_s20   ;;  %s1492_s19 = sphi %s1572_s19, %s1849_s19   ;;  %s1488_s18 = sphi %s1570_s18, %s1848_s18   ;;  %s1484_s17 = sphi %s1568_s17, %s1847_s17  }
   0x7   : > { %s1301_s24 = sadd.s32 4294967294, %s1504_s22   ;;  %s36_s25 = sadd.s32 1, %s1500_s21 }
   0x8   : > { %s295_s26 = sadd.s32 1, %s1492_s19  ;;  %p38_p0 = scmp.ge.s32.totalorder %s36_s25, 2 }
   0x9   : > { %p305_p1 = scmp.ne.s32.totalorder %s1492_s19, %s1488_s18  ;;  %p306_p2 = scmp.eq.s32.totalorder %s1300_s23, 1 }
   0xa   : > { %p311_p3 = scmp.ne.s32.totalorder %s1488_s18, %s1484_s17  ;;  %s1851_s25 = smov (%p38_p0, %s36_s25), 0 }
   0xb   : > { %1841 = sst [smem:[#allocation6_spill]] %s1851_s25  ;;  %p1608_p4 = por %p306_p2, %p305_p1 }
   0xc   : > { %p312_p5 = scmp.eq.s32.totalorder %s1301_s24, 1  ;;  %s290_s28 = ssub.s32 %s1500_s21, %s1851_s25 }
   0xd   : > { %p1304_p6 = scmp.ge.s32.totalorder %s1504_s22, 1  ;;  %p293_p7 = scmp.eq.s32.totalorder %s290_s28, 0 }
   0xe   : > { %p1615_p8 = por %p312_p5, %p311_p3  ;;  %p381_p9 = scmp.lt.s32.totalorder %s1504_s22, 3 }
   0xf   : > { %s1621_s30 = scalar_select %p293_p7, %s1492_s19, %s295_s26  }
  0x10   : > { %p382_p10 = pnand %p1304_p6, %p381_p9 }
  0x11   : > { %p434_p11 = scmp.lt.s32.totalorder (!%p382_p10), %s1496_s20, 1  ;;  %s1844_s0 = sld [smem:[#allocation7_spill]] (!%p382_p10) }
  0x12   : > { %385 = sbr.rel (%p382_p10) target bundleno = 1438 (0x59e), region = 64  ;;  %s431_s24 = sand.u32 (!%p382_p10), 1, %s1488_s18  }
  0x13   : > { %s1305_s26 = sshll.u32 (!%p382_p10), %s431_s24, 3  ;;  %s1186_s12 = scalar_lea.sflag (!%p382_p10), [#allocation3], %s431_s24 }
  0x17   : > { %v458_v0 = vld [vmem:[%s1829_s4] sm:$0xff]  ;;  %v1506_v1 = vmov 0   ;;  %s435_s16 = scalar_select %p434_p11, %s1496_s20, 1  ;;  %vm482_vm0 = vcmask 261120   ;;  %v459_v6 = vld [vmem:[%s1829_s4 + $0x8] sm:$0xff]  ;;  %v460_v8 = vld [vmem:[%s1829_s4 + $0x10] sm:$0xff] }
  0x18   : > { %1400 = vset.pattern.permute.xlu0 %v1506_v1  ;;  %1401 = vset.pattern.permute.xlu1 %v1506_v1  ;;  %v535_v2 = vld [vmem:[%s1831_s6] sm:$0xff]  ;;  %v528_v7 = vld [vmem:[%s1830_s5 + $0x8] sm:$0xff]  ;;  %v537_v11 = vld [vmem:[%s1831_s6 + $0x10] sm:$0xff]  ;;  %vm684_vm1 = vcmask 64512  }
  0x19   : > { %464 = vperm.xlu0 %1400, %v458_v0   ;;  %545 = vperm.xlu1 %1401, %v535_v2   ;;  %s1631_s23 = sshll.u32 %s435_s16, 3  ;;  %v454_v5 = vld [vmem:[%s1828_s3] sm:$0xff]  ;;  %v536_v9 = vld [vmem:[%s1831_s6 + $0x8] sm:$0xff]  ;;  %v529_v12 = vld [vmem:[%s1830_s5 + $0x10] sm:$0xff]  ;;  %s433_s16 = scalar_lea.vmem [#allocation2], %s1305_s26 }
  0x1a   : > { %1402 = vset.pattern.permute.xlu2 %v1506_v1  ;;  %s440_s28 = scalar_lea.vmem %s1844_s0, %s1631_s23  ;;  %s444_s14 = scalar_lea.vmem %s1826_s1, %s1631_s23  ;;  %v455_v10 = vld [vmem:[%s1828_s3 + $0x8] sm:$0xff]  ;;  %v538_v13 = vld [vmem:[%s1831_s6 + $0x18] sm:$0xff]  ;;  %v456_v15 = vld [vmem:[%s1828_s3 + $0x10] sm:$0xff] }
  0x1b   : > { %v1637_v3 = vld [vmem:[%s440_s28] sm:$0xff]  ;;  %550 = vperm.xlu2 %1402, %v536_v9   ;;  %v461_v14 = vld [vmem:[%s1829_s4 + $0x18] sm:$0xff]  ;;  %s451_s25 = scalar_lea.vmem %s1827_s2, %s1631_s23  ;;  %v533_v9 = vld [vmem:[%s1830_s5 + $0x30] sm:$0xff]  ;;  %s1337_s28 = sshll.u32 %s1496_s20, 3 }
  0x1c   : > { %1309 = vmatpush.xpose.msk.msra.mxu0 %vm482_vm0, %v1637_v3  ;;  %v453_v4 = vld [vmem:[%s444_s14] sm:$0xff]  ;;  %v530_v16 = vld [vmem:[%s1830_s5 + $0x18] sm:$0xff]  ;;  %s1197_s23 = scalar_lea.hbm %s1836_s11, %s1337_s28  ;;  %s1199_s20 = sshll.u32 %s433_s16, 4  ;;  %s1200_s20 = int_to_ptr.vmem [resolvable:$true] %s1199_s20 }
  0x1d   : > { %1340 = vmatpush.xpose.msk.msra.mxu1 %vm482_vm0, %v453_v4  ;;  %1341 = vmatpush.xpose.msk.msra.mxu3 %vm482_vm0, %v453_v4  ;;  %v457_v17 = vld [vmem:[%s1828_s3 + $0x18] sm:$0xff]  ;;  %v527_v18 = vld [vmem:[%s1830_s5] sm:$0xff]  ;;  %s1201_s0 = sshll.u32 %s1197_s23, 4  ;;  %s1446_s26 = scalar_lea.hbm %s1836_s11, 16  ;;  %s1202_s0 = int_to_ptr.hbm [resolvable:$true] %s1201_s0 }
  0x1e   : > { %v651_v47 = vld [vmem:[%s451_s25] sm:$0xff]  ;;  %v534_v1 = vld [vmem:[%s1830_s5 + $0x38] sm:$0xff]  ;;  %s1440_s13 = sshra.s32 %s1202_s0, 4  ;;  %s1441_s13 = int_to_ptr.hbm [resolvable:$true] %s1440_s13 }
  0x1f   : > { %1310 = vmatmul.msk.f32.vlgmr.msra.gmra.mxu0 %vm482_vm0, %v454_v5  ;;  %v531_v0 = vld [vmem:[%s1830_s5 + $0x20] sm:$0xff]  ;;  %s1442_s28 = scalar_lea.hbm %s1441_s13, 8  ;;  %p1447_p1 = scmp.lt.s32.totalorder %s1441_s13, %s1836_s11 }
  0x20   : > { %1314 = vmatpush.xpose.msk.msrb.mxu0 %vm482_vm0, %v453_v4  ;;  %1316 = vmatmul.msk.f32.vlgmr.msra.gmra.mxu1 %vm482_vm0, %v528_v7  ;;  %p1443_p12 = scmp.ne.s32.totalorder %s1441_s13, %s1442_s28  ;;  %p1448_p2 = scmp.lt.s32.totalorder %s1446_s26, %s1442_s28 }
  0x21   : > { %469 = vperm.xlu0 %1400, %v459_v6   ;;  %474 = vperm.xlu1 %1401, %v460_v8   ;;  %v532_v6 = vld [vmem:[%s1830_s5 + $0x28] sm:$0xff] }
  0x22   : > { %1322 = vmatmul.msk.f32.vlgmr.msra.gmra.mxu3 %vm482_vm0, %v534_v1  ;;  %p1444_p13 = pnand %p1443_p12, %p1608_p4  ;;  %p1449_p3 = por %p1448_p2, %p1447_p1 }
  0x23   : > { %479 = vperm.xlu2 %1402, %v461_v14  }
  0x24   : > { %p1445_p0 = pneg %p1444_p13 }
  0x26   : > { %p1450_p5 = pnand %p1449_p3, %p1445_p0 }
  0x27   : > { %1311 = vmatmul.msk.f32.gmra.mxu0 %vm482_vm0, %v455_v10 }
  0x28   : > { %1317 = vmatmul.msk.f32.gmra.mxu1 %vm482_vm0, %v529_v12 }
  0x29   : > { %555 = vperm.xlu0 %1400, %v537_v11   ;;  %560 = vperm.xlu1 %1401, %v538_v13  }
  0x2f   : > { %1312 = vmatmul.msk.f32.gmra.mxu0 %vm482_vm0, %v456_v15 }
  0x30   : > { %1318 = vmatmul.msk.f32.gmra.mxu1 %vm482_vm0, %v530_v16 }
  0x37   : > { %1313 = vmatmul.msk.f32.gmra.mxu0 %vm482_vm0, %v457_v17 }
  0x38   : > { %1319 = vmatmul.msk.f32.gmra.mxu1 %vm482_vm0, %v531_v0 }
  0x3f   : > { %1315 = vmatmul.msk.f32.vlgmr.msrb.gmra.mxu0 %vm482_vm0, %v527_v18 }
  0x40   : > { %1320 = vmatmul.msk.f32.gmra.mxu1 %vm482_vm0, %v532_v6 }
  0x48   : > { %1321 = vmatmul.msk.f32.gmra.mxu1 %vm482_vm0, %v533_v9 }
  0x75   : > { %v551_v26 = vpop.permute.xlu2 %550 }
  0x7d   : > { %v480_v30 = vpop.permute.xlu2 %479 }
  0x8b   : > { %v465_v19 = vpop.permute.xlu0 %464  ;;  %v546_v22 = vpop.permute.xlu1 %545 }
  0x93   : > { %v470_v23 = vpop.permute.xlu0 %469  ;;  %v475_v27 = vpop.permute.xlu1 %474 }
  0x9b   : > { %v556_v38 = vpop.permute.xlu0 %555  ;;  %v561_v42 = vpop.permute.xlu1 %560 }
  0x9c   : > { %v515_v20 = vpop.f32.mrf.mxu0 }
  0x9d   : > { %v516_v21 = vadd.f32 %v515_v20, %v465_v19  ;;  %v630_v33 = vpop.f32.mrf.mxu1  ;;  %v539_v19 = vld [vmem:[%s1831_s6 + $0x20] sm:$0xff] }
  0x9e   : > { %v631_v34 = vadd.f32 %v630_v33, %v551_v26 }
  0x9f   : > { %652 = vxpose.xlu2.b32.start.end [1/1] (short) (narrow) %v516_v21, 8 }
  0xa4   : > { %v518_v24 = vpop.f32.mrf.mxu0 }
  0xa5   : > { %v519_v25 = vadd.f32 %v518_v24, %v470_v23  ;;  %v633_v37 = vpop.f32.mrf.mxu1  ;;  %v542_v24 = vld [vmem:[%s1831_s6 + $0x38] sm:$0xff] }
  0xa6   : > { %v634_v39 = vadd.f32 %v633_v37, %v556_v38 }
  0xa7   : > { %760 = vxpose.xlu0.b32.start.end [1/1] (short) (narrow) %v519_v25, 8 }
  0xac   : > { %v521_v28 = vpop.f32.mrf.mxu0 }
  0xad   : > { %v522_v29 = vadd.f32 %v521_v28, %v475_v27  ;;  %v636_v41 = vpop.f32.mrf.mxu1  ;;  %v540_v27 = vld [vmem:[%s1831_s6 + $0x28] sm:$0xff]  ;;  %v541_v28 = vld [vmem:[%s1831_s6 + $0x30] sm:$0xff] }
  0xae   : > { %v637_v43 = vadd.f32 %v636_v41, %v561_v42 }
  0xaf   : > { %867 = vxpose.xlu1.b32.start.end [1/1] (short) (narrow) %v522_v29, 8 }
  0xb4   : > { %v524_v31 = vpop.f32.mrf.mxu0 }
  0xb5   : > { %v525_v32 = vadd.f32 %v524_v31, %v480_v30  ;;  %v639_v42 = vpop.f32.mrf.mxu1 }
  0xb7   : > { %974 = vxpose.xlu2.b32.start.end [1/1] (short) (narrow) %v525_v32, 8 }
  0xbc   : > { %v627_v35 = vpop.f32.mrf.mxu0 }
  0xbd   : > { %v628_v36 = vadd.f32 %v627_v35, %v546_v22 }
  0xbf   : > { %703 = vmatpush.msra.mxu2 %v628_v36 }
  0xc1   : > { %810 = vmatpush.msrb.mxu2 %v631_v34 }
 0x138   : > { %v668_v40 = vpop.trf.xlu2 }
 0x139   : > { %1323 = vmatmul.msk.f32.vlgmr.msra.gmra.mxu2 %vm684_vm1, %v668_v40 }
 0x13a   : > { %917 = vmatpush.msra.mxu2 %v634_v39 }
 0x14b   : > { %v776_v44 = vpop.trf.xlu0 }
 0x14c   : > { %1326 = vmatmul.msk.f32.vlgmr.msrb.gmra.mxu2 %vm684_vm1, %v776_v44 }
 0x14d   : > { %1024 = vmatpush.msrb.mxu2 %v637_v43 }
 0x150   : > { %v990_v46 = vpop.trf.xlu2 }
 0x153   : > { %v883_v45 = vpop.trf.xlu1 }
 0x154   : > { %1329 = vmatmul.msk.f32.vlgmr.msra.gmra.mxu2 %vm684_vm1, %v883_v45 }
 0x15c   : > { %1332 = vmatmul.msk.f32.vlgmr.msrb.gmra.mxu2 %vm684_vm1, %v990_v46 }
 0x1bc   : > { %v705_v48 = vpop.f32.mrf.mxu2 }
 0x1bd   : > { %v708_v49 = vmul.f32 0.35355338, %v705_v48 }
 0x1bf   : > { %v709_v50 = vadd.f32 %v708_v49, %v651_v47 }
 0x1c1   : > { %v710_v51 = vsel %vm684_vm1, %v709_v50, -inf }
 0x1c2   : > { %711 = vmax.xlane.f32.xlu0 %v710_v51 }
 0x1cf   : > { %v812_v52 = vpop.f32.mrf.mxu2 }
 0x1d0   : > { %v815_v53 = vmul.f32 0.35355338, %v812_v52 }
 0x1d2   : > { %v816_v54 = vadd.f32 %v815_v53, %v651_v47 }
 0x1d4   : > { %v817_v55 = vsel %vm684_vm1, %v816_v54, -inf }
 0x1d5   : > { %818 = vmax.xlane.f32.xlu2 %v817_v55 }
 0x1d7   : > { %v919_v56 = vpop.f32.mrf.mxu2 }
 0x1d8   : > { %v922_v57 = vmul.f32 0.35355338, %v919_v56 }
 0x1da   : > { %v923_v58 = vadd.f32 %v922_v57, %v651_v47 }
 0x1dc   : > { %v924_v59 = vsel %vm684_vm1, %v923_v58, -inf }
 0x1dd   : > { %925 = vmax.xlane.f32.xlu1 %v924_v59 }
 0x1df   : > { %v1026_v60 = vpop.f32.mrf.mxu2 }
 0x1e0   : > { %v1029_v61 = vmul.f32 0.35355338, %v1026_v60 }
 0x1e2   : > { %v1030_v62 = vadd.f32 %v1029_v61, %v651_v47 }
 0x1e4   : > { %v1031_v63 = vsel %vm684_vm1, %v1030_v62, -inf }
 0x1e5   : > { %1032 = vmax.xlane.f32.xlu0 %v1031_v63 }
 0x235   : > { %v712_v2 = vpop.xlane.xlu0 %711 }
 0x236   : > { %v713_v4 = vsub.f32 %v709_v50, %v712_v2 }
 0x238   : > { %v714_v5 = vmul.f32 1.442695, %v713_v4  ;;  %v642_v4 = vpop.f32.mrf.mxu1 }
 0x23a   : > { %1406 = vpow2.f32 %v714_v5 }
 0x240   : > { %v1407_v7 = vpop.eup %1406 }
 0x241   : > { %v716_v8 = vsel %vm684_vm1, %v1407_v7, 0.0 }
 0x242   : > { %717 = vadd.xlane.f32.xlu1 %v716_v8 }
 0x248   : > { %v819_v10 = vpop.xlane.xlu2 %818 }
 0x249   : > { %v820_v11 = vsub.f32 %v816_v54, %v819_v10 }
 0x24b   : > { %v821_v12 = vmul.f32 1.442695, %v820_v11 }
 0x24d   : > { %1408 = vpow2.f32 %v821_v12 }
 0x250   : > { %v926_v13 = vpop.xlane.xlu1 %925 }
 0x251   : > { %v927_v14 = vsub.f32 %v923_v58, %v926_v13 }
 0x253   : > { %v1727_v15 = vpop.eup %1408  ;;  %v928_v16 = vmul.f32 1.442695, %v927_v14 }
 0x254   : > { %v823_v17 = vsel %vm684_vm1, %v1727_v15, 0.0 }
 0x255   : > { %1410 = vpow2.f32 %v928_v16  ;;  %824 = vadd.xlane.f32.xlu2 %v823_v17 }
 0x258   : > { %v1033_v18 = vpop.xlane.xlu0 %1032 }
 0x259   : > { %v1034_v20 = vsub.f32 %v1030_v62, %v1033_v18 }
 0x25b   : > { %v1734_v21 = vpop.eup %1410  ;;  %v1035_v22 = vmul.f32 1.442695, %v1034_v20  ;;  %565 = vperm.xlu1 %1401, %v539_v19   ;;  %v645_v19 = vpop.f32.mrf.mxu1 }
 0x25c   : > { %v930_v23 = vsel %vm684_vm1, %v1734_v21, 0.0 }
 0x25d   : > { %1412 = vpow2.f32 %v1035_v22  ;;  %931 = vadd.xlane.f32.xlu0 %v930_v23  ;;  %v648_v23 = vpop.f32.mrf.mxu3 }
 0x263   : > { %v1741_v25 = vpop.eup %1412  ;;  %580 = vperm.xlu1 %1401, %v542_v24  }
 0x264   : > { %v1037_v26 = vsel %vm684_vm1, %v1741_v25, 0.0 }
 0x265   : > { %1038 = vadd.xlane.f32.xlu2 %v1037_v26 }
 0x271   : > { %570 = vperm.xlu0 %1400, %v540_v27  }
 0x27d   : > { %575 = vperm.xlu2 %1402, %v541_v28   ;;  %v1084_v28 = vld [vmem:[%s1832_s7 + $0x18] sm:$0xff] }
 0x27e   : > { %1136 = vmatpush.msra.mxu2 %v1084_v28 }
 0x2b5   : > { %v718_v29 = vpop.xlane.xlu1 %717 }
 0x2b6   : > { %1414 = vrcp.f32 %v718_v29  ;;  %v730_v33 = vand.u32 2147483648, %v718_v29  ;;  %v728_v35 = vand.u32 2147483647, %v718_v29  ;;  %vm724_vm3 = vweird.f32 %v718_v29 }
 0x2b8   : > { %v731_v37 = vor.u32 1.1754944e-38, %v730_v33  ;;  %vm729_vm5 = vcmp.eq.f32.partialorder %v728_v35, 8.507059e+37  ;;  %v1403_v35 = vld [vmem:[%s1833_s8] ss:$0 sm:$0xff] }
 0x2bc   : > { %v1415_v30 = vpop.eup %1414 }
 0x2bd   : > { %v720_v31 = vmul.f32 %v1415_v30, %v718_v29  ;;  %vm725_vm2 = vweird.f32 %v1415_v30  ;;  %v1082_v29 = vld [vmem:[%s1832_s7 + $0x8] sm:$0xff] }
 0x2be   : > { %vm726_vm4 = vmor %vm724_vm3, %vm725_vm2 }
 0x2bf   : > { %v721_v32 = vsub.f32 1.0, %v720_v31 }
 0x2c1   : > { %v722_v34 = vmul.f32 %v1415_v30, %v721_v32 }
 0x2c3   : > { %v723_v36 = vadd.f32 %v1415_v30, %v722_v34 }
 0x2c5   : > { %v727_v38 = vsel %vm726_vm4, %v1415_v30, %v723_v36  ;;  %v1081_v30 = vld [vmem:[%s1832_s7] sm:$0xff] }
 0x2c6   : > { %v732_v39 = vsel %vm729_vm5, %v731_v37, %v727_v38 }
 0x2c7   : > { %v733_v40 = vmul.f32 %v1407_v7, %v732_v39 }
 0x2c8   : > { %v825_v41 = vpop.xlane.xlu2 %824 }
 0x2c9   : > { %1416 = vrcp.f32 %v825_v41  ;;  %1324 = vmatpush.xpose.msk.msrb.mxu3 %vm684_vm1, %v733_v40  ;;  %v837_v49 = vand.u32 2147483648, %v825_v41  ;;  %v835_v51 = vand.u32 2147483647, %v825_v41  ;;  %vm831_vm7 = vweird.f32 %v825_v41 }
 0x2ca   : > { %v1507_v40 = vmov 32.0  }
 0x2cb   : > { %v838_v54 = vor.u32 1.1754944e-38, %v837_v49  ;;  %vm836_vm9 = vcmp.eq.f32.partialorder %v835_v51, 8.507059e+37 }
 0x2cd   : > { %v566_v43 = vpop.permute.xlu1 %565 }
 0x2ce   : > { %v640_v44 = vadd.f32 %v639_v42, %v566_v43 }
 0x2cf   : > { %v1417_v45 = vpop.eup %1416 }
 0x2d0   : > { %v827_v46 = vmul.f32 %v1417_v45, %v825_v41  ;;  %1325 = vmatmul.msk.f32.vlgmr.msrb.gmra.mxu3 %vm684_vm1, %v640_v44  ;;  %v932_v47 = vpop.xlane.xlu0 %931  ;;  %vm832_vm6 = vweird.f32 %v1417_v45 }
 0x2d1   : > { %1418 = vrcp.f32 %v932_v47  ;;  %vm833_vm8 = vmor %vm831_vm7, %vm832_vm6  ;;  %v944_v61 = vand.u32 2147483648, %v932_v47  ;;  %v942_v63 = vand.u32 2147483647, %v932_v47  ;;  %vm938_vm11 = vweird.f32 %v932_v47 }
 0x2d2   : > { %v828_v48 = vsub.f32 1.0, %v827_v46 }
 0x2d3   : > { %v945_v2 = vor.u32 1.1754944e-38, %v944_v61  ;;  %vm943_vm13 = vcmp.eq.f32.partialorder %v942_v63, 8.507059e+37  ;;  %v1405_v63 = vld [vmem:[%s1835_s10] ss:$0 sm:$0xff] }
 0x2d4   : > { %v829_v50 = vmul.f32 %v1417_v45, %v828_v48 }
 0x2d5   : > { %v581_v24 = vpop.permute.xlu1 %580 }
 0x2d6   : > { %v830_v52 = vadd.f32 %v1417_v45, %v829_v50  ;;  %v649_v26 = vadd.f32 %v648_v23, %v581_v24 }
 0x2d7   : > { %v1419_v53 = vpop.eup %1418 }
 0x2d8   : > { %v834_v55 = vsel %vm833_vm8, %v1417_v45, %v830_v52  ;;  %v934_v56 = vmul.f32 %v1419_v53, %v932_v47  ;;  %v1039_v57 = vpop.xlane.xlu2 %1038  ;;  %vm939_vm10 = vweird.f32 %v1419_v53 }
 0x2d9   : > { %v839_v58 = vsel %vm836_vm9, %v838_v54, %v834_v55  ;;  %1420 = vrcp.f32 %v1039_v57  ;;  %vm940_vm12 = vmor %vm938_vm11, %vm939_vm10  ;;  %v1051_v10 = vand.u32 2147483648, %v1039_v57  ;;  %v1049_v13 = vand.u32 2147483647, %v1039_v57 }
 0x2da   : > { %v935_v59 = vsub.f32 1.0, %v934_v56  ;;  %v840_v60 = vmul.f32 %v1727_v15, %v839_v58  ;;  %vm1045_vm15 = vweird.f32 %v1039_v57  ;;  %1422 = vrcp.f32 %v1507_v40 }
 0x2db   : > { %v1052_v16 = vor.u32 1.1754944e-38, %v1051_v10  ;;  %vm1050_vm3 = vcmp.eq.f32.partialorder %v1049_v13, 8.507059e+37 }
 0x2dc   : > { %v936_v62 = vmul.f32 %v1419_v53, %v935_v59  ;;  %1327 = vmatpush.xpose.msk.msra.mxu3 %vm684_vm1, %v840_v60  ;;  %v1404_v60 = vld [vmem:[%s1834_s9] ss:$0 sm:$0xff] }
 0x2de   : > { %v937_v0 = vadd.f32 %v1419_v53, %v936_v62 }
 0x2df   : > { %v1421_v1 = vpop.eup %1420 }
 0x2e0   : > { %v941_v5 = vsel %vm940_vm12, %v1419_v53, %v937_v0  ;;  %v1041_v6 = vmul.f32 %v1421_v1, %v1039_v57  ;;  %vm1046_vm14 = vweird.f32 %v1421_v1  ;;  %v576_v20 = vpop.permute.xlu2 %575  ;;  %v1423_v41 = vpop.eup %1422 }
 0x2e1   : > { %v946_v7 = vsel %vm943_vm13, %v945_v2, %v941_v5  ;;  %vm1047_vm2 = vmor %vm1045_vm15, %vm1046_vm14  ;;  %v646_v22 = vadd.f32 %v645_v19, %v576_v20  ;;  %v1149_v42 = vmul.f32 32.0, %v1423_v41 }
 0x2e2   : > { %v1042_v8 = vsub.f32 1.0, %v1041_v6  ;;  %v947_v9 = vmul.f32 %v1734_v21, %v946_v7 }
 0x2e3   : > { %v571_v11 = vpop.permute.xlu0 %570  ;;  %v1150_v43 = vsub.f32 1.0, %v1149_v42 }
 0x2e4   : > { %v1043_v12 = vmul.f32 %v1421_v1, %v1042_v8  ;;  %v643_v14 = vadd.f32 %v642_v4, %v571_v11  ;;  %1330 = vmatpush.xpose.msk.msrb.mxu3 %vm684_vm1, %v947_v9 }
 0x2e5   : > { %v1151_v44 = vmul.f32 %v1423_v41, %v1150_v43 }
 0x2e6   : > { %v1044_v15 = vadd.f32 %v1421_v1, %v1043_v12  ;;  %1328 = vmatmul.msk.f32.vlgmr.msra.gmra.mxu3 %vm684_vm1, %v643_v14 }
 0x2e7   : > { %v1152_v45 = vadd.f32 %v1423_v41, %v1151_v44 }
 0x2e8   : > { %v1048_v17 = vsel %vm1047_vm2, %v1421_v1, %v1044_v15 }
 0x2e9   : > { %v1053_v18 = vsel %vm1050_vm3, %v1052_v16, %v1048_v17 }
 0x2ea   : > { %v1054_v21 = vmul.f32 %v1741_v25, %v1053_v18  ;;  %v1083_v25 = vld [vmem:[%s1832_s7 + $0x10] sm:$0xff] }
 0x2eb   : > { %1137 = vmatpush.msra.mxu2 %v1083_v25 }
 0x2ec   : > { %1333 = vmatpush.xpose.msk.msra.mxu3 %vm684_vm1, %v1054_v21 }
 0x2ed   : > { %1138 = vmatpush.msra.mxu2 %v1082_v29 }
 0x2ee   : > { %1331 = vmatmul.msk.f32.vlgmr.msrb.gmra.mxu3 %vm684_vm1, %v646_v22 }
 0x2ef   : > { %1139 = vmatpush.msra.mxu2 %v1081_v30 }
 0x2f6   : > { %1334 = vmatmul.msk.f32.vlgmr.msra.gmra.mxu3 %vm684_vm1, %v649_v26  ;;  %vm1153_vm1 = vweird.f32 %v1423_v41 }
 0x2f7   : > { %v1154_v46 = vsel %vm1153_vm1, %v1423_v41, %v1152_v45 }
 0x353   : > { %v757_v27 = vpop.f32.mrf.mxu3 }
 0x354   : > { %1089 = vxpose.xlu0.b32.start [1/4] (short) (narrow) %v757_v27, 8 }
 0x369   : > { %v864_v31 = vpop.f32.mrf.mxu3 }
 0x36a   : > { %1090 = vxpose.xlu0.b32.cont [2/4] (short) (narrow) %v864_v31, 8 }
 0x371   : > { %v971_v32 = vpop.f32.mrf.mxu3 }
 0x372   : > { %1091 = vxpose.xlu0.b32.cont [3/4] (short) (narrow) %v971_v32, 8 }
 0x379   : > { %v1078_v33 = vpop.f32.mrf.mxu3 }
 0x37a   : > { %1092 = vxpose.xlu0.b32.end [4/4] (short) (narrow) %v1078_v33, 8 }
 0x406   : > { %v1105_v34 = vpop.trf.xlu0 }
 0x407   : > { %1335 = vmatmul.msk.f32.vlgmr.msra.gmra.mxu2 %vm482_vm0, %v1105_v34 }
 0x48a   : > { %v1141_v36 = vpop.f32.mrf.mxu2 }
 0x48b   : > { %v1142_v37 = vadd.f32 %v1403_v35, %v1141_v36 }
 0x48d   : > { %v1144_v38 = vadd.f32 %v1142_v37, %v1637_v3 }
 0x48f   : > { %v1145_v39 = vsel %vm482_vm0, %v1144_v38, 0.0 }
 0x490   : > { %1146 = vadd.xlane.f32.xlu1 %v1145_v39 }
 0x503   : > { %v1147_v47 = vpop.xlane.xlu1 %1146 }
 0x504   : > { %v1155_v48 = vmul.f32 %v1154_v46, %v1147_v47 }
 0x506   : > { %v1156_v49 = vsub.f32 %v1144_v38, %v1155_v48 }
 0x508   : > { %v1157_v50 = vmul.f32 %v1156_v49, %v1156_v49 }
 0x50a   : > { %v1158_v3 = vsel %vm482_vm0, %v1157_v50, 0.0 }
 0x50b   : > { %1159 = vadd.xlane.f32.xlu2 %v1158_v3 }
 0x57e   : > { %v1160_v51 = vpop.xlane.xlu2 %1159 }
 0x57f   : > { %v1161_v52 = vmul.f32 %v1160_v51, %v1154_v46 }
 0x581   : > { %v1162_v53 = vadd.f32 1e-05, %v1161_v52 }
 0x583   : > { %1424 = vrsqrt.f32 %v1162_v53  ;;  %vm1169_vm5 = vweird.f32 %v1162_v53 }
 0x589   : > { %v1425_v54 = vpop.eup %1424 }
 0x58a   : > { %v1164_v55 = vmul.f32 %v1425_v54, %v1162_v53  ;;  %vm1170_vm4 = vweird.f32 %v1425_v54 }
 0x58b   : > { %vm1171_vm6 = vmor %vm1169_vm5, %vm1170_vm4 }
 0x58c   : > { %v1165_v56 = vmul.f32 %v1425_v54, %v1164_v55 }
 0x58e   : > { %v1166_v57 = vmul.f32 0.5, %v1165_v56 }
 0x590   : > { %v1167_v58 = vsub.f32 1.5, %v1166_v57 }
 0x592   : > { %v1168_v59 = vmul.f32 %v1425_v54, %v1167_v58 }
 0x594   : > { %v1172_v61 = vsel %vm1171_vm6, %v1425_v54, %v1168_v59 }
 0x595   : > { %v1173_v62 = vmul.f32 %v1172_v61, %v1156_v49 }
 0x597   : > { %v1178_v0 = vmul.f32 %v1404_v60, %v1173_v62 }
 0x599   : > { %v1183_v1 = vadd.f32 %v1405_v63, %v1178_v0 }
 0x59b   : > { %1184 = vst.msk [vmem:[%s433_s16] sm:$0xff] %vm482_vm0, %v1183_v1 }
 0x59c   : > { %1453 = shalt.err (!%p1450_p5)
}
 0x59d   : > { %1342 = dma.vmem_to_hbm [thread:$0]  (%p1608_p4), %s1200_s20, 128, %s1202_s0, %s1186_s12  }
 0x59e PF: > { %p1348_p6 = scmp.ge.s32.totalorder %s1504_s22, 2  ;;  %s1213_s24 = sand.u32 1, %s1484_s17  }
 0x59f   : > { %s1214_s15 = scalar_lea.sflag [#allocation3], %s1213_s24 }
 0x5a0   : > { %p1345_p7 = pnand %p1348_p6, %p1615_p8 }
 0x5a2   : > { %p1346_p9 = pneg %p1345_p7 }
 0x5a4   : > { %1479 = dma.done.wait (%p1346_p9), %s1214_s15, 128  }
 0x5a5   : > { %1481 = vsyncadd (%p1346_p9), %s1214_s15, 4294967168  ;;  %s24_s22 = sadd.s32 1, %s1504_s22   ;;  %s1845_s20 = sld [smem:[#allocation5_spill]] }
 0x5a6   : > { %p21_p10 = scmp.ge.s32.totalorder %s24_s22, 4   ;;  %s1846_s21 = sld [smem:[#allocation6_spill]] }
 0x5a7   : > { %s1847_s17 = smov %s1488_s18  ;;  %s1848_s18 = smov %s1492_s19 }
 0x5a8   : > { %s1849_s19 = smov %s1621_s30  ;;  %23 = sbr.rel (!%p21_p10) target bundleno = 6 (0x6), region = 105 }
 0x5ad   :  { %1220 = vsyncpa [#allocation3], 1 }
 0x5ae   :  { %1222 = vsyncpa [#allocation3 + $0x1], 1 }

// kernel: tpu_custom_call.1
= control target key start
LH: loop header
LB: loop body
LE: loop exit
PB: predicated region body
PF: predicated region fallthrough
CT: control target
= control target key end

     0   :  { %s1825_s0 = inlined_call_operand.vmem [shape: f32[2,8,32], index: 0, kind: input, shape index: {}]   ;;  %s1826_s1 = inlined_call_operand.vmem [shape: f32[2,8,32], index: 1, kind: input, shape index: {}]   ;;  %s1827_s2 = inlined_call_operand.vmem [shape: f32[2,8,8], index: 2, kind: input, shape index: {}]   ;;  %s1828_s3 = inlined_call_operand.vmem [shape: f32[32,32], index: 3, kind: input, shape index: {}]   ;;  %s1829_s4 = inlined_call_operand.vmem [shape: f32[32,1], index: 4, kind: input, shape index: {}]   ;;  %s1830_s5 = inlined_call_operand.vmem [shape: f32[64,32], index: 5, kind: input, shape index: {}]   ;;  %s1831_s6 = inlined_call_operand.vmem [shape: f32[64,1], index: 6, kind: input, shape index: {}]   ;;  %s1832_s7 = inlined_call_operand.vmem [shape: f32[32,32], index: 7, kind: input, shape index: {}]   ;;  %s1833_s8 = inlined_call_operand.vmem [shape: f32[1,32], index: 8, kind: input, shape index: {}]   ;;  %s1834_s9 = inlined_call_operand.vmem [shape: f32[1,32], index: 9, kind: input, shape index: {}]   ;;  %s1835_s10 = inlined_call_operand.vmem [shape: f32[1,32], index: 10, kind: input, shape index: {}]   ;;  %s1836_s11 = inlined_call_operand.hbm [shape: f32[2,8,32], index: 11, kind: output, shape index: {}]  }
   0x1   :  { %1839 = sst [smem:[#allocation7_spill]] %s1825_s0 }
   0x2   :  { %16 = vsyncpa [#allocation3], 0 }
   0x3   :  { %18 = vsyncpa [#allocation3 + $0x1], 0  ;;  %s1568_s17 = smov 0   ;;  %s1570_s18 = smov 0  }
   0x4   :  { %s1572_s19 = smov 0   ;;  %s1574_s20 = smov 0  }
   0x5   :  { %s1576_s21 = smov 0   ;;  %s1578_s22 = smov 0  }
   0x6 LB: > { %1840 = sst [smem:[#allocation5_spill]] %s1500_s21  ;;  %s1300_s23 = sadd.s32 4294967295, %s1504_s22   ;;  %s1504_s22 = sphi %s1578_s22, %s24_s22   ;;  %s1500_s21 = sphi %s1576_s21, %s1846_s21   ;;  %s1496_s20 = sphi %s1574_s20, %s1845_s20   ;;  %s1492_s19 = sphi %s1572_s19, %s1849_s19   ;;  %s1488_s18 = sphi %s1570_s18, %s1848_s18   ;;  %s1484_s17 = sphi %s1568_s17, %s1847_s17  }
   0x7   : > { %s1301_s24 = sadd.s32 4294967294, %s1504_s22   ;;  %s36_s25 = sadd.s32 1, %s1500_s21 }
   0x8   : > { %s295_s26 = sadd.s32 1, %s1492_s19  ;;  %p38_p0 = scmp.ge.s32.totalorder %s36_s25, 2 }
   0x9   : > { %p305_p1 = scmp.ne.s32.totalorder %s1492_s19, %s1488_s18  ;;  %p306_p2 = scmp.eq.s32.totalorder %s1300_s23, 1 }
   0xa   : > { %p311_p3 = scmp.ne.s32.totalorder %s1488_s18, %s1484_s17  ;;  %s1851_s25 = smov (%p38_p0, %s36_s25), 0 }
   0xb   : > { %1841 = sst [smem:[#allocation6_spill]] %s1851_s25  ;;  %p1608_p4 = por %p306_p2, %p305_p1 }
   0xc   : > { %p312_p5 = scmp.eq.s32.totalorder %s1301_s24, 1  ;;  %s290_s28 = ssub.s32 %s1500_s21, %s1851_s25 }
   0xd   : > { %p1304_p6 = scmp.ge.s32.totalorder %s1504_s22, 1  ;;  %p293_p7 = scmp.eq.s32.totalorder %s290_s28, 0 }
   0xe   : > { %p1615_p8 = por %p312_p5, %p311_p3  ;;  %p381_p9 = scmp.lt.s32.totalorder %s1504_s22, 3 }
   0xf   : > { %s1621_s30 = scalar_select %p293_p7, %s1492_s19, %s295_s26  }
  0x10   : > { %p382_p10 = pnand %p1304_p6, %p381_p9 }
  0x11   : > { %p434_p11 = scmp.lt.s32.totalorder (!%p382_p10), %s1496_s20, 1  ;;  %s1844_s0 = sld [smem:[#allocation7_spill]] (!%p382_p10) }
  0x12   : > { %385 = sbr.rel (%p382_p10) target bundleno = 1438 (0x59e), region = 64  ;;  %s431_s24 = sand.u32 (!%p382_p10), 1, %s1488_s18  }
  0x13   : > { %s1305_s26 = sshll.u32 (!%p382_p10), %s431_s24, 3  ;;  %s1186_s12 = scalar_lea.sflag (!%p382_p10), [#allocation3], %s431_s24 }
  0x17   : > { %v458_v0 = vld [vmem:[%s1829_s4] sm:$0xff]  ;;  %v1506_v1 = vmov 0   ;;  %s435_s16 = scalar_select %p434_p11, %s1496_s20, 1  ;;  %vm482_vm0 = vcmask 261120   ;;  %v459_v6 = vld [vmem:[%s1829_s4 + $0x8] sm:$0xff]  ;;  %v460_v8 = vld [vmem:[%s1829_s4 + $0x10] sm:$0xff] }
  0x18   : > { %1400 = vset.pattern.permute.xlu0 %v1506_v1  ;;  %1401 = vset.pattern.permute.xlu1 %v1506_v1  ;;  %v535_v2 = vld [vmem:[%s1831_s6] sm:$0xff]  ;;  %v528_v7 = vld [vmem:[%s1830_s5 + $0x8] sm:$0xff]  ;;  %v537_v11 = vld [vmem:[%s1831_s6 + $0x10] sm:$0xff]  ;;  %vm684_vm1 = vcmask 64512  }
  0x19   : > { %464 = vperm.xlu0 %1400, %v458_v0   ;;  %545 = vperm.xlu1 %1401, %v535_v2   ;;  %s1631_s23 = sshll.u32 %s435_s16, 3  ;;  %v454_v5 = vld [vmem:[%s1828_s3] sm:$0xff]  ;;  %v536_v9 = vld [vmem:[%s1831_s6 + $0x8] sm:$0xff]  ;;  %v529_v12 = vld [vmem:[%s1830_s5 + $0x10] sm:$0xff]  ;;  %s433_s16 = scalar_lea.vmem [#allocation2], %s1305_s26 }
  0x1a   : > { %1402 = vset.pattern.permute.xlu2 %v1506_v1  ;;  %s440_s28 = scalar_lea.vmem %s1844_s0, %s1631_s23  ;;  %s444_s14 = scalar_lea.vmem %s1826_s1, %s1631_s23  ;;  %v455_v10 = vld [vmem:[%s1828_s3 + $0x8] sm:$0xff]  ;;  %v538_v13 = vld [vmem:[%s1831_s6 + $0x18] sm:$0xff]  ;;  %v456_v15 = vld [vmem:[%s1828_s3 + $0x10] sm:$0xff] }
  0x1b   : > { %v1637_v3 = vld [vmem:[%s440_s28] sm:$0xff]  ;;  %550 = vperm.xlu2 %1402, %v536_v9   ;;  %v461_v14 = vld [vmem:[%s1829_s4 + $0x18] sm:$0xff]  ;;  %s451_s25 = scalar_lea.vmem %s1827_s2, %s1631_s23  ;;  %v533_v9 = vld [vmem:[%s1830_s5 + $0x30] sm:$0xff]  ;;  %s1337_s28 = sshll.u32 %s1496_s20, 3 }
  0x1c   : > { %1309 = vmatpush.xpose.msk.msra.mxu0 %vm482_vm0, %v1637_v3  ;;  %v453_v4 = vld [vmem:[%s444_s14] sm:$0xff]  ;;  %v530_v16 = vld [vmem:[%s1830_s5 + $0x18] sm:$0xff]  ;;  %s1197_s23 = scalar_lea.hbm %s1836_s11, %s1337_s28  ;;  %s1199_s20 = sshll.u32 %s433_s16, 4  ;;  %s1200_s20 = int_to_ptr.vmem [resolvable:$true] %s1199_s20 }
  0x1d   : > { %1340 = vmatpush.xpose.msk.msra.mxu1 %vm482_vm0, %v453_v4  ;;  %1341 = vmatpush.xpose.msk.msra.mxu3 %vm482_vm0, %v453_v4  ;;  %v457_v17 = vld [vmem:[%s1828_s3 + $0x18] sm:$0xff]  ;;  %v527_v18 = vld [vmem:[%s1830_s5] sm:$0xff]  ;;  %s1201_s0 = sshll.u32 %s1197_s23, 4  ;;  %s1446_s26 = scalar_lea.hbm %s1836_s11, 16  ;;  %s1202_s0 = int_to_ptr.hbm [resolvable:$true] %s1201_s0 }
  0x1e   : > { %v651_v47 = vld [vmem:[%s451_s25] sm:$0xff]  ;;  %v534_v1 = vld [vmem:[%s1830_s5 + $0x38] sm:$0xff]  ;;  %s1440_s13 = sshra.s32 %s1202_s0, 4  ;;  %s1441_s13 = int_to_ptr.hbm [resolvable:$true] %s1440_s13 }
  0x1f   : > { %1310 = vmatmul.msk.f32.vlgmr.msra.gmra.mxu0 %vm482_vm0, %v454_v5  ;;  %v531_v0 = vld [vmem:[%s1830_s5 + $0x20] sm:$0xff]  ;;  %s1442_s28 = scalar_lea.hbm %s1441_s13, 8  ;;  %p1447_p1 = scmp.lt.s32.totalorder %s1441_s13, %s1836_s11 }
  0x20   : > { %1314 = vmatpush.xpose.msk.msrb.mxu0 %vm482_vm0, %v453_v4  ;;  %1316 = vmatmul.msk.f32.vlgmr.msra.gmra.mxu1 %vm482_vm0, %v528_v7  ;;  %p1443_p12 = scmp.ne.s32.totalorder %s1441_s13, %s1442_s28  ;;  %p1448_p2 = scmp.lt.s32.totalorder %s1446_s26, %s1442_s28 }
  0x21   : > { %469 = vperm.xlu0 %1400, %v459_v6   ;;  %474 = vperm.xlu1 %1401, %v460_v8   ;;  %v532_v6 = vld [vmem:[%s1830_s5 + $0x28] sm:$0xff] }
  0x22   : > { %1322 = vmatmul.msk.f32.vlgmr.msra.gmra.mxu3 %vm482_vm0, %v534_v1  ;;  %p1444_p13 = pnand %p1443_p12, %p1608_p4  ;;  %p1449_p3 = por %p1448_p2, %p1447_p1 }
  0x23   : > { %479 = vperm.xlu2 %1402, %v461_v14  }
  0x24   : > { %p1445_p0 = pneg %p1444_p13 }
  0x26   : > { %p1450_p5 = pnand %p1449_p3, %p1445_p0 }
  0x27   : > { %1311 = vmatmul.msk.f32.gmra.mxu0 %vm482_vm0, %v455_v10 }
  0x28   : > { %1317 = vmatmul.msk.f32.gmra.mxu1 %vm482_vm0, %v529_v12 }
  0x29   : > { %555 = vperm.xlu0 %1400, %v537_v11   ;;  %560 = vperm.xlu1 %1401, %v538_v13  }
  0x2f   : > { %1312 = vmatmul.msk.f32.gmra.mxu0 %vm482_vm0, %v456_v15 }
  0x30   : > { %1318 = vmatmul.msk.f32.gmra.mxu1 %vm482_vm0, %v530_v16 }
  0x37   : > { %1313 = vmatmul.msk.f32.gmra.mxu0 %vm482_vm0, %v457_v17 }
  0x38   : > { %1319 = vmatmul.msk.f32.gmra.mxu1 %vm482_vm0, %v531_v0 }
  0x3f   : > { %1315 = vmatmul.msk.f32.vlgmr.msrb.gmra.mxu0 %vm482_vm0, %v527_v18 }
  0x40   : > { %1320 = vmatmul.msk.f32.gmra.mxu1 %vm482_vm0, %v532_v6 }
  0x48   : > { %1321 = vmatmul.msk.f32.gmra.mxu1 %vm482_vm0, %v533_v9 }
  0x75   : > { %v551_v26 = vpop.permute.xlu2 %550 }
  0x7d   : > { %v480_v30 = vpop.permute.xlu2 %479 }
  0x8b   : > { %v465_v19 = vpop.permute.xlu0 %464  ;;  %v546_v22 = vpop.permute.xlu1 %545 }
  0x93   : > { %v470_v23 = vpop.permute.xlu0 %469  ;;  %v475_v27 = vpop.permute.xlu1 %474 }
  0x9b   : > { %v556_v38 = vpop.permute.xlu0 %555  ;;  %v561_v42 = vpop.permute.xlu1 %560 }
  0x9c   : > { %v515_v20 = vpop.f32.mrf.mxu0 }
  0x9d   : > { %v516_v21 = vadd.f32 %v515_v20, %v465_v19  ;;  %v630_v33 = vpop.f32.mrf.mxu1  ;;  %v539_v19 = vld [vmem:[%s1831_s6 + $0x20] sm:$0xff] }
  0x9e   : > { %v631_v34 = vadd.f32 %v630_v33, %v551_v26 }
  0x9f   : > { %652 = vxpose.xlu2.b32.start.end [1/1] (short) (narrow) %v516_v21, 8 }
  0xa4   : > { %v518_v24 = vpop.f32.mrf.mxu0 }
  0xa5   : > { %v519_v25 = vadd.f32 %v518_v24, %v470_v23  ;;  %v633_v37 = vpop.f32.mrf.mxu1  ;;  %v542_v24 = vld [vmem:[%s1831_s6 + $0x38] sm:$0xff] }
  0xa6   : > { %v634_v39 = vadd.f32 %v633_v37, %v556_v38 }
  0xa7   : > { %760 = vxpose.xlu0.b32.start.end [1/1] (short) (narrow) %v519_v25, 8 }
  0xac   : > { %v521_v28 = vpop.f32.mrf.mxu0 }
  0xad   : > { %v522_v29 = vadd.f32 %v521_v28, %v475_v27  ;;  %v636_v41 = vpop.f32.mrf.mxu1  ;;  %v540_v27 = vld [vmem:[%s1831_s6 + $0x28] sm:$0xff]  ;;  %v541_v28 = vld [vmem:[%s1831_s6 + $0x30] sm:$0xff] }
  0xae   : > { %v637_v43 = vadd.f32 %v636_v41, %v561_v42 }
  0xaf   : > { %867 = vxpose.xlu1.b32.start.end [1/1] (short) (narrow) %v522_v29, 8 }
  0xb4   : > { %v524_v31 = vpop.f32.mrf.mxu0 }
  0xb5   : > { %v525_v32 = vadd.f32 %v524_v31, %v480_v30  ;;  %v639_v42 = vpop.f32.mrf.mxu1 }
  0xb7   : > { %974 = vxpose.xlu2.b32.start.end [1/1] (short) (narrow) %v525_v32, 8 }
  0xbc   : > { %v627_v35 = vpop.f32.mrf.mxu0 }
  0xbd   : > { %v628_v36 = vadd.f32 %v627_v35, %v546_v22 }
  0xbf   : > { %703 = vmatpush.msra.mxu2 %v628_v36 }
  0xc1   : > { %810 = vmatpush.msrb.mxu2 %v631_v34 }
 0x138   : > { %v668_v40 = vpop.trf.xlu2 }
 0x139   : > { %1323 = vmatmul.msk.f32.vlgmr.msra.gmra.mxu2 %vm684_vm1, %v668_v40 }
 0x13a   : > { %917 = vmatpush.msra.mxu2 %v634_v39 }
 0x14b   : > { %v776_v44 = vpop.trf.xlu0 }
 0x14c   : > { %1326 = vmatmul.msk.f32.vlgmr.msrb.gmra.mxu2 %vm684_vm1, %v776_v44 }
 0x14d   : > { %1024 = vmatpush.msrb.mxu2 %v637_v43 }
 0x150   : > { %v990_v46 = vpop.trf.xlu2 }
 0x153   : > { %v883_v45 = vpop.trf.xlu1 }
 0x154   : > { %1329 = vmatmul.msk.f32.vlgmr.msra.gmra.mxu2 %vm684_vm1, %v883_v45 }
 0x15c   : > { %1332 = vmatmul.msk.f32.vlgmr.msrb.gmra.mxu2 %vm684_vm1, %v990_v46 }
 0x1bc   : > { %v705_v48 = vpop.f32.mrf.mxu2 }
 0x1bd   : > { %v708_v49 = vmul.f32 0.35355338, %v705_v48 }
 0x1bf   : > { %v709_v50 = vadd.f32 %v708_v49, %v651_v47 }
 0x1c1   : > { %v710_v51 = vsel %vm684_vm1, %v709_v50, -inf }
 0x1c2   : > { %711 = vmax.xlane.f32.xlu0 %v710_v51 }
 0x1cf   : > { %v812_v52 = vpop.f32.mrf.mxu2 }
 0x1d0   : > { %v815_v53 = vmul.f32 0.35355338, %v812_v52 }
 0x1d2   : > { %v816_v54 = vadd.f32 %v815_v53, %v651_v47 }
 0x1d4   : > { %v817_v55 = vsel %vm684_vm1, %v816_v54, -inf }
 0x1d5   : > { %818 = vmax.xlane.f32.xlu2 %v817_v55 }
 0x1d7   : > { %v919_v56 = vpop.f32.mrf.mxu2 }
 0x1d8   : > { %v922_v57 = vmul.f32 0.35355338, %v919_v56 }
 0x1da   : > { %v923_v58 = vadd.f32 %v922_v57, %v651_v47 }
 0x1dc   : > { %v924_v59 = vsel %vm684_vm1, %v923_v58, -inf }
 0x1dd   : > { %925 = vmax.xlane.f32.xlu1 %v924_v59 }
 0x1df   : > { %v1026_v60 = vpop.f32.mrf.mxu2 }
 0x1e0   : > { %v1029_v61 = vmul.f32 0.35355338, %v1026_v60 }
 0x1e2   : > { %v1030_v62 = vadd.f32 %v1029_v61, %v651_v47 }
 0x1e4   : > { %v1031_v63 = vsel %vm684_vm1, %v1030_v62, -inf }
 0x1e5   : > { %1032 = vmax.xlane.f32.xlu0 %v1031_v63 }
 0x235   : > { %v712_v2 = vpop.xlane.xlu0 %711 }
 0x236   : > { %v713_v4 = vsub.f32 %v709_v50, %v712_v2 }
 0x238   : > { %v714_v5 = vmul.f32 1.442695, %v713_v4  ;;  %v642_v4 = vpop.f32.mrf.mxu1 }
 0x23a   : > { %1406 = vpow2.f32 %v714_v5 }
 0x240   : > { %v1407_v7 = vpop.eup %1406 }
 0x241   : > { %v716_v8 = vsel %vm684_vm1, %v1407_v7, 0.0 }
 0x242   : > { %717 = vadd.xlane.f32.xlu1 %v716_v8 }
 0x248   : > { %v819_v10 = vpop.xlane.xlu2 %818 }
 0x249   : > { %v820_v11 = vsub.f32 %v816_v54, %v819_v10 }
 0x24b   : > { %v821_v12 = vmul.f32 1.442695, %v820_v11 }
 0x24d   : > { %1408 = vpow2.f32 %v821_v12 }
 0x250   : > { %v926_v13 = vpop.xlane.xlu1 %925 }
 0x251   : > { %v927_v14 = vsub.f32 %v923_v58, %v926_v13 }
 0x253   : > { %v1727_v15 = vpop.eup %1408  ;;  %v928_v16 = vmul.f32 1.442695, %v927_v14 }
 0x254   : > { %v823_v17 = vsel %vm684_vm1, %v1727_v15, 0.0 }
 0x255   : > { %1410 = vpow2.f32 %v928_v16  ;;  %824 = vadd.xlane.f32.xlu2 %v823_v17 }
 0x258   : > { %v1033_v18 = vpop.xlane.xlu0 %1032 }
 0x259   : > { %v1034_v20 = vsub.f32 %v1030_v62, %v1033_v18 }
 0x25b   : > { %v1734_v21 = vpop.eup %1410  ;;  %v1035_v22 = vmul.f32 1.442695, %v1034_v20  ;;  %565 = vperm.xlu1 %1401, %v539_v19   ;;  %v645_v19 = vpop.f32.mrf.mxu1 }
 0x25c   : > { %v930_v23 = vsel %vm684_vm1, %v1734_v21, 0.0 }
 0x25d   : > { %1412 = vpow2.f32 %v1035_v22  ;;  %931 = vadd.xlane.f32.xlu0 %v930_v23  ;;  %v648_v23 = vpop.f32.mrf.mxu3 }
 0x263   : > { %v1741_v25 = vpop.eup %1412  ;;  %580 = vperm.xlu1 %1401, %v542_v24  }
 0x264   : > { %v1037_v26 = vsel %vm684_vm1, %v1741_v25, 0.0 }
 0x265   : > { %1038 = vadd.xlane.f32.xlu2 %v1037_v26 }
 0x271   : > { %570 = vperm.xlu0 %1400, %v540_v27  }
 0x27d   : > { %575 = vperm.xlu2 %1402, %v541_v28   ;;  %v1084_v28 = vld [vmem:[%s1832_s7 + $0x18] sm:$0xff] }
 0x27e   : > { %1136 = vmatpush.msra.mxu2 %v1084_v28 }
 0x2b5   : > { %v718_v29 = vpop.xlane.xlu1 %717 }
 0x2b6   : > { %1414 = vrcp.f32 %v718_v29  ;;  %v730_v33 = vand.u32 2147483648, %v718_v29  ;;  %v728_v35 = vand.u32 2147483647, %v718_v29  ;;  %vm724_vm3 = vweird.f32 %v718_v29 }
 0x2b8   : > { %v731_v37 = vor.u32 1.1754944e-38, %v730_v33  ;;  %vm729_vm5 = vcmp.eq.f32.partialorder %v728_v35, 8.507059e+37  ;;  %v1403_v35 = vld [vmem:[%s1833_s8] ss:$0 sm:$0xff] }
 0x2bc   : > { %v1415_v30 = vpop.eup %1414 }
 0x2bd   : > { %v720_v31 = vmul.f32 %v1415_v30, %v718_v29  ;;  %vm725_vm2 = vweird.f32 %v1415_v30  ;;  %v1082_v29 = vld [vmem:[%s1832_s7 + $0x8] sm:$0xff] }
 0x2be   : > { %vm726_vm4 = vmor %vm724_vm3, %vm725_vm2 }
 0x2bf   : > { %v721_v32 = vsub.f32 1.0, %v720_v31 }
 0x2c1   : > { %v722_v34 = vmul.f32 %v1415_v30, %v721_v32 }
 0x2c3   : > { %v723_v36 = vadd.f32 %v1415_v30, %v722_v34 }
 0x2c5   : > { %v727_v38 = vsel %vm726_vm4, %v1415_v30, %v723_v36  ;;  %v1081_v30 = vld [vmem:[%s1832_s7] sm:$0xff] }
 0x2c6   : > { %v732_v39 = vsel %vm729_vm5, %v731_v37, %v727_v38 }
 0x2c7   : > { %v733_v40 = vmul.f32 %v1407_v7, %v732_v39 }
 0x2c8   : > { %v825_v41 = vpop.xlane.xlu2 %824 }
 0x2c9   : > { %1416 = vrcp.f32 %v825_v41  ;;  %1324 = vmatpush.xpose.msk.msrb.mxu3 %vm684_vm1, %v733_v40  ;;  %v837_v49 = vand.u32 2147483648, %v825_v41  ;;  %v835_v51 = vand.u32 2147483647, %v825_v41  ;;  %vm831_vm7 = vweird.f32 %v825_v41 }
 0x2ca   : > { %v1507_v40 = vmov 32.0  }
 0x2cb   : > { %v838_v54 = vor.u32 1.1754944e-38, %v837_v49  ;;  %vm836_vm9 = vcmp.eq.f32.partialorder %v835_v51, 8.507059e+37 }
 0x2cd   : > { %v566_v43 = vpop.permute.xlu1 %565 }
 0x2ce   : > { %v640_v44 = vadd.f32 %v639_v42, %v566_v43 }
 0x2cf   : > { %v1417_v45 = vpop.eup %1416 }
 0x2d0   : > { %v827_v46 = vmul.f32 %v1417_v45, %v825_v41  ;;  %1325 = vmatmul.msk.f32.vlgmr.msrb.gmra.mxu3 %vm684_vm1, %v640_v44  ;;  %v932_v47 = vpop.xlane.xlu0 %931  ;;  %vm832_vm6 = vweird.f32 %v1417_v45 }
 0x2d1   : > { %1418 = vrcp.f32 %v932_v47  ;;  %vm833_vm8 = vmor %vm831_vm7, %vm832_vm6  ;;  %v944_v61 = vand.u32 2147483648, %v932_v47  ;;  %v942_v63 = vand.u32 2147483647, %v932_v47  ;;  %vm938_vm11 = vweird.f32 %v932_v47 }
 0x2d2   : > { %v828_v48 = vsub.f32 1.0, %v827_v46 }
 0x2d3   : > { %v945_v2 = vor.u32 1.1754944e-38, %v944_v61  ;;  %vm943_vm13 = vcmp.eq.f32.partialorder %v942_v63, 8.507059e+37  ;;  %v1405_v63 = vld [vmem:[%s1835_s10] ss:$0 sm:$0xff] }
 0x2d4   : > { %v829_v50 = vmul.f32 %v1417_v45, %v828_v48 }
 0x2d5   : > { %v581_v24 = vpop.permute.xlu1 %580 }
 0x2d6   : > { %v830_v52 = vadd.f32 %v1417_v45, %v829_v50  ;;  %v649_v26 = vadd.f32 %v648_v23, %v581_v24 }
 0x2d7   : > { %v1419_v53 = vpop.eup %1418 }
 0x2d8   : > { %v834_v55 = vsel %vm833_vm8, %v1417_v45, %v830_v52  ;;  %v934_v56 = vmul.f32 %v1419_v53, %v932_v47  ;;  %v1039_v57 = vpop.xlane.xlu2 %1038  ;;  %vm939_vm10 = vweird.f32 %v1419_v53 }
 0x2d9   : > { %v839_v58 = vsel %vm836_vm9, %v838_v54, %v834_v55  ;;  %1420 = vrcp.f32 %v1039_v57  ;;  %vm940_vm12 = vmor %vm938_vm11, %vm939_vm10  ;;  %v1051_v10 = vand.u32 2147483648, %v1039_v57  ;;  %v1049_v13 = vand.u32 2147483647, %v1039_v57 }
 0x2da   : > { %v935_v59 = vsub.f32 1.0, %v934_v56  ;;  %v840_v60 = vmul.f32 %v1727_v15, %v839_v58  ;;  %vm1045_vm15 = vweird.f32 %v1039_v57  ;;  %1422 = vrcp.f32 %v1507_v40 }
 0x2db   : > { %v1052_v16 = vor.u32 1.1754944e-38, %v1051_v10  ;;  %vm1050_vm3 = vcmp.eq.f32.partialorder %v1049_v13, 8.507059e+37 }
 0x2dc   : > { %v936_v62 = vmul.f32 %v1419_v53, %v935_v59  ;;  %1327 = vmatpush.xpose.msk.msra.mxu3 %vm684_vm1, %v840_v60  ;;  %v1404_v60 = vld [vmem:[%s1834_s9] ss:$0 sm:$0xff] }
 0x2de   : > { %v937_v0 = vadd.f32 %v1419_v53, %v936_v62 }
 0x2df   : > { %v1421_v1 = vpop.eup %1420 }
 0x2e0   : > { %v941_v5 = vsel %vm940_vm12, %v1419_v53, %v937_v0  ;;  %v1041_v6 = vmul.f32 %v1421_v1, %v1039_v57  ;;  %vm1046_vm14 = vweird.f32 %v1421_v1  ;;  %v576_v20 = vpop.permute.xlu2 %575  ;;  %v1423_v41 = vpop.eup %1422 }
 0x2e1   : > { %v946_v7 = vsel %vm943_vm13, %v945_v2, %v941_v5  ;;  %vm1047_vm2 = vmor %vm1045_vm15, %vm1046_vm14  ;;  %v646_v22 = vadd.f32 %v645_v19, %v576_v20  ;;  %v1149_v42 = vmul.f32 32.0, %v1423_v41 }
 0x2e2   : > { %v1042_v8 = vsub.f32 1.0, %v1041_v6  ;;  %v947_v9 = vmul.f32 %v1734_v21, %v946_v7 }
 0x2e3   : > { %v571_v11 = vpop.permute.xlu0 %570  ;;  %v1150_v43 = vsub.f32 1.0, %v1149_v42 }
 0x2e4   : > { %v1043_v12 = vmul.f32 %v1421_v1, %v1042_v8  ;;  %v643_v14 = vadd.f32 %v642_v4, %v571_v11  ;;  %1330 = vmatpush.xpose.msk.msrb.mxu3 %vm684_vm1, %v947_v9 }
 0x2e5   : > { %v1151_v44 = vmul.f32 %v1423_v41, %v1150_v43 }
 0x2e6   : > { %v1044_v15 = vadd.f32 %v1421_v1, %v1043_v12  ;;  %1328 = vmatmul.msk.f32.vlgmr.msra.gmra.mxu3 %vm684_vm1, %v643_v14 }
 0x2e7   : > { %v1152_v45 = vadd.f32 %v1423_v41, %v1151_v44 }
 0x2e8   : > { %v1048_v17 = vsel %vm1047_vm2, %v1421_v1, %v1044_v15 }
 0x2e9   : > { %v1053_v18 = vsel %vm1050_vm3, %v1052_v16, %v1048_v17 }
 0x2ea   : > { %v1054_v21 = vmul.f32 %v1741_v25, %v1053_v18  ;;  %v1083_v25 = vld [vmem:[%s1832_s7 + $0x10] sm:$0xff] }
 0x2eb   : > { %1137 = vmatpush.msra.mxu2 %v1083_v25 }
 0x2ec   : > { %1333 = vmatpush.xpose.msk.msra.mxu3 %vm684_vm1, %v1054_v21 }
 0x2ed   : > { %1138 = vmatpush.msra.mxu2 %v1082_v29 }
 0x2ee   : > { %1331 = vmatmul.msk.f32.vlgmr.msrb.gmra.mxu3 %vm684_vm1, %v646_v22 }
 0x2ef   : > { %1139 = vmatpush.msra.mxu2 %v1081_v30 }
 0x2f6   : > { %1334 = vmatmul.msk.f32.vlgmr.msra.gmra.mxu3 %vm684_vm1, %v649_v26  ;;  %vm1153_vm1 = vweird.f32 %v1423_v41 }
 0x2f7   : > { %v1154_v46 = vsel %vm1153_vm1, %v1423_v41, %v1152_v45 }
 0x353   : > { %v757_v27 = vpop.f32.mrf.mxu3 }
 0x354   : > { %1089 = vxpose.xlu0.b32.start [1/4] (short) (narrow) %v757_v27, 8 }
 0x369   : > { %v864_v31 = vpop.f32.mrf.mxu3 }
 0x36a   : > { %1090 = vxpose.xlu0.b32.cont [2/4] (short) (narrow) %v864_v31, 8 }
 0x371   : > { %v971_v32 = vpop.f32.mrf.mxu3 }
 0x372   : > { %1091 = vxpose.xlu0.b32.cont [3/4] (short) (narrow) %v971_v32, 8 }
 0x379   : > { %v1078_v33 = vpop.f32.mrf.mxu3 }
 0x37a   : > { %1092 = vxpose.xlu0.b32.end [4/4] (short) (narrow) %v1078_v33, 8 }
 0x406   : > { %v1105_v34 = vpop.trf.xlu0 }
 0x407   : > { %1335 = vmatmul.msk.f32.vlgmr.msra.gmra.mxu2 %vm482_vm0, %v1105_v34 }
 0x48a   : > { %v1141_v36 = vpop.f32.mrf.mxu2 }
 0x48b   : > { %v1142_v37 = vadd.f32 %v1403_v35, %v1141_v36 }
 0x48d   : > { %v1144_v38 = vadd.f32 %v1142_v37, %v1637_v3 }
 0x48f   : > { %v1145_v39 = vsel %vm482_vm0, %v1144_v38, 0.0 }
 0x490   : > { %1146 = vadd.xlane.f32.xlu1 %v1145_v39 }
 0x503   : > { %v1147_v47 = vpop.xlane.xlu1 %1146 }
 0x504   : > { %v1155_v48 = vmul.f32 %v1154_v46, %v1147_v47 }
 0x506   : > { %v1156_v49 = vsub.f32 %v1144_v38, %v1155_v48 }
 0x508   : > { %v1157_v50 = vmul.f32 %v1156_v49, %v1156_v49 }
 0x50a   : > { %v1158_v3 = vsel %vm482_vm0, %v1157_v50, 0.0 }
 0x50b   : > { %1159 = vadd.xlane.f32.xlu2 %v1158_v3 }
 0x57e   : > { %v1160_v51 = vpop.xlane.xlu2 %1159 }
 0x57f   : > { %v1161_v52 = vmul.f32 %v1160_v51, %v1154_v46 }
 0x581   : > { %v1162_v53 = vadd.f32 1e-05, %v1161_v52 }
 0x583   : > { %1424 = vrsqrt.f32 %v1162_v53  ;;  %vm1169_vm5 = vweird.f32 %v1162_v53 }
 0x589   : > { %v1425_v54 = vpop.eup %1424 }
 0x58a   : > { %v1164_v55 = vmul.f32 %v1425_v54, %v1162_v53  ;;  %vm1170_vm4 = vweird.f32 %v1425_v54 }
 0x58b   : > { %vm1171_vm6 = vmor %vm1169_vm5, %vm1170_vm4 }
 0x58c   : > { %v1165_v56 = vmul.f32 %v1425_v54, %v1164_v55 }
 0x58e   : > { %v1166_v57 = vmul.f32 0.5, %v1165_v56 }
 0x590   : > { %v1167_v58 = vsub.f32 1.5, %v1166_v57 }
 0x592   : > { %v1168_v59 = vmul.f32 %v1425_v54, %v1167_v58 }
 0x594   : > { %v1172_v61 = vsel %vm1171_vm6, %v1425_v54, %v1168_v59 }
 0x595   : > { %v1173_v62 = vmul.f32 %v1172_v61, %v1156_v49 }
 0x597   : > { %v1178_v0 = vmul.f32 %v1404_v60, %v1173_v62 }
 0x599   : > { %v1183_v1 = vadd.f32 %v1405_v63, %v1178_v0 }
 0x59b   : > { %1184 = vst.msk [vmem:[%s433_s16] sm:$0xff] %vm482_vm0, %v1183_v1 }
 0x59c   : > { %1453 = shalt.err (!%p1450_p5)
}
 0x59d   : > { %1342 = dma.vmem_to_hbm [thread:$0]  (%p1608_p4), %s1200_s20, 128, %s1202_s0, %s1186_s12  }
 0x59e PF: > { %p1348_p6 = scmp.ge.s32.totalorder %s1504_s22, 2  ;;  %s1213_s24 = sand.u32 1, %s1484_s17  }
 0x59f   : > { %s1214_s15 = scalar_lea.sflag [#allocation3], %s1213_s24 }
 0x5a0   : > { %p1345_p7 = pnand %p1348_p6, %p1615_p8 }
 0x5a2   : > { %p1346_p9 = pneg %p1345_p7 }
 0x5a4   : > { %1479 = dma.done.wait (%p1346_p9), %s1214_s15, 128  }
 0x5a5   : > { %1481 = vsyncadd (%p1346_p9), %s1214_s15, 4294967168  ;;  %s24_s22 = sadd.s32 1, %s1504_s22   ;;  %s1845_s20 = sld [smem:[#allocation5_spill]] }
 0x5a6   : > { %p21_p10 = scmp.ge.s32.totalorder %s24_s22, 4   ;;  %s1846_s21 = sld [smem:[#allocation6_spill]] }
 0x5a7   : > { %s1847_s17 = smov %s1488_s18  ;;  %s1848_s18 = smov %s1492_s19 }
 0x5a8   : > { %s1849_s19 = smov %s1621_s30  ;;  %23 = sbr.rel (!%p21_p10) target bundleno = 6 (0x6), region = 105 }
 0x5ad   :  { %1220 = vsyncpa [#allocation3], 1 }
 0x5ae   :  { %1222 = vsyncpa [#allocation3 + $0x1], 1 }

</bundles_post_ra>
